<compile_context>
chip_gen: v5e
topology: v5e:2x2
jax: 0.10.0
libtpu: 0.0.40
codegen_flags: <defaults>
</compile_context>

<pallas_src>
import functools

import jax
import jax.numpy as jnp
from jax import lax
from jax.experimental import pallas as pl
from jax.experimental.pallas import tpu as pltpu

EPS = 1e-5  # nn.BatchNorm2d default eps


def _conv3x3_tile(x_ref, w_ref, *, H, W, Cin, Coutp):
    """3x3 conv of one padded image tile as 9 accumulated MXU matmuls.

    x_ref: (H+2, W+2, Cin) bf16 ref (zero-padded image, NHWC)
    w_ref: (9, Cin, Coutp) bf16 ref (tap-major weights, tap = dy*3 + dx)
    returns: (H*W, Coutp) float32 accumulator.
    """
    acc = jnp.zeros((H * W, Coutp), jnp.float32)
    for dy in range(3):
        for dx in range(3):
            patch = x_ref[dy:dy + H, dx:dx + W, :]            # (H, W, Cin), static slice
            # Layout no-op when W is a multiple of the sublane tile (8 f32 / 16 bf16).
            patch = patch.reshape(H * W, Cin)
            acc = acc + jnp.dot(patch, w_ref[dy * 3 + dx],
                                preferred_element_type=jnp.float32)
    return acc


def _stats_kernel(x_ref, w_ref, stats_ref, *, H, W, Cin, Coutp):
    """Pass 1: conv + accumulate per-channel sum / sum-of-squares over the whole batch."""
    @pl.when(pl.program_id(0) == 0)
    def _():
        stats_ref[...] = jnp.zeros_like(stats_ref)

    acc = _conv3x3_tile(x_ref, w_ref, H=H, W=W, Cin=Cin, Coutp=Coutp)
    # Exact f32 sums of the f32 accumulator; E[x^2]-mu^2 is finalized in f32 in the
    # wrapper (conv activations are O(1) here; use Welford/two-pass if means get huge).
    stats_ref[0:1, :] += jnp.sum(acc, axis=0, keepdims=True)
    stats_ref[1:2, :] += jnp.sum(acc * acc, axis=0, keepdims=True)


def _norm_kernel(x_ref, w_ref, scale_ref, shift_ref, out_ref, *, H, W, Cin, Coutp):
    """Pass 2: recompute conv, apply fused BN affine (scale/shift) + ReLU."""
    acc = _conv3x3_tile(x_ref, w_ref, H=H, W=W, Cin=Cin, Coutp=Coutp)
    y = acc * scale_ref[...] + shift_ref[...]
    out_ref[...] = jnp.maximum(y, 0.0).astype(out_ref.dtype)


def single_conv(x_nchw, w_oihw, gamma, beta):
    """Forward pass of SingleConv. x_nchw: (N, Cin, H, W); w_oihw: (Cout, Cin, 3, 3)."""
    N, Cin, H, W = x_nchw.shape
    Cout = w_oihw.shape[0]
    Coutp = ((Cout + 127) // 128) * 128      # lane-dense output / dense MXU columns
    HW = H * W
    M = N * HW
    Hp, Wp = H + 2, W + 2
    vmem_limit = 32 * 1024 * 1024            # fits v5e/v6e/v7x; re-derive for huge tiles

    # --- glue (plain JAX): layout + zero padding, bf16 for the MXU ---
    x = jnp.transpose(x_nchw, (0, 2, 3, 1))                               # NHWC
    xp = jnp.pad(x, ((0, 0), (1, 1), (1, 1), (0, 0))).astype(jnp.bfloat16)

    # (Cout, Cin, 3, 3) -> (3, 3, Cin, Cout) -> (9, Cin, Coutp), zero-padded, bf16.
    w = jnp.transpose(w_oihw, (2, 3, 1, 0)).reshape(9, Cin, Cout)
    w = jnp.pad(w, ((0, 0), (0, 0), (0, Coutp - Cout))).astype(jnp.bfloat16)

    x_spec = pl.BlockSpec((None, Hp, Wp, Cin), lambda n: (n, 0, 0, 0))
    w_spec = pl.BlockSpec((9, Cin, Coutp), lambda n: (0, 0, 0))

    # --- pass 1: conv + BN statistics (shared accumulator -> "arbitrary" grid) ---
    stats = pl.pallas_call(
        functools.partial(_stats_kernel, H=H, W=W, Cin=Cin, Coutp=Coutp),
        out_shape=jax.ShapeDtypeStruct((2, Coutp), jnp.float32),
        grid=(N,),
        in_specs=[x_spec, w_spec],
        out_specs=pl.BlockSpec((2, Coutp), lambda n: (0, 0)),
        compiler_params=pltpu.CompilerParams(
            dimension_semantics=("arbitrary",),
            vmem_limit_bytes=vmem_limit),
    )(xp, w)

    # Finalize BN (tiny per-channel math; folded into a single scale/shift).
    mean = stats[0:1] / M
    var = stats[1:2] / M - mean * mean
    gamma_p = jnp.pad(gamma.astype(jnp.float32).reshape(1, Cout),
                      ((0, 0), (0, Coutp - Cout)))
    beta_p = jnp.pad(beta.astype(jnp.float32).reshape(1, Cout),
                     ((0, 0), (0, Coutp - Cout)))
    scale = gamma_p * lax.rsqrt(var + EPS)
    shift = beta_p - mean * scale

    # --- pass 2: recompute conv, normalize + ReLU (independent tiles -> "parallel") ---
    y = pl.pallas_call(
        functools.partial(_norm_kernel, H=H, W=W, Cin=Cin, Coutp=Coutp),
        out_shape=jax.ShapeDtypeStruct((N, HW, Coutp), jnp.float32),
        grid=(N,),
        in_specs=[x_spec, w_spec,
                  pl.BlockSpec((1, Coutp), lambda n: (0, 0)),
                  pl.BlockSpec((1, Coutp), lambda n: (0, 0))],
        out_specs=pl.BlockSpec((None, HW, Coutp), lambda n: (n, 0, 0)),
        compiler_params=pltpu.CompilerParams(
            dimension_semantics=("parallel",),
            vmem_limit_bytes=vmem_limit),
    )(xp, w, scale, shift)

    y = y.reshape(N, H, W, Coutp)[..., :Cout]
    return jnp.transpose(y, (0, 3, 1, 2))                                 # back to NCHW


def _reference(x_nchw, w_oihw, gamma, beta):
    conv = lax.conv_general_dilated(
        x_nchw, w_oihw, window_strides=(1, 1), padding=((1, 1), (1, 1)),
        dimension_numbers=("NCHW", "OIHW", "NCHW"))
    mean = jnp.mean(conv, axis=(0, 2, 3), keepdims=True)
    var = jnp.mean((conv - mean) ** 2, axis=(0, 2, 3), keepdims=True)
    y = (conv - mean) * lax.rsqrt(var + EPS)
    y = y * gamma.reshape(1, -1, 1, 1) + beta.reshape(1, -1, 1, 1)
    return jnp.maximum(y, 0.0)


if __name__ == "__main__":
    N, Cin, Cout, H, W = 2, 4, 8, 16, 16
    key = jax.random.PRNGKey(0)
    kx, kw = jax.random.split(key)

    x = jax.random.normal(kx, (N, Cin, H, W), dtype=jnp.float32)
    # Deterministic Kaiming-style init for Conv2d weight (bias=False).
    fan_in = Cin * 3 * 3
    w = jax.random.normal(kw, (Cout, Cin, 3, 3), dtype=jnp.float32) * jnp.sqrt(2.0 / fan_in)
    # BatchNorm2d default affine init: weight=1, bias=0.
    gamma = jnp.ones((Cout,), dtype=jnp.float32)
    beta = jnp.zeros((Cout,), dtype=jnp.float32)

    out = single_conv(x, w, gamma, beta)
    out = jax.block_until_ready(out)

    ref = _reference(x, w, gamma, beta)
    assert out.shape == (N, Cout, H, W)
    # Tolerance loosened vs the f32 reference because matmul inputs are fed to the MXU
    # in bf16 (accumulation and BN math stay f32).
    assert jnp.allclose(out, ref, rtol=2e-2, atol=2e-2), float(jnp.max(jnp.abs(out - ref)))

    print("KERNEL_OK")
</pallas_src>

<mosaic_0001>
module attributes {stable_mosaic.version = 11 : i64} {
  func.func @_stats_kernel(%arg0: i32, %arg1: memref<1x18x18x4xbf16, #tpu.memory_space<vmem>>, %arg2: memref<9x4x128xbf16, #tpu.memory_space<vmem>>, %arg3: memref<2x128xf32, #tpu.memory_space<vmem>>) attributes {dimension_semantics = [#tpu.dimension_semantics<arbitrary>], iteration_bounds = array<i64: 2>, scalar_prefetch = 0 : i64, scratch_operands = 0 : i64, tpu.core_type = #tpu.core_type<tc>, window_params = [{transform_indices = @transform_0, window_bounds = array<i64: 1, 18, 18, 4>}, {pipeline_mode = #tpu.pipeline_mode<synchronous>, transform_indices = @transform_1, window_bounds = array<i64: 9, 4, 128>}, {pipeline_mode = #tpu.pipeline_mode<synchronous>, transform_indices = @transform_2, window_bounds = array<i64: 2, 128>}]} {
    %c0_i32 = arith.constant 0 : i32
    %0 = arith.cmpi eq, %arg0, %c0_i32 : i32
    %1 = arith.extui %0 : i1 to i32
    %c0_i32_0 = arith.constant 0 : i32
    %2 = arith.cmpi ne, %1, %c0_i32_0 : i32
    scf.if %2 {
      %cst_74 = arith.constant 0.000000e+00 : f32
      %78 = vector.broadcast %cst_74 : f32 to vector<2x128xf32>
      %c0_75 = arith.constant 0 : index
      %c0_76 = arith.constant 0 : index
      %79 = vector.load %arg3[%c0_75, %c0_76] : memref<2x128xf32, #tpu.memory_space<vmem>>, vector<2x128xf32>
      tpu.vector_store %arg3[%c0_75, %c0_76], %78 {strides = array<i32>} : memref<2x128xf32, #tpu.memory_space<vmem>>, vector<2x128xf32>,
    } else {
    }
    %cst = arith.constant 0.000000e+00 : f32
    %3 = vector.broadcast %cst : f32 to vector<256x128xf32>
    %c0 = arith.constant 0 : index
    %c0_1 = arith.constant 0 : index
    %c0_2 = arith.constant 0 : index
    %c0_3 = arith.constant 0 : index
    %4 = vector.load %arg1[%c0, %c0_1, %c0_2, %c0_3] : memref<1x18x18x4xbf16, #tpu.memory_space<vmem>>, vector<1x16x16x4xbf16>
    %5 = vector.shape_cast %4 : vector<1x16x16x4xbf16> to vector<16x16x4xbf16>
    %6 = vector.shape_cast %5 : vector<16x16x4xbf16> to vector<256x4xbf16>
    %c0_4 = arith.constant 0 : index
    %c0_5 = arith.constant 0 : index
    %c0_6 = arith.constant 0 : index
    %7 = vector.load %arg2[%c0_4, %c0_5, %c0_6] : memref<9x4x128xbf16, #tpu.memory_space<vmem>>, vector<1x4x128xbf16>
    %8 = vector.shape_cast %7 : vector<1x4x128xbf16> to vector<4x128xbf16>
    %cst_7 = arith.constant dense<0.000000e+00> : vector<256x128xf32>
    %9 = tpu.matmul %6, %8, %cst_7 {dimension_numbers = #tpu.dot_dimension_numbers<[1], [0], [0], [1], [0, 0, 1, 1], [], []>} : vector<256x4xbf16>, vector<4x128xbf16>, vector<256x128xf32> -> vector<256x128xf32>
    %10 = arith.addf %3, %9 : vector<256x128xf32>
    %c0_8 = arith.constant 0 : index
    %c0_9 = arith.constant 0 : index
    %c1 = arith.constant 1 : index
    %c0_10 = arith.constant 0 : index
    %11 = vector.load %arg1[%c0_8, %c0_9, %c1, %c0_10] : memref<1x18x18x4xbf16, #tpu.memory_space<vmem>>, vector<1x16x16x4xbf16>
    %12 = vector.shape_cast %11 : vector<1x16x16x4xbf16> to vector<16x16x4xbf16>
    %13 = vector.shape_cast %12 : vector<16x16x4xbf16> to vector<256x4xbf16>
    %c1_11 = arith.constant 1 : index
    %c0_12 = arith.constant 0 : index
    %c0_13 = arith.constant 0 : index
    %14 = vector.load %arg2[%c1_11, %c0_12, %c0_13] : memref<9x4x128xbf16, #tpu.memory_space<vmem>>, vector<1x4x128xbf16>
    %15 = vector.shape_cast %14 : vector<1x4x128xbf16> to vector<4x128xbf16>
    %cst_14 = arith.constant dense<0.000000e+00> : vector<256x128xf32>
    %16 = tpu.matmul %13, %15, %cst_14 {dimension_numbers = #tpu.dot_dimension_numbers<[1], [0], [0], [1], [0, 0, 1, 1], [], []>} : vector<256x4xbf16>, vector<4x128xbf16>, vector<256x128xf32> -> vector<256x128xf32>
    %17 = arith.addf %10, %16 : vector<256x128xf32>
    %c0_15 = arith.constant 0 : index
    %c0_16 = arith.constant 0 : index
    %c2 = arith.constant 2 : index
    %c0_17 = arith.constant 0 : index
    %18 = vector.load %arg1[%c0_15, %c0_16, %c2, %c0_17] : memref<1x18x18x4xbf16, #tpu.memory_space<vmem>>, vector<1x16x16x4xbf16>
    %19 = vector.shape_cast %18 : vector<1x16x16x4xbf16> to vector<16x16x4xbf16>
    %20 = vector.shape_cast %19 : vector<16x16x4xbf16> to vector<256x4xbf16>
    %c2_18 = arith.constant 2 : index
    %c0_19 = arith.constant 0 : index
    %c0_20 = arith.constant 0 : index
    %21 = vector.load %arg2[%c2_18, %c0_19, %c0_20] : memref<9x4x128xbf16, #tpu.memory_space<vmem>>, vector<1x4x128xbf16>
    %22 = vector.shape_cast %21 : vector<1x4x128xbf16> to vector<4x128xbf16>
    %cst_21 = arith.constant dense<0.000000e+00> : vector<256x128xf32>
    %23 = tpu.matmul %20, %22, %cst_21 {dimension_numbers = #tpu.dot_dimension_numbers<[1], [0], [0], [1], [0, 0, 1, 1], [], []>} : vector<256x4xbf16>, vector<4x128xbf16>, vector<256x128xf32> -> vector<256x128xf32>
    %24 = arith.addf %17, %23 : vector<256x128xf32>
    %c0_22 = arith.constant 0 : index
    %c1_23 = arith.constant 1 : index
    %c0_24 = arith.constant 0 : index
    %c0_25 = arith.constant 0 : index
    %25 = vector.load %arg1[%c0_22, %c1_23, %c0_24, %c0_25] : memref<1x18x18x4xbf16, #tpu.memory_space<vmem>>, vector<1x16x16x4xbf16>
    %26 = vector.shape_cast %25 : vector<1x16x16x4xbf16> to vector<16x16x4xbf16>
    %27 = vector.shape_cast %26 : vector<16x16x4xbf16> to vector<256x4xbf16>
    %c3 = arith.constant 3 : index
    %c0_26 = arith.constant 0 : index
    %c0_27 = arith.constant 0 : index
    %28 = vector.load %arg2[%c3, %c0_26, %c0_27] : memref<9x4x128xbf16, #tpu.memory_space<vmem>>, vector<1x4x128xbf16>
    %29 = vector.shape_cast %28 : vector<1x4x128xbf16> to vector<4x128xbf16>
    %cst_28 = arith.constant dense<0.000000e+00> : vector<256x128xf32>
    %30 = tpu.matmul %27, %29, %cst_28 {dimension_numbers = #tpu.dot_dimension_numbers<[1], [0], [0], [1], [0, 0, 1, 1], [], []>} : vector<256x4xbf16>, vector<4x128xbf16>, vector<256x128xf32> -> vector<256x128xf32>
    %31 = arith.addf %24, %30 : vector<256x128xf32>
    %c0_29 = arith.constant 0 : index
    %c1_30 = arith.constant 1 : index
    %c1_31 = arith.constant 1 : index
    %c0_32 = arith.constant 0 : index
    %32 = vector.load %arg1[%c0_29, %c1_30, %c1_31, %c0_32] : memref<1x18x18x4xbf16, #tpu.memory_space<vmem>>, vector<1x16x16x4xbf16>
    %33 = vector.shape_cast %32 : vector<1x16x16x4xbf16> to vector<16x16x4xbf16>
    %34 = vector.shape_cast %33 : vector<16x16x4xbf16> to vector<256x4xbf16>
    %c4 = arith.constant 4 : index
    %c0_33 = arith.constant 0 : index
    %c0_34 = arith.constant 0 : index
    %35 = vector.load %arg2[%c4, %c0_33, %c0_34] : memref<9x4x128xbf16, #tpu.memory_space<vmem>>, vector<1x4x128xbf16>
    %36 = vector.shape_cast %35 : vector<1x4x128xbf16> to vector<4x128xbf16>
    %cst_35 = arith.constant dense<0.000000e+00> : vector<256x128xf32>
    %37 = tpu.matmul %34, %36, %cst_35 {dimension_numbers = #tpu.dot_dimension_numbers<[1], [0], [0], [1], [0, 0, 1, 1], [], []>} : vector<256x4xbf16>, vector<4x128xbf16>, vector<256x128xf32> -> vector<256x128xf32>
    %38 = arith.addf %31, %37 : vector<256x128xf32>
    %c0_36 = arith.constant 0 : index
    %c1_37 = arith.constant 1 : index
    %c2_38 = arith.constant 2 : index
    %c0_39 = arith.constant 0 : index
    %39 = vector.load %arg1[%c0_36, %c1_37, %c2_38, %c0_39] : memref<1x18x18x4xbf16, #tpu.memory_space<vmem>>, vector<1x16x16x4xbf16>
    %40 = vector.shape_cast %39 : vector<1x16x16x4xbf16> to vector<16x16x4xbf16>
    %41 = vector.shape_cast %40 : vector<16x16x4xbf16> to vector<256x4xbf16>
    %c5 = arith.constant 5 : index
    %c0_40 = arith.constant 0 : index
    %c0_41 = arith.constant 0 : index
    %42 = vector.load %arg2[%c5, %c0_40, %c0_41] : memref<9x4x128xbf16, #tpu.memory_space<vmem>>, vector<1x4x128xbf16>
    %43 = vector.shape_cast %42 : vector<1x4x128xbf16> to vector<4x128xbf16>
    %cst_42 = arith.constant dense<0.000000e+00> : vector<256x128xf32>
    %44 = tpu.matmul %41, %43, %cst_42 {dimension_numbers = #tpu.dot_dimension_numbers<[1], [0], [0], [1], [0, 0, 1, 1], [], []>} : vector<256x4xbf16>, vector<4x128xbf16>, vector<256x128xf32> -> vector<256x128xf32>
    %45 = arith.addf %38, %44 : vector<256x128xf32>
    %c0_43 = arith.constant 0 : index
    %c2_44 = arith.constant 2 : index
    %c0_45 = arith.constant 0 : index
    %c0_46 = arith.constant 0 : index
    %46 = vector.load %arg1[%c0_43, %c2_44, %c0_45, %c0_46] : memref<1x18x18x4xbf16, #tpu.memory_space<vmem>>, vector<1x16x16x4xbf16>
    %47 = vector.shape_cast %46 : vector<1x16x16x4xbf16> to vector<16x16x4xbf16>
    %48 = vector.shape_cast %47 : vector<16x16x4xbf16> to vector<256x4xbf16>
    %c6 = arith.constant 6 : index
    %c0_47 = arith.constant 0 : index
    %c0_48 = arith.constant 0 : index
    %49 = vector.load %arg2[%c6, %c0_47, %c0_48] : memref<9x4x128xbf16, #tpu.memory_space<vmem>>, vector<1x4x128xbf16>
    %50 = vector.shape_cast %49 : vector<1x4x128xbf16> to vector<4x128xbf16>
    %cst_49 = arith.constant dense<0.000000e+00> : vector<256x128xf32>
    %51 = tpu.matmul %48, %50, %cst_49 {dimension_numbers = #tpu.dot_dimension_numbers<[1], [0], [0], [1], [0, 0, 1, 1], [], []>} : vector<256x4xbf16>, vector<4x128xbf16>, vector<256x128xf32> -> vector<256x128xf32>
    %52 = arith.addf %45, %51 : vector<256x128xf32>
    %c0_50 = arith.constant 0 : index
    %c2_51 = arith.constant 2 : index
    %c1_52 = arith.constant 1 : index
    %c0_53 = arith.constant 0 : index
    %53 = vector.load %arg1[%c0_50, %c2_51, %c1_52, %c0_53] : memref<1x18x18x4xbf16, #tpu.memory_space<vmem>>, vector<1x16x16x4xbf16>
    %54 = vector.shape_cast %53 : vector<1x16x16x4xbf16> to vector<16x16x4xbf16>
    %55 = vector.shape_cast %54 : vector<16x16x4xbf16> to vector<256x4xbf16>
    %c7 = arith.constant 7 : index
    %c0_54 = arith.constant 0 : index
    %c0_55 = arith.constant 0 : index
    %56 = vector.load %arg2[%c7, %c0_54, %c0_55] : memref<9x4x128xbf16, #tpu.memory_space<vmem>>, vector<1x4x128xbf16>
    %57 = vector.shape_cast %56 : vector<1x4x128xbf16> to vector<4x128xbf16>
    %cst_56 = arith.constant dense<0.000000e+00> : vector<256x128xf32>
    %58 = tpu.matmul %55, %57, %cst_56 {dimension_numbers = #tpu.dot_dimension_numbers<[1], [0], [0], [1], [0, 0, 1, 1], [], []>} : vector<256x4xbf16>, vector<4x128xbf16>, vector<256x128xf32> -> vector<256x128xf32>
    %59 = arith.addf %52, %58 : vector<256x128xf32>
    %c0_57 = arith.constant 0 : index
    %c2_58 = arith.constant 2 : index
    %c2_59 = arith.constant 2 : index
    %c0_60 = arith.constant 0 : index
    %60 = vector.load %arg1[%c0_57, %c2_58, %c2_59, %c0_60] : memref<1x18x18x4xbf16, #tpu.memory_space<vmem>>, vector<1x16x16x4xbf16>
    %61 = vector.shape_cast %60 : vector<1x16x16x4xbf16> to vector<16x16x4xbf16>
    %62 = vector.shape_cast %61 : vector<16x16x4xbf16> to vector<256x4xbf16>
    %c8 = arith.constant 8 : index
    %c0_61 = arith.constant 0 : index
    %c0_62 = arith.constant 0 : index
    %63 = vector.load %arg2[%c8, %c0_61, %c0_62] : memref<9x4x128xbf16, #tpu.memory_space<vmem>>, vector<1x4x128xbf16>
    %64 = vector.shape_cast %63 : vector<1x4x128xbf16> to vector<4x128xbf16>
    %cst_63 = arith.constant dense<0.000000e+00> : vector<256x128xf32>
    %65 = tpu.matmul %62, %64, %cst_63 {dimension_numbers = #tpu.dot_dimension_numbers<[1], [0], [0], [1], [0, 0, 1, 1], [], []>} : vector<256x4xbf16>, vector<4x128xbf16>, vector<256x128xf32> -> vector<256x128xf32>
    %66 = arith.addf %59, %65 : vector<256x128xf32>
    %c0_64 = arith.constant 0 : index
    %c0_65 = arith.constant 0 : index
    %67 = vector.load %arg3[%c0_64, %c0_65] : memref<2x128xf32, #tpu.memory_space<vmem>>, vector<1x128xf32>
    %cst_66 = arith.constant dense<0.000000e+00> : vector<128xf32>
    %68 = vector.multi_reduction <add>, %66, %cst_66 [0] : vector<256x128xf32> to vector<128xf32>
    %69 = vector.shape_cast %68 : vector<128xf32> to vector<1x128xf32>
    %70 = arith.addf %67, %69 : vector<1x128xf32>
    %c0_67 = arith.constant 0 : index
    %c0_68 = arith.constant 0 : index
    %71 = vector.load %arg3[%c0_67, %c0_68] : memref<2x128xf32, #tpu.memory_space<vmem>>, vector<1x128xf32>
    tpu.vector_store %arg3[%c0_67, %c0_68], %70 {strides = array<i32>} : memref<2x128xf32, #tpu.memory_space<vmem>>, vector<1x128xf32>,
    %c1_69 = arith.constant 1 : index
    %c0_70 = arith.constant 0 : index
    %72 = vector.load %arg3[%c1_69, %c0_70] : memref<2x128xf32, #tpu.memory_space<vmem>>, vector<1x128xf32>
    %73 = arith.mulf %66, %66 : vector<256x128xf32>
    %cst_71 = arith.constant dense<0.000000e+00> : vector<128xf32>
    %74 = vector.multi_reduction <add>, %73, %cst_71 [0] : vector<256x128xf32> to vector<128xf32>
    %75 = vector.shape_cast %74 : vector<128xf32> to vector<1x128xf32>
    %76 = arith.addf %72, %75 : vector<1x128xf32>
    %c1_72 = arith.constant 1 : index
    %c0_73 = arith.constant 0 : index
    %77 = vector.load %arg3[%c1_72, %c0_73] : memref<2x128xf32, #tpu.memory_space<vmem>>, vector<1x128xf32>
    tpu.vector_store %arg3[%c1_72, %c0_73], %76 {strides = array<i32>} : memref<2x128xf32, #tpu.memory_space<vmem>>, vector<1x128xf32>,
    return
  }
  func.func @transform_0(%arg0: i32) -> (i32, i32, i32, i32) {
    %c0_i32 = arith.constant 0 : i32
    %c0_i32_0 = arith.constant 0 : i32
    %c0_i32_1 = arith.constant 0 : i32
    %c0_i32_2 = arith.constant 0 : i32
    return %arg0, %c0_i32, %c0_i32_0, %c0_i32_1 : i32, i32, i32, i32
  }
  func.func @transform_1(%arg0: i32) -> (i32, i32, i32) {
    %c0_i32 = arith.constant 0 : i32
    %c0_i32_0 = arith.constant 0 : i32
    %c0_i32_1 = arith.constant 0 : i32
    %c0_i32_2 = arith.constant 0 : i32
    return %c0_i32, %c0_i32_0, %c0_i32_1 : i32, i32, i32
  }
  func.func @transform_2(%arg0: i32) -> (i32, i32) {
    %c0_i32 = arith.constant 0 : i32
    %c0_i32_0 = arith.constant 0 : i32
    %c0_i32_1 = arith.constant 0 : i32
    return %c0_i32, %c0_i32_0 : i32, i32
  }
}

</mosaic_0001>

<bundles_post_ra>
// kernel: tpu_custom_call.1
= control target key start
LH: loop header
LB: loop body
LE: loop exit
PB: predicated region body
PF: predicated region fallthrough
CT: control target
= control target key end

     0   :  { %7 = vsyncpa [#allocation3], 0  ;;  %s4976_s9 = smov 0   ;;  %s6311_s0 = inlined_call_operand.vmem [shape: bf16[2,18,18,4], index: 0, kind: input, shape index: {}]   ;;  %s6312_s1 = inlined_call_operand.vmem [shape: bf16[9,4,128], index: 1, kind: input, shape index: {}]   ;;  %s6313_s2 = inlined_call_operand.hbm [shape: f32[2,128], index: 2, kind: output, shape index: {}]  }
   0x1 LB: > { %s4982_s10 = sadd.s32 4294967295, %s4957_s9   ;;  %p4210_p0 = scmp.ge.s32.totalorder %s4957_s9, 1  ;;  %s4957_s9 = sphi %s4976_s9, %s13_s9  }
   0x2   : > { %p108_p1 = scmp.lt.s32.totalorder %s4957_s9, 3 }
   0x4   : > { %p109_p2 = pnand %p4210_p0, %p108_p1 }
   0x6   : > { %112 = sbr.rel (%p109_p2) target bundleno = 781 (0x30d), region = 28 }
   0xb   : > { %p125_p3 = scmp.lt.s32.totalorder %s4982_s10, 1  ;;  %p4212_p4 = scmp.ne.s32.totalorder %s4982_s10, 0 }
   0xd   : > { %s126_s11 = scalar_select %p125_p3, %s4982_s10, 1 }
   0xe   : > { %134 = sbr.rel (%p4212_p4) target bundleno = 21 (0x15), region = 32 }
   0xf   : > { %s4852_s12 = smul.u32 216, %s126_s11 }
  0x11   : > { %s4991_s15 = scalar_lea.vmem %s6311_s0, %s4852_s12 }
  0x13   : > { %v4959_v0 = vmov 0.0  }
  0x14   : > { %135 = vst [vmem:[#allocation2] sm:$0x3] %v4959_v0 }
  0x15 PF: > { %v4213_v1 = vld [vmem:[%s6312_s1 + $0x2] sm:$0x3]  ;;  %vm671_vm0 = vcmask 1041408   ;;  %v144_v2 = vld [vmem:[%s4991_s15 + $0x30] sm:$0xf]  ;;  %vm622_vm3 = vcmask 31744  }
  0x16   : > { %v673_v3 = vsel %vm671_vm0, %v4213_v1, 0  ;;  %v145_v4 = vld [vmem:[%s4991_s15 + $0x34] sm:$0xf]  ;;  %v173_v5 = vld [vmem:[%s4991_s15 + $0x38] sm:$0x1]  ;;  %v285_v6 = vshrl.u32 %v144_v2, 16 }
  0x17   : > { %4849 = vmatpush.bf16.msra.mxu1 %v673_v3  ;;  %4850 = vmatpush.bf16.msra.mxu2 %v673_v3  ;;  %vm185_vm1 = vsmask.f32 3328  ;;  %vm186_vm2 = vsmask.f32 7440  ;;  %v288_v7 = vshll.u32 %v144_v2, 16  ;;  %v294_v8 = vshll.u32 %v145_v4, 16 }
  0x18   : > { %4851 = vmatpush.bf16.msra.mxu3 %v673_v3  ;;  %682 = vmatpush.bf16.msra.mxu0 %v673_v3  ;;  %v287_v9 = vrot.slane %v285_v6, 4  ;;  %v298_v10 = vshrl.u32 %v145_v4, 16  ;;  %v304_v11 = vshll.u32 %v173_v5, 16  ;;  %v152_v12 = vld [vmem:[%s4991_s15 + $0x60] sm:$0xf]  ;;  %vm5007_vm4 = vmor %vm185_vm1, %vm186_vm2  ;;  %vm1032_vm5 = vcmask 1042432  }
  0x19   : > { %v290_v13 = vrot.slane %v288_v7, 5  ;;  %v296_v14 = vrot.slane %v294_v8, 5  ;;  %v153_v15 = vld [vmem:[%s4991_s15 + $0x64] sm:$0xf]  ;;  %v177_v16 = vld [vmem:[%s4991_s15 + $0x68] sm:$0x1] }
  0x1a   : > { %v300_v17 = vrot.slane %v298_v10, 4  ;;  %v381_v18 = vshrl.u32 %v152_v12, 16  ;;  %v384_v19 = vshll.u32 %v152_v12, 16  ;;  %v390_v21 = vshll.u32 %v153_v15, 16  ;;  %v160_v24 = vld [vmem:[%s4991_s15 + $0x90] sm:$0xf] }
  0x1b   : > { %v291_v20 = vor.u32 %v290_v13, %v287_v9  ;;  %v394_v22 = vshrl.u32 %v153_v15, 16  ;;  %v400_v23 = vshll.u32 %v177_v16, 16  ;;  %v306_v27 = vrot.slane %v304_v11, 5  ;;  %v161_v30 = vld [vmem:[%s4991_s15 + $0x94] sm:$0xf]  ;;  %s4960_s6 = smov [#allocation2]  }
  0x1c   : > { %v301_v26 = vor.u32 %v300_v17, %v296_v14  ;;  %v383_v28 = vrot.slane %v381_v18, 4  ;;  %v386_v29 = vrot.slane %v384_v19, 5  ;;  %v392_v32 = vrot.slane %v390_v21, 5  ;;  %v181_v41 = vld [vmem:[%s4991_s15 + $0x98] sm:$0x1]  ;;  %s4165_s7 = sshll.u32 %s4960_s6, 4  ;;  %s4166_s7 = int_to_ptr.vmem [resolvable:$true] %s4165_s7 }
  0x1d   : > { %v292_v31 = vrot.slane %v291_v20, 4  ;;  %v396_v33 = vrot.slane %v394_v22, 4  ;;  %v402_v34 = vrot.slane %v400_v23, 5  ;;  %v477_v37 = vshrl.u32 %v160_v24, 16  ;;  %v4326_v52 = vld [vmem:[%s6312_s1 + $0x4] sm:$0x3] }
  0x1e   : > { %v302_v35 = vrot.slane %v301_v26, 4  ;;  %v387_v36 = vor.u32 %v386_v29, %v383_v28  ;;  %v480_v38 = vshll.u32 %v160_v24, 16  ;;  %v486_v42 = vshll.u32 %v161_v30, 16  ;;  %v136_v56 = vld [vmem:[%s4991_s15] sm:$0xf]  ;;  %s4167_s12 = sshll.u32 %s6313_s2, 4  ;;  %s4168_s12 = int_to_ptr.hbm [resolvable:$true] %s4167_s12 }
  0x1f   : > { %v297_v39 = vsel %vm5007_vm4, %v292_v31, %v296_v14  ;;  %v397_v40 = vor.u32 %v396_v33, %v392_v32  ;;  %v490_v43 = vshrl.u32 %v161_v30, 16  ;;  %v479_v47 = vrot.slane %v477_v37, 4  ;;  %v5024_v57 = vld [vmem:[%s4991_s15 + $0x4] sm:$0xf]  ;;  %v5029_v62 = vld [vmem:[%s4991_s15 + $0x8] sm:$0x1] }
  0x20   : > { %v307_v44 = vsel %vm5007_vm4, %v302_v35, %v306_v27  ;;  %v582_v45 = vunpack.c.l.b16 %v297_v39  ;;  %v388_v46 = vrot.slane %v387_v36, 4  ;;  %v482_v50 = vrot.slane %v480_v38, 5  ;;  %v4375_v3 = vld [vmem:[%s6312_s1 + $0x6] sm:$0x3]  ;;  %v168_v8 = vld [vmem:[%s6312_s1] sm:$0x3] }
  0x21   : > { %v583_v48 = vunpack.c.l.b16 %v307_v44  ;;  %v398_v49 = vrot.slane %v397_v40, 4  ;;  %v488_v51 = vrot.slane %v486_v42, 5  ;;  %v492_v54 = vrot.slane %v490_v43, 4  ;;  %v4504_v13 = vld [vmem:[%s6312_s1 + $0x8] sm:$0x3]  ;;  %p4857_p5 = scmp.eq.s32.totalorder %s4982_s10, 1 }
  0x22   : > { %v393_v53 = vsel %vm5007_vm4, %v388_v46, %v392_v32  ;;  %v496_v55 = vshll.u32 %v181_v41, 16  ;;  %v483_v61 = vor.u32 %v482_v50, %v479_v47  ;;  %v1246_v2 = vsel %vm671_vm0, %v4326_v52, 0  ;;  %v146_v18 = vld [vmem:[%s4991_s15 + $0x3c] sm:$0xf]  ;;  %v5052_v22 = vld [vmem:[%s4991_s15 + $0x40] sm:$0xf] }
  0x23   : > { %v610_v58 = vpack.c.b16 %v583_v48, %v582_v45  ;;  %v403_v59 = vsel %vm5007_vm4, %v398_v49, %v402_v34  ;;  %v590_v60 = vunpack.c.l.b16 %v393_v53  ;;  %v493_v0 = vor.u32 %v492_v54, %v488_v51  ;;  %1255 = vmatpush.bf16.msrb.mxu2 %v1246_v2  ;;  %v5056_v28 = vld [vmem:[%s4991_s15 + $0x44] sm:$0x1]  ;;  %v154_v33 = vld [vmem:[%s4991_s15 + $0x6c] sm:$0xf]  ;;  %v155_v42 = vld [vmem:[%s4991_s15 + $0x70] sm:$0xf] }
  0x24   : > { %v591_v63 = vunpack.c.l.b16 %v403_v59  ;;  %v498_v1 = vrot.slane %v496_v55, 5  ;;  %v484_v4 = vrot.slane %v483_v61, 4  ;;  %v189_v5 = vshrl.u32 %v136_v56, 16  ;;  %v178_v46 = vld [vmem:[%s4991_s15 + $0x74] sm:$0x1] }
  0x25   : > { %4218 = vmatmul.msk.bf16.vlgmr.msra.gmra.mxu1 %vm622_vm3, %v610_v58  ;;  %v192_v6 = vshll.u32 %v136_v56, 16  ;;  %v198_v7 = vshll.u32 %v5024_v57, 16  ;;  %v494_v10 = vrot.slane %v493_v0, 4  ;;  %v202_v11 = vshrl.u32 %v5024_v57, 16  ;;  %v162_v61 = vld [vmem:[%s4991_s15 + $0x9c] sm:$0xf] }
  0x26   : > { %v614_v9 = vpack.c.b16 %v591_v63, %v590_v60  ;;  %v208_v12 = vshll.u32 %v5029_v62, 16  ;;  %v489_v14 = vsel %vm5007_vm4, %v484_v4, %v488_v51  ;;  %v191_v15 = vrot.slane %v189_v5, 4  ;;  %v163_v2 = vld [vmem:[%s4991_s15 + $0xa0] sm:$0xf] }
  0x27   : > { %v194_v16 = vrot.slane %v192_v6, 5  ;;  %v200_v17 = vrot.slane %v198_v7, 5  ;;  %v499_v19 = vsel %vm5007_vm4, %v494_v10, %v498_v1  ;;  %v598_v20 = vunpack.c.l.b16 %v489_v14 }
  0x28   : > { %4222 = vmatmul.msk.bf16.vlgmr.msra.gmra.mxu2 %vm622_vm3, %v614_v9  ;;  %v204_v21 = vrot.slane %v202_v11, 4  ;;  %v599_v23 = vunpack.c.l.b16 %v499_v19  ;;  %v210_v26 = vrot.slane %v208_v12, 5  ;;  %v1533_v27 = vsel %vm671_vm0, %v4375_v3, 0  ;;  %v182_v9 = vld [vmem:[%s4991_s15 + $0xa4] sm:$0x1] }
  0x29   : > { %v195_v24 = vor.u32 %v194_v16, %v191_v15  ;;  %1542 = vmatpush.bf16.msrb.mxu3 %v1533_v27  ;;  %v893_v30 = vsel %vm671_vm0, %v168_v8, 0  ;;  %v2187_v31 = vsel %vm671_vm0, %v4504_v13, 0  ;;  %v309_v32 = vshrl.u32 %v146_v18, 16 }
  0x2a   : > { %v205_v29 = vor.u32 %v204_v21, %v200_v17  ;;  %v618_v34 = vpack.c.b16 %v599_v23, %v598_v20  ;;  %902 = vmatpush.bf16.msrb.mxu1 %v893_v30  ;;  %2196 = vmatpush.bf16.msrb.mxu0 %v2187_v31  ;;  %v312_v36 = vshll.u32 %v146_v18, 16  ;;  %v318_v37 = vshll.u32 %v5052_v22, 16  ;;  %v5083_v31 = vld [vmem:[%s4991_s15 + $0x10] sm:$0xf] }
  0x2b   : > { %v196_v35 = vrot.slane %v195_v24, 4  ;;  %v311_v39 = vrot.slane %v309_v32, 4  ;;  %v322_v40 = vshrl.u32 %v5052_v22, 16  ;;  %v328_v41 = vshll.u32 %v5056_v28, 16  ;;  %v5086_v32 = vld [vmem:[%s4991_s15 + $0x14] sm:$0x1] }
  0x2c   : > { %v206_v38 = vrot.slane %v205_v29, 4  ;;  %4226 = vmatmul.msk.bf16.vlgmr.msra.gmra.mxu3 %vm622_vm3, %v618_v34  ;;  %v314_v44 = vrot.slane %v312_v36, 5  ;;  %v320_v45 = vrot.slane %v318_v37, 5  ;;  %v405_v47 = vshrl.u32 %v154_v33, 16 }
  0x2d   : > { %v201_v43 = vsel %vm5007_vm4, %v196_v35, %v200_v17  ;;  %v324_v50 = vrot.slane %v322_v40, 4  ;;  %v330_v51 = vrot.slane %v328_v41, 5  ;;  %v408_v55 = vshll.u32 %v154_v33, 16 }
  0x2e   : > { %v211_v48 = vsel %vm5007_vm4, %v206_v38, %v210_v26  ;;  %v574_v49 = vunpack.c.l.b16 %v201_v43  ;;  %v315_v53 = vor.u32 %v314_v44, %v311_v39  ;;  %v407_v54 = vrot.slane %v405_v47, 4  ;;  %v138_v26 = vld [vmem:[%s4991_s15 + $0xc] sm:$0xf] }
  0x2f   : > { %v575_v52 = vunpack.c.l.b16 %v211_v48  ;;  %v325_v56 = vor.u32 %v324_v50, %v320_v45  ;;  %v414_v58 = vshll.u32 %v155_v42, 16  ;;  %v418_v59 = vshrl.u32 %v155_v42, 16  ;;  %v5098_v50 = vld [vmem:[%s4991_s15 + $0x4c] sm:$0xf] }
  0x30   : > { %v424_v60 = vshll.u32 %v178_v46, 16  ;;  %v316_v0 = vrot.slane %v315_v53, 4  ;;  %v410_v1 = vrot.slane %v408_v55, 5  ;;  %v501_v10 = vshrl.u32 %v162_v61, 16 }
  0x31   : > { %v606_v63 = vpack.c.b16 %v575_v52, %v574_v49  ;;  %v326_v3 = vrot.slane %v325_v56, 4  ;;  %v416_v4 = vrot.slane %v414_v58, 5  ;;  %v420_v5 = vrot.slane %v418_v59, 4  ;;  %v5102_v58 = vld [vmem:[%s4991_s15 + $0x50] sm:$0x1] }
  0x32   : > { %v426_v6 = vrot.slane %v424_v60, 5  ;;  %v321_v7 = vsel %vm5007_vm4, %v316_v0, %v320_v45  ;;  %v411_v8 = vor.u32 %v410_v1, %v407_v54  ;;  %v504_v11 = vshll.u32 %v162_v61, 16  ;;  %v148_v45 = vld [vmem:[%s4991_s15 + $0x48] sm:$0xf] }
  0x33   : > { %4214 = vmatmul.msk.bf16.vlgmr.msra.gmra.mxu0 %vm622_vm3, %v606_v63  ;;  %v331_v12 = vsel %vm5007_vm4, %v326_v3, %v330_v51  ;;  %v584_v13 = vunpack.c.l.b16 %v321_v7  ;;  %v421_v14 = vor.u32 %v420_v5, %v416_v4  ;;  %v510_v15 = vshll.u32 %v163_v2, 16 }
  0x34   : > { %v585_v16 = vunpack.c.l.b16 %v331_v12  ;;  %v412_v17 = vrot.slane %v411_v8, 4  ;;  %v503_v18 = vrot.slane %v501_v10, 4  ;;  %v506_v19 = vrot.slane %v504_v11, 5 }
  0x35   : > { %v422_v20 = vrot.slane %v421_v14, 4  ;;  %v512_v21 = vrot.slane %v510_v15, 5  ;;  %v514_v23 = vshrl.u32 %v163_v2, 16  ;;  %v520_v24 = vshll.u32 %v182_v9, 16  ;;  %v156_v2 = vld [vmem:[%s4991_s15 + $0x78] sm:$0xf] }
  0x36   : > { %v611_v27 = vpack.c.b16 %v585_v16, %v584_v13  ;;  %v417_v29 = vsel %vm5007_vm4, %v412_v17, %v416_v4  ;;  %v507_v30 = vor.u32 %v506_v19, %v503_v18  ;;  %v213_v39 = vshrl.u32 %v138_v26, 16  ;;  %v157_v14 = vld [vmem:[%s4991_s15 + $0x7c] sm:$0xf]  ;;  %v179_v15 = vld [vmem:[%s4991_s15 + $0x80] sm:$0x1] }
  0x37   : > { %v427_v33 = vsel %vm5007_vm4, %v422_v20, %v426_v6  ;;  %v592_v34 = vunpack.c.l.b16 %v417_v29  ;;  %v516_v35 = vrot.slane %v514_v23, 4  ;;  %v522_v36 = vrot.slane %v520_v24, 5 }
  0x38   : > { %4219 = vmatmul.msk.bf16.gmra.mxu1 %vm622_vm3, %v611_v27  ;;  %v593_v37 = vunpack.c.l.b16 %v427_v33  ;;  %v508_v38 = vrot.slane %v507_v30, 4  ;;  %v216_v40 = vshll.u32 %v138_v26, 16  ;;  %v222_v42 = vshll.u32 %v5083_v31, 16 }
  0x39   : > { %v517_v41 = vor.u32 %v516_v35, %v512_v21  ;;  %v226_v43 = vshrl.u32 %v5083_v31, 16  ;;  %v232_v44 = vshll.u32 %v5086_v32, 16  ;;  %v215_v48 = vrot.slane %v213_v39, 4 }
  0x3a   : > { %v615_v46 = vpack.c.b16 %v593_v37, %v592_v34  ;;  %v513_v47 = vsel %vm5007_vm4, %v508_v38, %v512_v21  ;;  %v218_v49 = vrot.slane %v216_v40, 5  ;;  %v224_v53 = vrot.slane %v222_v42, 5  ;;  %v164_v34 = vld [vmem:[%s4991_s15 + $0xa8] sm:$0xf]  ;;  %v165_v38 = vld [vmem:[%s4991_s15 + $0xac] sm:$0xf] }
  0x3b   : > { %v518_v51 = vrot.slane %v517_v41, 4  ;;  %v600_v52 = vunpack.c.l.b16 %v513_v47  ;;  %v228_v54 = vrot.slane %v226_v43, 4  ;;  %v234_v56 = vrot.slane %v232_v44, 5  ;;  %v183_v43 = vld [vmem:[%s4991_s15 + $0xb0] sm:$0x1] }
  0x3c   : > { %4223 = vmatmul.msk.bf16.gmra.mxu2 %vm622_vm3, %v615_v46  ;;  %v219_v55 = vor.u32 %v218_v49, %v215_v48  ;;  %v333_v59 = vshrl.u32 %v148_v45, 16  ;;  %v336_v60 = vshll.u32 %v148_v45, 16  ;;  %v342_v0 = vshll.u32 %v5098_v50, 16 }
  0x3d   : > { %v523_v61 = vsel %vm5007_vm4, %v518_v51, %v522_v36  ;;  %v229_v63 = vor.u32 %v228_v54, %v224_v53  ;;  %v346_v1 = vshrl.u32 %v5098_v50, 16  ;;  %v352_v10 = vshll.u32 %v5102_v58, 16 }
  0x3e   : > { %v601_v3 = vunpack.c.l.b16 %v523_v61  ;;  %v220_v4 = vrot.slane %v219_v55, 4  ;;  %v335_v5 = vrot.slane %v333_v59, 4  ;;  %v338_v6 = vrot.slane %v336_v60, 5 }
  0x3f   : > { %v230_v7 = vrot.slane %v229_v63, 4  ;;  %v344_v8 = vrot.slane %v342_v0, 5  ;;  %v348_v9 = vrot.slane %v346_v1, 4  ;;  %v429_v16 = vshrl.u32 %v156_v2, 16  ;;  %v5127_v1 = vld [vmem:[%s4991_s15 + $0x1c] sm:$0xf] }
  0x40   : > { %v619_v11 = vpack.c.b16 %v601_v3, %v600_v52  ;;  %v225_v12 = vsel %vm5007_vm4, %v220_v4, %v224_v53  ;;  %v339_v13 = vor.u32 %v338_v6, %v335_v5  ;;  %v354_v20 = vrot.slane %v352_v10, 5  ;;  %v140_v53 = vld [vmem:[%s4991_s15 + $0x18] sm:$0xf]  ;;  %v5133_v4 = vld [vmem:[%s4991_s15 + $0x20] sm:$0x1] }
  0x41   : > { %v235_v17 = vsel %vm5007_vm4, %v230_v7, %v234_v56  ;;  %v576_v18 = vunpack.c.l.b16 %v225_v12  ;;  %v349_v19 = vor.u32 %v348_v9, %v344_v8  ;;  %v431_v24 = vrot.slane %v429_v16, 4  ;;  %v150_v10 = vld [vmem:[%s4991_s15 + $0x54] sm:$0xf] }
  0x42   : > { %4227 = vmatmul.msk.bf16.gmra.mxu3 %vm622_vm3, %v619_v11  ;;  %v577_v21 = vunpack.c.l.b16 %v235_v17  ;;  %v340_v23 = vrot.slane %v339_v13, 4  ;;  %v432_v26 = vshll.u32 %v156_v2, 16  ;;  %v438_v29 = vshll.u32 %v157_v14, 16 }
  0x43   : > { %v350_v27 = vrot.slane %v349_v19, 4  ;;  %v442_v30 = vshrl.u32 %v157_v14, 16  ;;  %v448_v33 = vshll.u32 %v179_v15, 16  ;;  %v525_v47 = vshrl.u32 %v164_v34, 16 }
  0x44   : > { %v607_v35 = vpack.c.b16 %v577_v21, %v576_v18  ;;  %v345_v36 = vsel %vm5007_vm4, %v340_v23, %v344_v8  ;;  %v434_v37 = vrot.slane %v432_v26, 5  ;;  %v440_v41 = vrot.slane %v438_v29, 5  ;;  %v5142_v23 = vld [vmem:[%s4991_s15 + $0x58] sm:$0xf] }
  0x45   : > { %v355_v39 = vsel %vm5007_vm4, %v350_v27, %v354_v20  ;;  %v586_v40 = vunpack.c.l.b16 %v345_v36  ;;  %v444_v42 = vrot.slane %v442_v30, 4  ;;  %v450_v46 = vrot.slane %v448_v33, 5  ;;  %v5149_v33 = vld [vmem:[%s4991_s15 + $0x5c] sm:$0x1] }
  0x46   : > { %4215 = vmatmul.msk.bf16.gmra.mxu0 %vm622_vm3, %v607_v35  ;;  %v587_v44 = vunpack.c.l.b16 %v355_v39  ;;  %v435_v45 = vor.u32 %v434_v37, %v431_v24  ;;  %v528_v49 = vshll.u32 %v164_v34, 16  ;;  %v534_v51 = vshll.u32 %v165_v38, 16  ;;  %v158_v34 = vld [vmem:[%s4991_s15 + $0x84] sm:$0xf] }
  0x47   : > { %v445_v48 = vor.u32 %v444_v42, %v440_v41  ;;  %v538_v52 = vshrl.u32 %v165_v38, 16  ;;  %v527_v56 = vrot.slane %v525_v47, 4  ;;  %v544_v59 = vshll.u32 %v183_v43, 16 }
  0x48   : > { %v612_v54 = vpack.c.b16 %v587_v44, %v586_v40  ;;  %v436_v55 = vrot.slane %v435_v45, 4  ;;  %v530_v61 = vrot.slane %v528_v49, 5  ;;  %v536_v63 = vrot.slane %v534_v51, 5 }
  0x49   : > { %v446_v60 = vrot.slane %v445_v48, 4  ;;  %v540_v0 = vrot.slane %v538_v52, 4  ;;  %v546_v3 = vrot.slane %v544_v59, 5  ;;  %v237_v5 = vshrl.u32 %v140_v53, 16  ;;  %v159_v52 = vld [vmem:[%s4991_s15 + $0x88] sm:$0xf] }
  0x4a   : > { %4220 = vmatmul.msk.bf16.gmra.mxu1 %vm622_vm3, %v612_v54  ;;  %v441_v2 = vsel %vm5007_vm4, %v436_v55, %v440_v41  ;;  %v531_v8 = vor.u32 %v530_v61, %v527_v56  ;;  %v240_v13 = vshll.u32 %v140_v53, 16  ;;  %v246_v14 = vshll.u32 %v5127_v1, 16  ;;  %v180_v55 = vld [vmem:[%s4991_s15 + $0x8c] sm:$0x1] }
  0x4b   : > { %v451_v6 = vsel %vm5007_vm4, %v446_v60, %v450_v46  ;;  %v594_v7 = vunpack.c.l.b16 %v441_v2  ;;  %v541_v9 = vor.u32 %v540_v0, %v536_v63  ;;  %v239_v12 = vrot.slane %v237_v5, 4 }
  0x4c   : > { %v595_v11 = vunpack.c.l.b16 %v451_v6  ;;  %v532_v15 = vrot.slane %v531_v8, 4  ;;  %v250_v17 = vshrl.u32 %v5127_v1, 16  ;;  %v256_v18 = vshll.u32 %v5133_v4, 16 }
  0x4d   : > { %v542_v16 = vrot.slane %v541_v9, 4  ;;  %v242_v20 = vrot.slane %v240_v13, 5  ;;  %v248_v21 = vrot.slane %v246_v14, 5  ;;  %v357_v24 = vshrl.u32 %v150_v10, 16 }
  0x4e   : > { %v616_v19 = vpack.c.b16 %v595_v11, %v594_v7  ;;  %v537_v26 = vsel %vm5007_vm4, %v532_v15, %v536_v63  ;;  %v252_v29 = vrot.slane %v250_v17, 4  ;;  %v258_v30 = vrot.slane %v256_v18, 5  ;;  %v166_v7 = vld [vmem:[%s4991_s15 + $0xb4] sm:$0xf]  ;;  %v167_v15 = vld [vmem:[%s4991_s15 + $0xb8] sm:$0xf] }
  0x4f   : > { %v547_v27 = vsel %vm5007_vm4, %v542_v16, %v546_v3  ;;  %v602_v35 = vunpack.c.l.b16 %v537_v26  ;;  %v243_v37 = vor.u32 %v242_v20, %v239_v12  ;;  %v359_v38 = vrot.slane %v357_v24, 4 }
  0x50   : > { %4224 = vmatmul.msk.bf16.gmra.mxu2 %vm622_vm3, %v616_v19  ;;  %v603_v36 = vunpack.c.l.b16 %v547_v27  ;;  %v253_v39 = vor.u32 %v252_v29, %v248_v21  ;;  %v360_v40 = vshll.u32 %v150_v10, 16  ;;  %v366_v41 = vshll.u32 %v5142_v23, 16  ;;  %v184_v19 = vld [vmem:[%s4991_s15 + $0xbc] sm:$0x1] }
  0x51   : > { %v370_v42 = vshrl.u32 %v5142_v23, 16  ;;  %v244_v44 = vrot.slane %v243_v37, 4  ;;  %v376_v45 = vshll.u32 %v5149_v33, 16  ;;  %v453_v46 = vshrl.u32 %v158_v34, 16 }
  0x52   : > { %v620_v43 = vpack.c.b16 %v603_v36, %v602_v35  ;;  %v254_v47 = vrot.slane %v253_v39, 4  ;;  %v362_v48 = vrot.slane %v360_v40, 5  ;;  %v368_v49 = vrot.slane %v366_v41, 5  ;;  %v142_v36 = vld [vmem:[%s4991_s15 + $0x24] sm:$0xf] }
  0x53   : > { %v372_v51 = vrot.slane %v370_v42, 4  ;;  %v249_v53 = vsel %vm5007_vm4, %v244_v44, %v248_v21  ;;  %v378_v54 = vrot.slane %v376_v45, 5  ;;  %v455_v56 = vrot.slane %v453_v46, 4  ;;  %v5175_v41 = vld [vmem:[%s4991_s15 + $0x28] sm:$0xf] }
  0x54   : > { %4228 = vmatmul.msk.bf16.gmra.mxu3 %vm622_vm3, %v620_v43  ;;  %v456_v59 = vshll.u32 %v158_v34, 16  ;;  %v259_v60 = vsel %vm5007_vm4, %v254_v47, %v258_v30  ;;  %v578_v61 = vunpack.c.l.b16 %v249_v53  ;;  %v363_v63 = vor.u32 %v362_v48, %v359_v38  ;;  %v5178_v46 = vld [vmem:[%s4991_s15 + $0x2c] sm:$0x1] }
  0x55   : > { %v373_v0 = vor.u32 %v372_v51, %v368_v49  ;;  %v579_v2 = vunpack.c.l.b16 %v259_v60  ;;  %v462_v5 = vshll.u32 %v159_v52, 16  ;;  %v466_v6 = vshrl.u32 %v159_v52, 16 }
  0x56   : > { %v458_v3 = vrot.slane %v456_v59, 5  ;;  %v364_v8 = vrot.slane %v363_v63, 4  ;;  %v472_v10 = vshll.u32 %v180_v55, 16  ;;  %v549_v20 = vshrl.u32 %v166_v7, 16 }
  0x57   : > { %v374_v9 = vrot.slane %v373_v0, 4  ;;  %v608_v11 = vpack.c.b16 %v579_v2, %v578_v61  ;;  %v464_v13 = vrot.slane %v462_v5, 5  ;;  %v468_v14 = vrot.slane %v466_v6, 4  ;;  %v4456_v5 = vld [vmem:[%s4991_s15 + $0xc] sm:$0xf] }
  0x58   : > { %v459_v12 = vor.u32 %v458_v3, %v455_v56  ;;  %v369_v16 = vsel %vm5007_vm4, %v364_v8, %v368_v49  ;;  %v474_v18 = vrot.slane %v472_v10, 5  ;;  %v551_v29 = vrot.slane %v549_v20, 4 }
  0x59   : > { %v379_v17 = vsel %vm5007_vm4, %v374_v9, %v378_v54  ;;  %4216 = vmatmul.msk.bf16.gmra.mxu0 %vm622_vm3, %v608_v11  ;;  %v588_v21 = vunpack.c.l.b16 %v369_v16  ;;  %v469_v27 = vor.u32 %v468_v14, %v464_v13  ;;  %v552_v30 = vshll.u32 %v166_v7, 16  ;;  %v4602_v9 = vld [vmem:[%s6312_s1 + $0xc] sm:$0x3] }
  0x5a   : > { %v589_v24 = vunpack.c.l.b16 %v379_v17  ;;  %v460_v26 = vrot.slane %v459_v12, 4  ;;  %v558_v34 = vshll.u32 %v167_v15, 16  ;;  %v562_v35 = vshrl.u32 %v167_v15, 16 }
  0x5b   : > { %v470_v39 = vrot.slane %v469_v27, 4  ;;  %v568_v40 = vshll.u32 %v184_v19, 16  ;;  %v554_v43 = vrot.slane %v552_v30, 5  ;;  %v1040_v47 = vrot.slane %v5029_v62, 5  ;;  %v984_v62 = vld [vmem:[%s4991_s15] sm:$0xe] }
  0x5c   : > { %v613_v37 = vpack.c.b16 %v589_v24, %v588_v21  ;;  %v465_v38 = vsel %vm5007_vm4, %v460_v26, %v464_v13  ;;  %v560_v44 = vrot.slane %v558_v34, 5  ;;  %v564_v45 = vrot.slane %v562_v35, 4  ;;  %v4457_v13 = vld [vmem:[%s4991_s15 + $0x10] sm:$0xf] }
  0x5d   : > { %v596_v42 = vunpack.c.l.b16 %v465_v38  ;;  %v475_v48 = vsel %vm5007_vm4, %v470_v39, %v474_v18  ;;  %v570_v49 = vrot.slane %v568_v40, 5  ;;  %v261_v51 = vshrl.u32 %v142_v36, 16 }
  0x5e   : > { %4221 = vmatmul.msk.bf16.gmra.mxu1 %vm622_vm3, %v613_v37  ;;  %v597_v52 = vunpack.c.l.b16 %v475_v48  ;;  %v555_v53 = vor.u32 %v554_v43, %v551_v29  ;;  %v565_v54 = vor.u32 %v564_v45, %v560_v44  ;;  %v264_v55 = vshll.u32 %v142_v36, 16  ;;  %v4458_v37 = vld [vmem:[%s4991_s15 + $0x14] sm:$0x1] }
  0x5f   : > { %v263_v56 = vrot.slane %v261_v51, 4  ;;  %v270_v59 = vshll.u32 %v5175_v41, 16  ;;  %v274_v60 = vshrl.u32 %v5175_v41, 16  ;;  %v280_v61 = vshll.u32 %v5178_v46, 16 }
  0x60   : > { %v617_v63 = vpack.c.b16 %v597_v52, %v596_v42  ;;  %v556_v0 = vrot.slane %v555_v53, 4  ;;  %v566_v2 = vrot.slane %v565_v54, 4  ;;  %v266_v3 = vrot.slane %v264_v55, 5  ;;  %v4731_v42 = vld [vmem:[%s6312_s1 + $0xe] sm:$0x3] }
  0x61   : > { %v272_v6 = vrot.slane %v270_v59, 5  ;;  %v276_v7 = vrot.slane %v274_v60, 4  ;;  %v282_v8 = vrot.slane %v280_v61, 5  ;;  %vm1033_vm6 = vcmask 1046532   ;;  %v4553_v54 = vld [vmem:[%s6312_s1 + $0xa] sm:$0x3] }
  0x62   : > { %4225 = vmatmul.msk.bf16.gmra.mxu2 %vm622_vm3, %v617_v63  ;;  %v561_v10 = vsel %vm5007_vm4, %v556_v0, %v560_v44  ;;  %v571_v11 = vsel %vm5007_vm4, %v566_v2, %v570_v49  ;;  %v267_v12 = vor.u32 %v266_v3, %v263_v56  ;;  %vm5198_vm7 = vmor %vm1032_vm5, %vm1033_vm6  ;;  %v4310_v18 = vrot.slane %v984_v62, 9  ;;  %v4801_v49 = vld [vmem:[%s4991_s15] sm:$0xff]  ;;  %v4780_v55 = vld [vmem:[%s6312_s1 + $0x10] sm:$0x3] }
  0x63   : > { %v604_v14 = vunpack.c.l.b16 %v561_v10  ;;  %v605_v15 = vunpack.c.l.b16 %v571_v11  ;;  %v277_v16 = vor.u32 %v276_v7, %v272_v6  ;;  %v1037_v20 = vrot.slane %v5024_v57, 5  ;;  %v4459_v3 = vld [vmem:[%s4991_s15 + $0x18] sm:$0xf]  ;;  %v4460_v7 = vld [vmem:[%s4991_s15 + $0x1c] sm:$0xf] }
  0x64   : > { %v268_v19 = vrot.slane %v267_v12, 4  ;;  %v2872_v21 = vsel %vm671_vm0, %v4602_v9, 0  ;;  %v1705_v24 = vshrl.u32 %v4456_v5, 16  ;;  %v1708_v29 = vshll.u32 %v4456_v5, 16  ;;  %v985_v10 = vld [vmem:[%s4991_s15 + $0xc] sm:$0xe] }
  0x65   : > { %v621_v26 = vpack.c.b16 %v605_v15, %v604_v14  ;;  %v278_v27 = vrot.slane %v277_v16, 4  ;;  %2881 = vmatpush.bf16.msra.mxu2 %v2872_v21  ;;  %v1714_v30 = vshll.u32 %v4457_v13, 16  ;;  %v1038_v35 = vsel %vm5198_vm7, %v4310_v18, %v1037_v20  ;;  %v4817_v16 = vld [vmem:[%s4991_s15 + $0xc] sm:$0xff] }
  0x66   : > { %v273_v34 = vsel %vm5007_vm4, %v268_v19, %v272_v6  ;;  %v1039_v36 = vrot.slane %v1037_v20, 4  ;;  %v1707_v38 = vrot.slane %v1705_v24, 4  ;;  %v1710_v40 = vrot.slane %v1708_v29, 5 }
  0x67   : > { %4229 = vmatmul.msk.bf16.gmra.mxu3 %vm622_vm3, %v621_v26  ;;  %v283_v57 = vsel %vm5007_vm4, %v278_v27, %v282_v8  ;;  %v580_v39 = vunpack.c.l.b16 %v273_v34  ;;  %v1716_v45 = vrot.slane %v1714_v30, 5  ;;  %v1718_v48 = vshrl.u32 %v4457_v13, 16  ;;  %v4461_v30 = vld [vmem:[%s4991_s15 + $0x20] sm:$0x1] }
  0x68   : > { %v581_v43 = vunpack.c.l.b16 %v283_v57  ;;  %v1041_v44 = vsel %vm5198_vm7, %v1039_v36, %v1040_v47  ;;  %v1149_v51 = vunpack.c.l.b16 %v1038_v35  ;;  %v1711_v52 = vor.u32 %v1710_v40, %v1707_v38 }
  0x69   : > { %v1724_v53 = vshll.u32 %v4458_v37, 16  ;;  %v1150_v59 = vunpack.c.l.b16 %v1041_v44  ;;  %v1720_v60 = vrot.slane %v1718_v48, 4  ;;  %v3526_v47 = vsel %vm671_vm0, %v4731_v42, 0 }
  0x6a   : > { %v609_v56 = vpack.c.b16 %v581_v43, %v580_v39  ;;  %3535 = vmatpush.bf16.msra.mxu3 %v3526_v47  ;;  %v1712_v61 = vrot.slane %v1711_v52, 4  ;;  %v2585_v63 = vsel %vm671_vm0, %v4553_v54, 0  ;;  %v3924_v0 = vsel %vm671_vm0, %v4780_v55, 0  ;;  %v986_v52 = vld [vmem:[%s4991_s15 + $0x18] sm:$0xe] }
  0x6b   : > { %v1721_v62 = vor.u32 %v1720_v60, %v1716_v45  ;;  %v1726_v2 = vrot.slane %v1724_v53, 5  ;;  %3933 = vmatpush.bf16.msra.mxu0 %v3924_v0  ;;  %v1181_v5 = vpack.c.b16 %v1150_v59, %v1149_v51  ;;  %2594 = vmatpush.bf16.msra.mxu1 %v2585_v63  ;;  %v1044_v8 = vrot.slane %v5083_v31, 5  ;;  %v4818_v47 = vld [vmem:[%s4991_s15 + $0x18] sm:$0xff] }
  0x6c   : > { %4217 = vmatmul.msk.bf16.gmra.mxu0 %vm622_vm3, %v609_v56  ;;  %v1717_v9 = vsel %vm5007_vm4, %v1712_v61, %v1716_v45  ;;  %v1729_v11 = vshrl.u32 %v4459_v3, 16  ;;  %v1732_v13 = vshll.u32 %v4459_v3, 16  ;;  %v1738_v14 = vshll.u32 %v4460_v7, 16  ;;  %v4462_v45 = vld [vmem:[%s4991_s15 + $0x24] sm:$0xf] }
  0x6d   : > { %v1722_v6 = vrot.slane %v1721_v62, 4  ;;  %v1742_v15 = vshrl.u32 %v4460_v7, 16  ;;  %v4311_v18 = vrot.slane %v985_v10, 9  ;;  %v1046_v19 = vrot.slane %v1044_v8, 4  ;;  %v4464_v7 = vld [vmem:[%s4991_s15 + $0x2c] sm:$0x1] }
  0x6e   : > { %4294 = vmatmul.msk.bf16.vlgmr.msrb.gmra.mxu1 %vm622_vm3, %v4801_v49  ;;  %v1047_v31 = vrot.slane %v5086_v32, 5  ;;  %v2090_v20 = vunpack.c.l.b16 %v1717_v9  ;;  %v1731_v24 = vrot.slane %v1729_v11, 4  ;;  %v1734_v26 = vrot.slane %v1732_v13, 5  ;;  %v4802_v32 = vld [vmem:[%s4991_s15 + $0xc] sm:$0xff]  ;;  %v4463_v49 = vld [vmem:[%s4991_s15 + $0x28] sm:$0xf] }
  0x6f   : > { %v1727_v12 = vsel %vm5007_vm4, %v1722_v6, %v1726_v2  ;;  %v1740_v27 = vrot.slane %v1738_v14, 5  ;;  %v1744_v29 = vrot.slane %v1742_v15, 4  ;;  %v1045_v34 = vsel %vm5198_vm7, %v4311_v18, %v1044_v8 }
  0x70   : > { %v2091_v21 = vunpack.c.l.b16 %v1727_v12  ;;  %v1048_v35 = vsel %vm5198_vm7, %v1046_v19, %v1047_v31  ;;  %v1735_v37 = vor.u32 %v1734_v26, %v1731_v24  ;;  %v1748_v57 = vshll.u32 %v4461_v30, 16  ;;  %v4465_v31 = vld [vmem:[%s4991_s15 + $0x30] sm:$0xf] }
  0x71   : > { %v1745_v38 = vor.u32 %v1744_v29, %v1740_v27  ;;  %v1151_v39 = vunpack.c.l.b16 %v1045_v34  ;;  %v1152_v40 = vunpack.c.l.b16 %v1048_v35  ;;  %v1051_v51 = vrot.slane %v5127_v1, 5 }
  0x72   : > { %4327 = vmatmul.msk.bf16.vlgmr.msrb.gmra.mxu2 %vm622_vm3, %v1181_v5  ;;  %v2122_v36 = vpack.c.b16 %v2091_v21, %v2090_v20  ;;  %v1736_v42 = vrot.slane %v1735_v37, 4  ;;  %v1750_v44 = vrot.slane %v1748_v57, 5  ;;  %v1753_v53 = vshrl.u32 %v4462_v45, 16  ;;  %v4466_v21 = vld [vmem:[%s4991_s15 + $0x34] sm:$0xf] }
  0x73   : > { %v1746_v43 = vrot.slane %v1745_v38, 4  ;;  %v1182_v48 = vpack.c.b16 %v1152_v40, %v1151_v39  ;;  %v1756_v54 = vshll.u32 %v4462_v45, 16  ;;  %v1762_v59 = vshll.u32 %v4463_v49, 16  ;;  %v4467_v45 = vld [vmem:[%s4991_s15 + $0x38] sm:$0x1] }
  0x74   : > { %v1741_v55 = vsel %vm5007_vm4, %v1736_v42, %v1740_v27  ;;  %v1766_v60 = vshrl.u32 %v4463_v49, 16  ;;  %v4312_v61 = vrot.slane %v986_v52, 9  ;;  %v1053_v62 = vrot.slane %v1051_v51, 4  ;;  %v987_v27 = vld [vmem:[%s4991_s15 + $0x24] sm:$0xe] }
  0x75   : > { %v1751_v56 = vsel %vm5007_vm4, %v1746_v43, %v1750_v44  ;;  %v1054_v1 = vrot.slane %v5133_v4, 5  ;;  %v2092_v63 = vunpack.c.l.b16 %v1741_v55  ;;  %v1755_v2 = vrot.slane %v1753_v53, 4  ;;  %v4803_v4 = vld [vmem:[%s4991_s15 + $0x18] sm:$0xff] }
  0x76   : > { %v2093_v0 = vunpack.c.l.b16 %v1751_v56  ;;  %v1758_v3 = vrot.slane %v1756_v54, 5  ;;  %v1764_v5 = vrot.slane %v1762_v59, 5  ;;  %v1768_v6 = vrot.slane %v1766_v60, 4  ;;  %v4468_v59 = vld [vmem:[%s4991_s15 + $0x3c] sm:$0xf] }
  0x77   : > { %4440 = vmatmul.msk.bf16.vlgmr.msrb.gmra.mxu3 %vm622_vm3, %v4817_v16  ;;  %v1052_v8 = vsel %vm5198_vm7, %v4312_v61, %v1051_v51  ;;  %v1055_v9 = vsel %vm5198_vm7, %v1053_v62, %v1054_v1  ;;  %v1772_v13 = vshll.u32 %v4464_v7, 16  ;;  %v1058_v24 = vrot.slane %v5175_v41, 5  ;;  %v4469_v60 = vld [vmem:[%s4991_s15 + $0x40] sm:$0xf] }
  0x78   : > { %v2123_v10 = vpack.c.b16 %v2093_v0, %v2092_v63  ;;  %v1759_v11 = vor.u32 %v1758_v3, %v1755_v2  ;;  %v1769_v12 = vor.u32 %v1768_v6, %v1764_v5  ;;  %v1153_v14 = vunpack.c.l.b16 %v1052_v8  ;;  %v4869_v63 = vld [vmem:[%s4991_s15 + $0x34] sm:$0xf]  ;;  %v988_v2 = vld [vmem:[%s4991_s15 + $0x30] sm:$0xe] }
  0x79   : > { %v1154_v15 = vunpack.c.l.b16 %v1055_v9  ;;  %v1774_v19 = vrot.slane %v1772_v13, 5  ;;  %v1777_v29 = vshrl.u32 %v4465_v31, 16  ;;  %v1780_v34 = vshll.u32 %v4465_v31, 16 }
  0x7a   : > { %v1760_v16 = vrot.slane %v1759_v11, 4  ;;  %v1770_v18 = vrot.slane %v1769_v12, 4  ;;  %v1786_v35 = vshll.u32 %v4466_v21, 16  ;;  %v4313_v37 = vrot.slane %v987_v27, 9  ;;  %v4870_v12 = vld [vmem:[%s4991_s15 + $0x38] sm:$0x1] }
  0x7b   : > { %v1183_v20 = vpack.c.b16 %v1154_v15, %v1153_v14  ;;  %v1060_v38 = vrot.slane %v1058_v24, 4  ;;  %v1061_v41 = vrot.slane %v5178_v46, 5  ;;  %v1779_v40 = vrot.slane %v1777_v29, 4  ;;  %v4804_v46 = vld [vmem:[%s4991_s15 + $0x24] sm:$0xff]  ;;  %v4820_v14 = vld [vmem:[%s4991_s15 + $0x30] sm:$0xff] }
  0x7c   : > { %4505 = vmatmul.msk.bf16.vlgmr.msrb.gmra.mxu0 %vm622_vm3, %v2122_v36  ;;  %v1765_v26 = vsel %vm5007_vm4, %v1760_v16, %v1764_v5  ;;  %v1775_v30 = vsel %vm5007_vm4, %v1770_v18, %v1774_v19  ;;  %v1790_v36 = vshrl.u32 %v4466_v21, 16  ;;  %v1782_v42 = vrot.slane %v1780_v34, 5  ;;  %v4470_v21 = vld [vmem:[%s4991_s15 + $0x44] sm:$0x1] }
  0x7d   : > { %v2094_v57 = vunpack.c.l.b16 %v1765_v26  ;;  %v2095_v39 = vunpack.c.l.b16 %v1775_v30  ;;  %v1788_v43 = vrot.slane %v1786_v35, 5  ;;  %v1062_v49 = vsel %vm5198_vm7, %v1060_v38, %v1061_v41  ;;  %v4805_v35 = vld [vmem:[%s4991_s15 + $0x30] sm:$0xff] }
  0x7e   : > { %4295 = vmatmul.msk.bf16.gmra.mxu1 %vm622_vm3, %v4802_v32  ;;  %v4819_v32 = vld [vmem:[%s4991_s15 + $0x24] sm:$0xff]  ;;  %v1792_v44 = vrot.slane %v1790_v36, 4  ;;  %v1783_v52 = vor.u32 %v1782_v42, %v1779_v40  ;;  %v1796_v54 = vshll.u32 %v4467_v45, 16  ;;  %v1156_v56 = vunpack.c.l.b16 %v1062_v49  ;;  %v4472_v42 = vld [vmem:[%s4991_s15 + $0x4c] sm:$0xf] }
  0x7f   : > { %v2124_v51 = vpack.c.b16 %v2095_v39, %v2094_v57  ;;  %v1065_v0 = vrot.slane %v4869_v63, 5  ;;  %v1801_v3 = vshrl.u32 %v4468_v59, 16  ;;  %v1804_v5 = vshll.u32 %v4468_v59, 16  ;;  %v4471_v40 = vld [vmem:[%s4991_s15 + $0x48] sm:$0xf]  ;;  %v4821_v59 = vld [vmem:[%s4991_s15 + $0x3c] sm:$0xff] }
  0x80   : > { %v1793_v53 = vor.u32 %v1792_v44, %v1788_v43  ;;  %v1798_v62 = vrot.slane %v1796_v54, 5  ;;  %v1810_v6 = vshll.u32 %v4469_v60, 16  ;;  %v1814_v7 = vshrl.u32 %v4469_v60, 16 }
  0x81   : > { %v4314_v11 = vrot.slane %v988_v2, 9  ;;  %v1068_v13 = vrot.slane %v4870_v12, 5  ;;  %v1803_v15 = vrot.slane %v1801_v3, 4  ;;  %v1806_v16 = vrot.slane %v1804_v5, 5  ;;  %v4473_v5 = vld [vmem:[%s4991_s15 + $0x50] sm:$0x1] }
  0x82   : > { %4328 = vmatmul.msk.bf16.gmra.mxu2 %vm622_vm3, %v1182_v48  ;;  %v1059_v48 = vsel %vm5198_vm7, %v4313_v37, %v1058_v24  ;;  %v1794_v61 = vrot.slane %v1793_v53, 4  ;;  %v1812_v18 = vrot.slane %v1810_v6, 5  ;;  %v1816_v19 = vrot.slane %v1814_v7, 4  ;;  %v4806_v12 = vld [vmem:[%s4991_s15 + $0x3c] sm:$0xff] }
  0x83   : > { %v1155_v55 = vunpack.c.l.b16 %v1059_v48  ;;  %v1066_v24 = vsel %vm5198_vm7, %v4314_v11, %v1065_v0  ;;  %v1807_v27 = vor.u32 %v1806_v16, %v1803_v15  ;;  %v1820_v30 = vshll.u32 %v4470_v21, 16 }
  0x84   : > { %v1817_v29 = vor.u32 %v1816_v19, %v1812_v18  ;;  %v1157_v36 = vunpack.c.l.b16 %v1066_v24  ;;  %v1072_v49 = vrot.slane %v5052_v22, 5  ;;  %v1828_v53 = vshll.u32 %v4471_v40, 16  ;;  %v4474_v24 = vld [vmem:[%s4991_s15 + $0x54] sm:$0xf] }
  0x85   : > { %v1184_v1 = vpack.c.b16 %v1156_v56, %v1155_v55  ;;  %v1808_v41 = vrot.slane %v1807_v27, 4  ;;  %v1822_v39 = vrot.slane %v1820_v30, 5  ;;  %v1834_v54 = vshll.u32 %v4472_v42, 16 }
  0x86   : > { %v1818_v57 = vrot.slane %v1817_v29, 4  ;;  %v1838_v55 = vshrl.u32 %v4472_v42, 16  ;;  %v1079_v27 = vrot.slane %v5098_v50, 5  ;;  %v1082_v50 = vrot.slane %v5102_v58, 5 }
  0x87   : > { %4441 = vmatmul.msk.bf16.gmra.mxu3 %vm622_vm3, %v4818_v47  ;;  %v1784_v47 = vrot.slane %v1783_v52, 4  ;;  %v1813_v45 = vsel %vm5007_vm4, %v1808_v41, %v1812_v18  ;;  %v1825_v52 = vshrl.u32 %v4471_v40, 16  ;;  %v1836_v2 = vrot.slane %v1834_v54, 5 }
  0x88   : > { %v1823_v48 = vsel %vm5007_vm4, %v1818_v57, %v1822_v39  ;;  %v2098_v56 = vunpack.c.l.b16 %v1813_v45  ;;  %v1840_v3 = vrot.slane %v1838_v55, 4  ;;  %v4822_v39 = vld [vmem:[%s4991_s15 + $0x48] sm:$0xff]  ;;  %v1081_v42 = vrot.slane %v1079_v27, 4  ;;  %v4476_v55 = vld [vmem:[%s4991_s15 + $0x5c] sm:$0x1] }
  0x89   : > { %v1789_v9 = vsel %vm5007_vm4, %v1784_v47, %v1788_v43  ;;  %v2099_v60 = vunpack.c.l.b16 %v1823_v48  ;;  %v1827_v63 = vrot.slane %v1825_v52, 4 }
  0x8a   : > { %v2096_v31 = vunpack.c.l.b16 %v1789_v9  ;;  %v1841_v11 = vor.u32 %v1840_v3, %v1836_v2  ;;  %v1083_v58 = vsel %vm5198_vm7, %v1081_v42, %v1082_v50  ;;  %v4477_v3 = vld [vmem:[%s4991_s15 + $0x60] sm:$0xf]  ;;  %v4479_v42 = vld [vmem:[%s4991_s15 + $0x68] sm:$0x1] }
  0x8b   : > { %v2126_v9 = vpack.c.b16 %v2099_v60, %v2098_v56 }
  0x8c   : > { %4506 = vmatmul.msk.bf16.gmra.mxu0 %vm622_vm3, %v2123_v10  ;;  %v1799_v10 = vsel %vm5007_vm4, %v1794_v61, %v1798_v62  ;;  %v1074_v61 = vrot.slane %v1072_v49, 4  ;;  %v1075_v62 = vrot.slane %v5056_v28, 5  ;;  %v1842_v18 = vrot.slane %v1841_v11, 4 }
  0x8e   : > { %4296 = vmatmul.msk.bf16.gmra.mxu1 %vm622_vm3, %v4803_v4  ;;  %v1067_v4 = vrot.slane %v1065_v0, 4  ;;  %v1830_v0 = vrot.slane %v1828_v53, 5  ;;  %v1076_v7 = vsel %vm5198_vm7, %v1074_v61, %v1075_v62 }
  0x8f   : > { %v1160_v15 = vunpack.c.l.b16 %v1076_v7 }
  0x90   : > { %v1069_v26 = vsel %vm5198_vm7, %v1067_v4, %v1068_v13  ;;  %v1844_v4 = vshll.u32 %v4473_v5, 16  ;;  %v4478_v5 = vld [vmem:[%s4991_s15 + $0x64] sm:$0xf] }
  0x92   : > { %4329 = vmatmul.msk.bf16.gmra.mxu2 %vm622_vm3, %v1183_v20  ;;  %v2097_v20 = vunpack.c.l.b16 %v1799_v10  ;;  %v1831_v10 = vor.u32 %v1830_v0, %v1827_v63  ;;  %v1846_v19 = vrot.slane %v1844_v4, 5  ;;  %v1868_v63 = vshll.u32 %v4476_v55, 16  ;;  %v4808_v55 = vld [vmem:[%s4991_s15 + $0x54] sm:$0xff] }
  0x94   : > { %v2125_v34 = vpack.c.b16 %v2097_v20, %v2096_v31  ;;  %v1832_v16 = vrot.slane %v1831_v10, 4  ;;  %v1847_v30 = vsel %vm5007_vm4, %v1842_v18, %v1846_v19  ;;  %v1870_v11 = vrot.slane %v1868_v63, 5 }
  0x95   : > { %v2101_v45 = vunpack.c.l.b16 %v1847_v30  ;;  %v1886_v18 = vshrl.u32 %v4478_v5, 16 }
  0x96   : > { %v1837_v29 = vsel %vm5007_vm4, %v1832_v16, %v1836_v2  ;;  %v1162_v2 = vunpack.c.l.b16 %v1083_v58  ;;  %v1086_v16 = vrot.slane %v5142_v23, 5 }
  0x97   : > { %4442 = vmatmul.msk.bf16.gmra.mxu3 %vm622_vm3, %v4819_v32  ;;  %v1158_v32 = vunpack.c.l.b16 %v1069_v26  ;;  %v4475_v26 = vld [vmem:[%s4991_s15 + $0x58] sm:$0xf] }
  0x98   : > { %v1862_v41 = vshrl.u32 %v4475_v26, 16 }
  0x99   : > { %v1185_v44 = vpack.c.b16 %v1158_v32, %v1157_v36  ;;  %v1852_v36 = vshll.u32 %v4474_v24, 16  ;;  %v1858_v32 = vshll.u32 %v4475_v26, 16 }
  0x9a   : > { %v1864_v53 = vrot.slane %v1862_v41, 4  ;;  %v1888_v41 = vrot.slane %v1886_v18, 4 }
  0x9b   : > { %v1860_v52 = vrot.slane %v1858_v32, 5  ;;  %v1089_v32 = vrot.slane %v5149_v33, 5 }
  0x9c   : > { %4507 = vmatmul.msk.bf16.gmra.mxu0 %vm622_vm3, %v2124_v51 }
  0x9d   : > { %v1865_v62 = vor.u32 %v1864_v53, %v1860_v52 }
  0x9e   : > { %4297 = vmatmul.msk.bf16.gmra.mxu1 %vm622_vm3, %v4804_v46  ;;  %v989_v46 = vld [vmem:[%s4991_s15 + $0x3c] sm:$0xe] }
  0x9f   : > { %v4315_v47 = vrot.slane %v989_v46, 9  ;;  %v1854_v46 = vrot.slane %v1852_v36, 5  ;;  %v1866_v10 = vrot.slane %v1865_v62, 4  ;;  %v1088_v36 = vrot.slane %v1086_v16, 4 }
  0xa1   : > { %v1073_v6 = vsel %vm5198_vm7, %v4315_v47, %v1072_v49  ;;  %v4807_v47 = vld [vmem:[%s4991_s15 + $0x48] sm:$0xff]  ;;  %v1871_v26 = vsel %vm5007_vm4, %v1866_v10, %v1870_v11  ;;  %v4871_v11 = vld [vmem:[%s4991_s15 + $0x64] sm:$0xf] }
  0xa2   : > { %v5293_v8 = vpop.f32.mrf.mxu1  ;;  %4330 = vmatmul.msk.bf16.gmra.mxu2 %vm622_vm3, %v1184_v1 }
  0xa7   : > { %4443 = vmatmul.msk.bf16.gmra.mxu3 %vm622_vm3, %v4820_v14  ;;  %v1159_v14 = vunpack.c.l.b16 %v1073_v6 }
  0xa9   : > { %v1186_v20 = vpack.c.b16 %v1160_v15, %v1159_v14  ;;  %v1876_v14 = vshll.u32 %v4477_v3, 16  ;;  %v1882_v15 = vshll.u32 %v4478_v5, 16 }
  0xaa   : > { %v5311_v38 = vpop.f32.mrf.mxu1 }
  0xab   : > { %v5309_v37 = vpop.f32.mrf.mxu2  ;;  %v1878_v30 = vrot.slane %v1876_v14, 5  ;;  %v992_v14 = vld [vmem:[%s4991_s15 + $0x60] sm:$0xe] }
  0xac   : > { %4508 = vmatmul.msk.bf16.gmra.mxu0 %vm622_vm3, %v2125_v34  ;;  %v990_v34 = vld [vmem:[%s4991_s15 + $0x48] sm:$0xe] }
  0xad   : > { %v4316_v40 = vrot.slane %v990_v34, 9  ;;  %v1884_v34 = vrot.slane %v1882_v15, 5 }
  0xae   : > { %4298 = vmatmul.msk.bf16.gmra.mxu1 %vm622_vm3, %v4805_v35  ;;  %v1849_v35 = vshrl.u32 %v4474_v24, 16 }
  0xaf   : > { %v5324_v51 = vpop.f32.mrf.mxu3  ;;  %v1080_v56 = vsel %vm5198_vm7, %v4316_v40, %v1079_v27  ;;  %v2103_v40 = vunpack.c.l.b16 %v1871_v26  ;;  %v1889_v33 = vor.u32 %v1888_v41, %v1884_v34 }
  0xb0   : > { %v5317_v43 = vpop.f32.mrf.mxu0  ;;  %v1851_v49 = vrot.slane %v1849_v35, 4  ;;  %v1161_v0 = vunpack.c.l.b16 %v1080_v56  ;;  %v4823_v35 = vld [vmem:[%s4991_s15 + $0x54] sm:$0xff] }
  0xb1   : > { %v1890_v62 = vrot.slane %v1889_v33, 4 }
  0xb2   : > { %4331 = vmatmul.msk.bf16.gmra.mxu2 %vm622_vm3, %v1185_v44  ;;  %v2100_v44 = vunpack.c.l.b16 %v1837_v29  ;;  %v1855_v61 = vor.u32 %v1854_v46, %v1851_v49  ;;  %v1187_v4 = vpack.c.b16 %v1162_v2, %v1161_v0  ;;  %v1090_v46 = vsel %vm5198_vm7, %v1088_v36, %v1089_v32  ;;  %v4480_v0 = vld [vmem:[%s4991_s15 + $0x6c] sm:$0xf]  ;;  %v4481_v2 = vld [vmem:[%s4991_s15 + $0x70] sm:$0xf] }
  0xb3   : > { %v5330_v1 = vpop.f32.mrf.mxu2  ;;  %v1897_v15 = vshrl.u32 %v4480_v0, 16  ;;  %v1906_v18 = vshll.u32 %v4481_v2, 16 }
  0xb5   : > { %v5332_v22 = vpop.f32.mrf.mxu1  ;;  %v1899_v32 = vrot.slane %v1897_v15, 4  ;;  %v4484_v15 = vld [vmem:[%s4991_s15 + $0x7c] sm:$0xf] }
  0xb7   : > { %4444 = vmatmul.msk.bf16.gmra.mxu3 %vm622_vm3, %v4821_v59  ;;  %v5343_v13 = vpop.f32.mrf.mxu3  ;;  %v2127_v59 = vpack.c.b16 %v2101_v45, %v2100_v44 }
  0xb8   : > { %v5340_v28 = vpop.f32.mrf.mxu0 }
  0xbc   : > { %4509 = vmatmul.msk.bf16.gmra.mxu0 %vm622_vm3, %v2126_v9  ;;  %v1856_v9 = vrot.slane %v1855_v61, 4 }
  0xbd   : > { %v5346_v31 = vpop.f32.mrf.mxu1 }
  0xbe   : > { %4299 = vmatmul.msk.bf16.gmra.mxu1 %vm622_vm3, %v4806_v12  ;;  %v1873_v12 = vshrl.u32 %v4477_v3, 16  ;;  %v1861_v24 = vsel %vm5007_vm4, %v1856_v9, %v1860_v52  ;;  %v1892_v52 = vshll.u32 %v4479_v42, 16 }
  0xbf   : > { %v5349_v21 = vpop.f32.mrf.mxu2 }
  0xc0   : > { %v1875_v29 = vrot.slane %v1873_v12, 4  ;;  %v1894_v63 = vrot.slane %v1892_v52, 5 }
  0xc2   : > { %4332 = vmatmul.msk.bf16.gmra.mxu2 %vm622_vm3, %v1186_v20  ;;  %v991_v20 = vld [vmem:[%s4991_s15 + $0x54] sm:$0xe]  ;;  %v1879_v45 = vor.u32 %v1878_v30, %v1875_v29  ;;  %v1895_v10 = vsel %vm5007_vm4, %v1890_v62, %v1894_v63  ;;  %v4824_v30 = vld [vmem:[%s4991_s15 + $0x60] sm:$0xff] }
  0xc3   : > { %v5359_v57 = vpop.f32.mrf.mxu0  ;;  %v4317_v23 = vrot.slane %v991_v20, 9  ;;  %v1910_v20 = vshrl.u32 %v4481_v2, 16 }
  0xc4   : > { %v1880_v61 = vrot.slane %v1879_v45, 4  ;;  %v4482_v45 = vld [vmem:[%s4991_s15 + $0x74] sm:$0x1] }
  0xc5   : > { %v5364_v48 = vpop.f32.mrf.mxu3  ;;  %v1087_v49 = vsel %vm5198_vm7, %v4317_v23, %v1086_v16  ;;  %v1900_v16 = vshll.u32 %v4480_v0, 16  ;;  %v4318_v23 = vrot.slane %v992_v14, 9  ;;  %v4483_v14 = vld [vmem:[%s4991_s15 + $0x78] sm:$0xf] }
  0xc6   : > { %v1163_v58 = vunpack.c.l.b16 %v1087_v49  ;;  %v1885_v9 = vsel %vm5007_vm4, %v1880_v61, %v1884_v34 }
  0xc7   : > { %v5366_v54 = vpop.f32.mrf.mxu1  ;;  %4445 = vmatmul.msk.bf16.gmra.mxu3 %vm622_vm3, %v4822_v39  ;;  %v5374_v60 = vpop.f32.mrf.mxu2  ;;  %v2102_v39 = vunpack.c.l.b16 %v1861_v24  ;;  %v4872_v24 = vld [vmem:[%s4991_s15 + $0x68] sm:$0x1]  ;;  %v2104_v34 = vunpack.c.l.b16 %v1885_v9  ;;  %v1902_v41 = vrot.slane %v1900_v16, 5  ;;  %v4873_v16 = vld [vmem:[%s4991_s15 + $0x70] sm:$0xf] }
  0xc8   : > { %v1096_v26 = vrot.slane %v4872_v24, 5  ;;  %v993_v24 = vld [vmem:[%s4991_s15 + $0x6c] sm:$0xe] }
  0xc9   : > { %v2128_v53 = vpack.c.b16 %v2103_v40, %v2102_v39  ;;  %v1908_v39 = vrot.slane %v1906_v18, 5  ;;  %v1912_v40 = vrot.slane %v1910_v20, 4  ;;  %v1903_v52 = vor.u32 %v1902_v41, %v1899_v32  ;;  %v4874_v41 = vld [vmem:[%s4991_s15 + $0x74] sm:$0x1] }
  0xca   : > { %v1100_v18 = vrot.slane %v4873_v16, 5 }
  0xcb   : > { %v5380_v6 = vpop.f32.mrf.mxu0 }
  0xcc   : > { %4510 = vmatmul.msk.bf16.gmra.mxu0 %vm622_vm3, %v2127_v59  ;;  %v1164_v59 = vunpack.c.l.b16 %v1090_v46 }
  0xcd   : > { %v5382_v7 = vpop.f32.mrf.mxu3 }
  0xce   : > { %4300 = vmatmul.msk.bf16.gmra.mxu1 %vm622_vm3, %v4807_v47  ;;  %v1188_v3 = vpack.c.b16 %v1164_v59, %v1163_v58  ;;  %v4809_v59 = vld [vmem:[%s4991_s15 + $0x60] sm:$0xff] }
  0xcf   : > { %v5386_v19 = vpop.f32.mrf.mxu1 }
  0xd2   : > { %4333 = vmatmul.msk.bf16.gmra.mxu2 %vm622_vm3, %v1187_v4  ;;  %v1093_v4 = vrot.slane %v4871_v11, 5 }
  0xd3   : > { %v5394_v27 = vpop.f32.mrf.mxu2 }
  0xd4   : > { %v1095_v36 = vrot.slane %v1093_v4, 4  ;;  %v1094_v49 = vsel %vm5198_vm7, %v4318_v23, %v1093_v4  ;;  %v1934_v23 = vshrl.u32 %v4484_v15, 16 }
  0xd5   : > { %v1165_v63 = vunpack.c.l.b16 %v1094_v49  ;;  %v4319_v49 = vrot.slane %v993_v24, 9 }
  0xd6   : > { %v5399_v50 = vpop.f32.mrf.mxu0  ;;  %v1097_v46 = vsel %vm5198_vm7, %v1095_v36, %v1096_v26 }
  0xd7   : > { %v5401_v44 = vpop.f32.mrf.mxu3  ;;  %4446 = vmatmul.msk.bf16.gmra.mxu3 %vm622_vm3, %v4823_v35  ;;  %v2105_v35 = vunpack.c.l.b16 %v1895_v10  ;;  %v1166_v0 = vunpack.c.l.b16 %v1097_v46  ;;  %v1102_v46 = vrot.slane %v1100_v18, 4 }
  0xd9   : > { %v2129_v33 = vpack.c.b16 %v2105_v35, %v2104_v34  ;;  %v1189_v4 = vpack.c.b16 %v1166_v0, %v1165_v63  ;;  %v1924_v34 = vshll.u32 %v4483_v14, 16  ;;  %v1930_v35 = vshll.u32 %v4484_v15, 16 }
  0xda   : > { %v1936_v63 = vrot.slane %v1934_v23, 4 }
  0xdb   : > { %v5409_v56 = vpop.f32.mrf.mxu1  ;;  %v5411_v47 = vpop.f32.mrf.mxu2 }
  0xdc   : > { %4511 = vmatmul.msk.bf16.gmra.mxu0 %vm622_vm3, %v2128_v53  ;;  %v1913_v53 = vor.u32 %v1912_v40, %v1908_v39  ;;  %v1103_v40 = vrot.slane %v4874_v41, 5 }
  0xde   : > { %4301 = vmatmul.msk.bf16.gmra.mxu1 %vm622_vm3, %v4808_v55  ;;  %v5417_v5 = vpop.f32.mrf.mxu0  ;;  %v1916_v55 = vshll.u32 %v4482_v45, 16  ;;  %v1914_v9 = vrot.slane %v1913_v53, 4  ;;  %v4825_v45 = vld [vmem:[%s4991_s15 + $0x6c] sm:$0xff] }
  0xdf   : > { %v5424_v12 = vpop.f32.mrf.mxu3 }
  0xe0   : > { %v1918_v10 = vrot.slane %v1916_v55, 5 }
  0xe2   : > { %4334 = vmatmul.msk.bf16.gmra.mxu2 %vm622_vm3, %v1188_v3  ;;  %v1904_v3 = vrot.slane %v1903_v52, 4 }
  0xe3   : > { %v5429_v29 = vpop.f32.mrf.mxu1 }
  0xe4   : > { %v1909_v20 = vsel %vm5007_vm4, %v1904_v3, %v1908_v39  ;;  %v4485_v3 = vld [vmem:[%s4991_s15 + $0x80] sm:$0x1] }
  0xe5   : > { %v5432_v42 = vpop.f32.mrf.mxu2 }
  0xe7   : > { %4447 = vmatmul.msk.bf16.gmra.mxu3 %vm622_vm3, %v4824_v30  ;;  %v1921_v30 = vshrl.u32 %v4483_v14, 16  ;;  %v4810_v14 = vld [vmem:[%s4991_s15 + $0x6c] sm:$0xff] }
  0xe9   : > { %v5440_v58 = vpop.f32.mrf.mxu0  ;;  %v1923_v55 = vrot.slane %v1921_v30, 4 }
  0xea   : > { %v5443_v61 = vpop.f32.mrf.mxu3 }
  0xeb   : > { %v904_v62 = vpop.f32.mrf.mxu1 }
  0xec   : > { %v905_v2 = vadd.f32 %v904_v62, %v5317_v43  ;;  %4512 = vmatmul.msk.bf16.gmra.mxu0 %vm622_vm3, %v2129_v33  ;;  %v1919_v43 = vsel %vm5007_vm4, %v1914_v9, %v1918_v10  ;;  %v2106_v33 = vunpack.c.l.b16 %v1909_v20  ;;  %v1932_v62 = vrot.slane %v1930_v35, 5 }
  0xed   : > { %v5447_v11 = vpop.f32.mrf.mxu2  ;;  %v2107_v52 = vunpack.c.l.b16 %v1919_v43  ;;  %v1101_v9 = vsel %vm5198_vm7, %v4319_v49, %v1100_v18  ;;  %v1940_v20 = vshll.u32 %v4485_v3, 16 }
  0xee   : > { %4302 = vmatmul.msk.bf16.gmra.mxu1 %vm622_vm3, %v4809_v59  ;;  %v1926_v59 = vrot.slane %v1924_v34, 5  ;;  %v1937_v16 = vor.u32 %v1936_v63, %v1932_v62 }
  0xef   : > { %v2130_v10 = vpack.c.b16 %v2107_v52, %v2106_v33  ;;  %v1942_v41 = vrot.slane %v1940_v20, 5  ;;  %v4487_v33 = vld [vmem:[%s4991_s15 + $0x88] sm:$0xf]  ;;  %v4875_v52 = vld [vmem:[%s4991_s15 + $0x7c] sm:$0xf] }
  0xf0   : > { %v1927_v15 = vor.u32 %v1926_v59, %v1923_v55  ;;  %v994_v55 = vld [vmem:[%s4991_s15 + $0x78] sm:$0xe] }
  0xf1   : > { %v5458_v26 = vpop.f32.mrf.mxu0 }
  0xf2   : > { %v5460_v36 = vpop.f32.mrf.mxu3  ;;  %4335 = vmatmul.msk.bf16.gmra.mxu2 %vm622_vm3, %v1189_v4  ;;  %v1928_v23 = vrot.slane %v1927_v15, 4 }
  0xf3   : > { %v906_v32 = vpop.f32.mrf.mxu1 }
  0xf4   : > { %v907_v39 = vadd.f32 %v906_v32, %v5340_v28  ;;  %v1104_v28 = vsel %vm5198_vm7, %v1102_v46, %v1103_v40  ;;  %v1938_v32 = vrot.slane %v1937_v16, 4  ;;  %v4486_v40 = vld [vmem:[%s4991_s15 + $0x84] sm:$0xf]  ;;  %v4826_v16 = vld [vmem:[%s4991_s15 + $0x78] sm:$0xff] }
  0xf5   : > { %v1257_v53 = vpop.f32.mrf.mxu2  ;;  %v1168_v30 = vunpack.c.l.b16 %v1104_v28  ;;  %v1948_v59 = vshll.u32 %v4486_v40, 16  ;;  %v1958_v28 = vshrl.u32 %v4487_v33, 16 }
  0xf6   : > { %v1337_v0 = vadd.f32 %v1257_v53, %v905_v2  ;;  %v1167_v2 = vunpack.c.l.b16 %v1101_v9  ;;  %v1107_v53 = vrot.slane %v4875_v52, 5  ;;  %v1943_v3 = vsel %vm5007_vm4, %v1938_v32, %v1942_v41 }
  0xf7   : > { %4448 = vmatmul.msk.bf16.gmra.mxu3 %vm622_vm3, %v4825_v45  ;;  %v1954_v9 = vshll.u32 %v4487_v33, 16  ;;  %v1960_v32 = vrot.slane %v1958_v28, 4 }
  0xf8   : > { %v1190_v46 = vpack.c.b16 %v1168_v30, %v1167_v2 }
  0xf9   : > { %v2198_v4 = vpop.f32.mrf.mxu0 }
  0xfa   : > { %v1544_v43 = vpop.f32.mrf.mxu3 }
  0xfb   : > { %v909_v24 = vpop.f32.mrf.mxu1  ;;  %v1624_v34 = vadd.f32 %v1544_v43, %v1337_v0  ;;  %v1933_v0 = vsel %vm5007_vm4, %v1928_v23, %v1932_v62  ;;  %v4320_v43 = vrot.slane %v994_v55, 9  ;;  %v2109_v62 = vunpack.c.l.b16 %v1943_v3 }
  0xfc   : > { %v910_v18 = vadd.f32 %v909_v24, %v5359_v57  ;;  %4513 = vmatmul.msk.bf16.gmra.mxu0 %vm622_vm3, %v2130_v10  ;;  %v1945_v57 = vshrl.u32 %v4486_v40, 16  ;;  %v4876_v10 = vld [vmem:[%s4991_s15 + $0x80] sm:$0x1]  ;;  %v1109_v24 = vrot.slane %v1107_v53, 4  ;;  %v2108_v2 = vunpack.c.l.b16 %v1933_v0 }
  0xfd   : > { %v1259_v35 = vpop.f32.mrf.mxu2  ;;  %v5477_v45 = vadd.f32 %v2198_v4, %v1624_v34  ;;  %v1110_v4 = vrot.slane %v4876_v10, 5  ;;  %v1950_v34 = vrot.slane %v1948_v59, 5  ;;  %v1956_v23 = vrot.slane %v1954_v9, 5 }
  0xfe   : > { %4303 = vmatmul.msk.bf16.gmra.mxu1 %vm622_vm3, %v4810_v14  ;;  %v1338_v49 = vadd.f32 %v1259_v35, %v907_v39  ;;  %v1947_v30 = vrot.slane %v1945_v57, 4  ;;  %v2131_v33 = vpack.c.b16 %v2109_v62, %v2108_v2  ;;  %v4811_v57 = vld [vmem:[%s4991_s15 + $0x78] sm:$0xff]  ;;  %v4490_v2 = vld [vmem:[%s4991_s15 + $0x94] sm:$0xf]  ;;  %v4877_v62 = vld [vmem:[%s4991_s15 + $0x88] sm:$0xf] }
  0xff   : > { %v1961_v59 = vor.u32 %v1960_v32, %v1956_v23 }
 0x100   : > { %v1951_v52 = vor.u32 %v1950_v34, %v1947_v30  ;;  %v1114_v30 = vrot.slane %v4877_v62, 5  ;;  %v995_v34 = vld [vmem:[%s4991_s15 + $0x84] sm:$0xe] }
 0x101   : > { %v2200_v63 = vpop.f32.mrf.mxu0 }
 0x102   : > { %v1546_v39 = vpop.f32.mrf.mxu3  ;;  %4336 = vmatmul.msk.bf16.gmra.mxu2 %vm622_vm3, %v1190_v46  ;;  %v4488_v46 = vld [vmem:[%s4991_s15 + $0x8c] sm:$0x1]  ;;  %v1952_v10 = vrot.slane %v1951_v52, 4 }
 0x103   : > { %v911_v14 = vpop.f32.mrf.mxu1  ;;  %v1625_v15 = vadd.f32 %v1546_v39, %v1338_v49  ;;  %v1108_v49 = vsel %vm5198_vm7, %v4320_v43, %v1107_v53  ;;  %v1964_v0 = vshll.u32 %v4488_v46, 16  ;;  %v1962_v39 = vrot.slane %v1961_v59, 4  ;;  %v4827_v59 = vld [vmem:[%s4991_s15 + $0x84] sm:$0xff] }
 0x104   : > { %v912_v20 = vadd.f32 %v911_v14, %v5380_v6  ;;  %v1111_v6 = vsel %vm5198_vm7, %v1109_v24, %v1110_v4 }
 0x105   : > { %v1262_v35 = vpop.f32.mrf.mxu2  ;;  %v5490_v41 = vadd.f32 %v2200_v63, %v1625_v15  ;;  %v1170_v9 = vunpack.c.l.b16 %v1111_v6  ;;  %v1966_v14 = vrot.slane %v1964_v0, 5  ;;  %v4489_v15 = vld [vmem:[%s4991_s15 + $0x90] sm:$0xf]  ;;  %v1982_v6 = vshrl.u32 %v4490_v2, 16 }
 0x106   : > { %v1339_v40 = vadd.f32 %v1262_v35, %v910_v18  ;;  %v1169_v18 = vunpack.c.l.b16 %v1108_v49  ;;  %v1969_v35 = vshrl.u32 %v4489_v15, 16  ;;  %v1972_v46 = vshll.u32 %v4489_v15, 16 }
 0x107   : > { %4449 = vmatmul.msk.bf16.gmra.mxu3 %vm622_vm3, %v4826_v16  ;;  %v1978_v49 = vshll.u32 %v4490_v2, 16  ;;  %v4321_v0 = vrot.slane %v995_v34, 9 }
 0x108   : > { %v1191_v24 = vpack.c.b16 %v1170_v9, %v1169_v18  ;;  %v1971_v9 = vrot.slane %v1969_v35, 4 }
 0x109   : > { %v2203_v55 = vpop.f32.mrf.mxu0 }
 0x10a   : > { %v1549_v3 = vpop.f32.mrf.mxu3 }
 0x10b   : > { %v914_v63 = vpop.f32.mrf.mxu1  ;;  %v1626_v28 = vadd.f32 %v1549_v3, %v1339_v40  ;;  %v1967_v40 = vsel %vm5007_vm4, %v1962_v39, %v1966_v14  ;;  %v1116_v3 = vrot.slane %v1114_v30, 4  ;;  %v1984_v39 = vrot.slane %v1982_v6, 4 }
 0x10c   : > { %v915_v53 = vadd.f32 %v914_v63, %v5399_v50  ;;  %4514 = vmatmul.msk.bf16.gmra.mxu0 %vm622_vm3, %v2131_v33  ;;  %v1957_v50 = vsel %vm5007_vm4, %v1952_v10, %v1956_v23  ;;  %v4878_v33 = vld [vmem:[%s4991_s15 + $0x8c] sm:$0x1]  ;;  %v2111_v18 = vunpack.c.l.b16 %v1967_v40  ;;  %v1974_v10 = vrot.slane %v1972_v46, 5 }
 0x10d   : > { %v1264_v4 = vpop.f32.mrf.mxu2  ;;  %v5503_v16 = vadd.f32 %v2203_v55, %v1626_v28  ;;  %v1117_v52 = vrot.slane %v4878_v33, 5  ;;  %v2110_v63 = vunpack.c.l.b16 %v1957_v50  ;;  %v4812_v50 = vld [vmem:[%s4991_s15 + $0x84] sm:$0xff] }
 0x10e   : > { %4304 = vmatmul.msk.bf16.gmra.mxu1 %vm622_vm3, %v4811_v57  ;;  %v1340_v43 = vadd.f32 %v1264_v4, %v912_v20  ;;  %v1980_v4 = vrot.slane %v1978_v49, 5  ;;  %v1975_v34 = vor.u32 %v1974_v10, %v1971_v9 }
 0x10f   : > { %v2132_v2 = vpack.c.b16 %v2111_v18, %v2110_v63  ;;  %v4493_v63 = vld [vmem:[%s4991_s15 + $0xa0] sm:$0xf]  ;;  %v4879_v18 = vld [vmem:[%s4991_s15 + $0x94] sm:$0xf] }
 0x110   : > { %v1985_v35 = vor.u32 %v1984_v39, %v1980_v4  ;;  %v1121_v9 = vrot.slane %v4879_v18, 5 }
 0x111   : > { %v2205_v32 = vpop.f32.mrf.mxu0 }
 0x112   : > { %v1551_v20 = vpop.f32.mrf.mxu3  ;;  %4337 = vmatmul.msk.bf16.gmra.mxu2 %vm622_vm3, %v1191_v24  ;;  %v4491_v24 = vld [vmem:[%s4991_s15 + $0x98] sm:$0x1] }
 0x113   : > { %v916_v55 = vpop.f32.mrf.mxu1  ;;  %v1627_v57 = vadd.f32 %v1551_v20, %v1340_v43  ;;  %v1115_v43 = vsel %vm5198_vm7, %v4321_v0, %v1114_v30  ;;  %v1988_v40 = vshll.u32 %v4491_v24, 16  ;;  %v1986_v20 = vrot.slane %v1985_v35, 4  ;;  %v4828_v35 = vld [vmem:[%s4991_s15 + $0x90] sm:$0xff] }
 0x114   : > { %v917_v23 = vadd.f32 %v916_v55, %v5417_v5  ;;  %v1118_v5 = vsel %vm5198_vm7, %v1116_v3, %v1117_v52  ;;  %v1976_v52 = vrot.slane %v1975_v34, 4 }
 0x115   : > { %v1267_v28 = vpop.f32.mrf.mxu2  ;;  %v5516_v14 = vadd.f32 %v2205_v32, %v1627_v57  ;;  %v1172_v49 = vunpack.c.l.b16 %v1118_v5  ;;  %v1990_v55 = vrot.slane %v1988_v40, 5  ;;  %v4492_v57 = vld [vmem:[%s4991_s15 + $0x9c] sm:$0xf]  ;;  %v2006_v5 = vshrl.u32 %v4493_v63, 16 }
 0x116   : > { %v1341_v15 = vadd.f32 %v1267_v28, %v915_v53  ;;  %v1171_v53 = vunpack.c.l.b16 %v1115_v43  ;;  %v996_v28 = vld [vmem:[%s4991_s15 + $0x90] sm:$0xe]  ;;  %v1996_v10 = vshll.u32 %v4492_v57, 16  ;;  %v2002_v43 = vshll.u32 %v4493_v63, 16 }
 0x117   : > { %4450 = vmatmul.msk.bf16.gmra.mxu3 %vm622_vm3, %v4827_v59  ;;  %v1991_v24 = vsel %vm5007_vm4, %v1986_v20, %v1990_v55  ;;  %v2008_v20 = vrot.slane %v2006_v5, 4 }
 0x118   : > { %v1192_v3 = vpack.c.b16 %v1172_v49, %v1171_v53 }
 0x119   : > { %v2208_v62 = vpop.f32.mrf.mxu0 }
 0x11a   : > { %v1554_v46 = vpop.f32.mrf.mxu3 }
 0x11b   : > { %v919_v32 = vpop.f32.mrf.mxu1  ;;  %v1628_v6 = vadd.f32 %v1554_v46, %v1341_v15  ;;  %v1981_v15 = vsel %vm5007_vm4, %v1976_v52, %v1980_v4  ;;  %v4322_v46 = vrot.slane %v996_v28, 9  ;;  %v2113_v4 = vunpack.c.l.b16 %v1991_v24 }
 0x11c   : > { %v920_v30 = vadd.f32 %v919_v32, %v5440_v58  ;;  %4515 = vmatmul.msk.bf16.gmra.mxu0 %vm622_vm3, %v2132_v2  ;;  %v1993_v58 = vshrl.u32 %v4492_v57, 16  ;;  %v4880_v2 = vld [vmem:[%s4991_s15 + $0x98] sm:$0x1]  ;;  %v1123_v32 = vrot.slane %v1121_v9, 4  ;;  %v2112_v53 = vunpack.c.l.b16 %v1981_v15 }
 0x11d   : > { %v1269_v33 = vpop.f32.mrf.mxu2  ;;  %v5529_v59 = vadd.f32 %v2208_v62, %v1628_v6  ;;  %v1124_v62 = vrot.slane %v4880_v2, 5  ;;  %v1998_v6 = vrot.slane %v1996_v10, 5  ;;  %v2004_v52 = vrot.slane %v2002_v43, 5 }
 0x11e   : > { %4305 = vmatmul.msk.bf16.gmra.mxu1 %vm622_vm3, %v4812_v50  ;;  %v1342_v0 = vadd.f32 %v1269_v33, %v917_v23  ;;  %v1995_v49 = vrot.slane %v1993_v58, 4  ;;  %v2133_v63 = vpack.c.b16 %v2113_v4, %v2112_v53  ;;  %v4813_v58 = vld [vmem:[%s4991_s15 + $0x90] sm:$0xff]  ;;  %v4496_v4 = vld [vmem:[%s4991_s15 + $0xac] sm:$0xf] }
 0x11f   : > { %v2009_v10 = vor.u32 %v2008_v20, %v2004_v52 }
 0x120   : > { %v1999_v18 = vor.u32 %v1998_v6, %v1995_v49  ;;  %v997_v49 = vld [vmem:[%s4991_s15 + $0x9c] sm:$0xe] }
 0x121   : > { %v2210_v39 = vpop.f32.mrf.mxu0 }
 0x122   : > { %v1556_v23 = vpop.f32.mrf.mxu3  ;;  %4338 = vmatmul.msk.bf16.gmra.mxu2 %vm622_vm3, %v1192_v3  ;;  %v4494_v3 = vld [vmem:[%s4991_s15 + $0xa4] sm:$0x1] }
 0x123   : > { %v921_v50 = vpop.f32.mrf.mxu1  ;;  %v1629_v34 = vadd.f32 %v1556_v23, %v1342_v0  ;;  %v1122_v0 = vsel %vm5198_vm7, %v4322_v46, %v1121_v9  ;;  %v2012_v15 = vshll.u32 %v4494_v3, 16  ;;  %v2000_v9 = vrot.slane %v1999_v18, 4 }
 0x124   : > { %v922_v40 = vadd.f32 %v921_v50, %v5458_v26  ;;  %v1125_v26 = vsel %vm5198_vm7, %v1123_v32, %v1124_v62  ;;  %v2010_v62 = vrot.slane %v2009_v10, 4  ;;  %v4495_v50 = vld [vmem:[%s4991_s15 + $0xa8] sm:$0xf]  ;;  %v4881_v32 = vld [vmem:[%s4991_s15 + $0xa0] sm:$0xf] }
 0x125   : > { %v1272_v33 = vpop.f32.mrf.mxu2  ;;  %v5542_v55 = vadd.f32 %v2210_v39, %v1629_v34  ;;  %v1174_v43 = vunpack.c.l.b16 %v1125_v26  ;;  %v2014_v23 = vrot.slane %v2012_v15, 5  ;;  %v1128_v53 = vrot.slane %v4881_v32, 5 }
 0x126   : > { %v1343_v57 = vadd.f32 %v1272_v33, %v920_v30  ;;  %v1173_v30 = vunpack.c.l.b16 %v1122_v0  ;;  %v2005_v6 = vsel %vm5007_vm4, %v2000_v9, %v2004_v52  ;;  %v2017_v33 = vshrl.u32 %v4495_v50, 16 }
 0x127   : > { %4451 = vmatmul.msk.bf16.gmra.mxu3 %vm622_vm3, %v4828_v35  ;;  %v2020_v20 = vshll.u32 %v4495_v50, 16  ;;  %v2015_v3 = vsel %vm5007_vm4, %v2010_v62, %v2014_v23  ;;  %v2026_v0 = vshll.u32 %v4496_v4, 16  ;;  %v2030_v26 = vshrl.u32 %v4496_v4, 16  ;;  %v4497_v4 = vld [vmem:[%s4991_s15 + $0xb0] sm:$0x1] }
 0x128   : > { %v1193_v46 = vpack.c.b16 %v1174_v43, %v1173_v30  ;;  %v1130_v10 = vrot.slane %v1128_v53, 4  ;;  %v2114_v52 = vunpack.c.l.b16 %v2005_v6  ;;  %v2115_v43 = vunpack.c.l.b16 %v2015_v3  ;;  %v4814_v6 = vld [vmem:[%s4991_s15 + $0x9c] sm:$0xff] }
 0x129   : > { %v2213_v28 = vpop.f32.mrf.mxu0  ;;  %v2022_v9 = vrot.slane %v2020_v20, 5  ;;  %v2028_v62 = vrot.slane %v2026_v0, 5  ;;  %v2032_v23 = vrot.slane %v2030_v26, 4  ;;  %v2036_v3 = vshll.u32 %v4497_v4, 16 }
 0x12a   : > { %v1559_v39 = vpop.f32.mrf.mxu3 }
 0x12b   : > { %v924_v24 = vpop.f32.mrf.mxu1  ;;  %v1630_v5 = vadd.f32 %v1559_v39, %v1343_v57  ;;  %v4829_v39 = vld [vmem:[%s4991_s15 + $0x9c] sm:$0xff] }
 0x12c   : > { %4516 = vmatmul.msk.bf16.gmra.mxu0 %vm622_vm3, %v2133_v63  ;;  %v4882_v63 = vld [vmem:[%s4991_s15 + $0xa4] sm:$0x1]  ;;  %v925_v30 = vadd.f32 %v924_v24, %v5293_v8  ;;  %v2134_v8 = vpack.c.b16 %v2115_v43, %v2114_v52  ;;  %v2038_v52 = vrot.slane %v2036_v3, 5 }
 0x12d   : > { %v1274_v2 = vpop.f32.mrf.mxu2  ;;  %v5554_v34 = vadd.f32 %v2213_v28, %v1630_v5  ;;  %v1131_v18 = vrot.slane %v4882_v63, 5  ;;  %v2019_v5 = vrot.slane %v2017_v33, 4 }
 0x12e   : > { %4306 = vmatmul.msk.bf16.gmra.mxu1 %vm622_vm3, %v4813_v58  ;;  %v1344_v35 = vadd.f32 %v1274_v2, %v922_v40  ;;  %v4323_v58 = vrot.slane %v997_v49, 9 }
 0x12f   : > { %v2023_v24 = vor.u32 %v2022_v9, %v2019_v5 }
 0x131   : > { %v2215_v57 = vpop.f32.mrf.mxu0 }
 0x132   : > { %v1561_v40 = vpop.f32.mrf.mxu3  ;;  %4339 = vmatmul.msk.bf16.gmra.mxu2 %vm622_vm3, %v1193_v46  ;;  %v1129_v46 = vsel %vm5198_vm7, %v4323_v58, %v1128_v53  ;;  %v4498_v53 = vld [vmem:[%s4991_s15 + $0xb4] sm:$0xf]  ;;  %v2024_v58 = vrot.slane %v2023_v24, 4 }
 0x133   : > { %v926_v28 = vpop.f32.mrf.mxu1  ;;  %v1631_v15 = vadd.f32 %v1561_v40, %v1344_v35  ;;  %v1132_v35 = vsel %vm5198_vm7, %v1130_v10, %v1131_v18  ;;  %v1175_v33 = vunpack.c.l.b16 %v1129_v46  ;;  %v4499_v40 = vld [vmem:[%s4991_s15 + $0xb8] sm:$0xf]  ;;  %v2041_v5 = vshrl.u32 %v4498_v53, 16 }
 0x134   : > { %v1176_v20 = vunpack.c.l.b16 %v1132_v35  ;;  %v927_v18 = vadd.f32 %v926_v28, %v5311_v38  ;;  %v2044_v9 = vshll.u32 %v4498_v53, 16  ;;  %v2054_v46 = vshrl.u32 %v4499_v40, 16  ;;  %v998_v35 = vld [vmem:[%s4991_s15 + $0xa8] sm:$0xe] }
 0x135   : > { %v1277_v2 = vpop.f32.mrf.mxu2  ;;  %v5567_v50 = vadd.f32 %v2215_v57, %v1631_v15  ;;  %v2033_v57 = vor.u32 %v2032_v23, %v2028_v62  ;;  %v4883_v23 = vld [vmem:[%s4991_s15 + $0xac] sm:$0xf]  ;;  %v2029_v28 = vsel %vm5007_vm4, %v2024_v58, %v2028_v62 }
 0x136   : > { %v1345_v32 = vadd.f32 %v1277_v2, %v925_v30  ;;  %v1194_v15 = vpack.c.b16 %v1176_v20, %v1175_v33  ;;  %v2050_v2 = vshll.u32 %v4499_v40, 16  ;;  %v2043_v33 = vrot.slane %v2041_v5, 4 }
 0x137   : > { %4452 = vmatmul.msk.bf16.gmra.mxu3 %vm622_vm3, %v4829_v39  ;;  %v2034_v39 = vrot.slane %v2033_v57, 4  ;;  %v2046_v20 = vrot.slane %v2044_v9, 5  ;;  %v2056_v40 = vrot.slane %v2054_v46, 4  ;;  %v4815_v46 = vld [vmem:[%s4991_s15 + $0xa8] sm:$0xff] }
 0x138   : > { %v2052_v57 = vrot.slane %v2050_v2, 5 }
 0x139   : > { %v2218_v49 = vpop.f32.mrf.mxu0  ;;  %v2039_v4 = vsel %vm5007_vm4, %v2034_v39, %v2038_v52 }
 0x13a   : > { %v1564_v0 = vpop.f32.mrf.mxu3  ;;  %v2117_v58 = vunpack.c.l.b16 %v2039_v4  ;;  %v2057_v9 = vor.u32 %v2056_v40, %v2052_v57 }
 0x13b   : > { %v929_v26 = vpop.f32.mrf.mxu1  ;;  %v1632_v63 = vadd.f32 %v1564_v0, %v1345_v32  ;;  %v1135_v32 = vrot.slane %v4883_v23, 5  ;;  %v4830_v0 = vld [vmem:[%s4991_s15 + $0xa8] sm:$0xff] }
 0x13c   : > { %4517 = vmatmul.msk.bf16.gmra.mxu0 %vm622_vm3, %v2134_v8  ;;  %v4884_v8 = vld [vmem:[%s4991_s15 + $0xb0] sm:$0x1]  ;;  %v930_v62 = vadd.f32 %v929_v26, %v5332_v22 }
 0x13d   : > { %v1279_v10 = vpop.f32.mrf.mxu2  ;;  %v5581_v30 = vadd.f32 %v2218_v49, %v1632_v63  ;;  %v1138_v24 = vrot.slane %v4884_v8, 5  ;;  %v4324_v63 = vrot.slane %v998_v35, 9  ;;  %v1137_v53 = vrot.slane %v1135_v32, 4 }
 0x13e   : > { %4307 = vmatmul.msk.bf16.gmra.mxu1 %vm622_vm3, %v4814_v6  ;;  %v1346_v43 = vadd.f32 %v1279_v10, %v927_v18  ;;  %v2116_v18 = vunpack.c.l.b16 %v2029_v28  ;;  %v4500_v10 = vld [vmem:[%s4991_s15 + $0xbc] sm:$0x1] }
 0x13f   : > { %v1139_v5 = vsel %vm5198_vm7, %v1137_v53, %v1138_v24  ;;  %v2060_v22 = vshll.u32 %v4500_v10, 16  ;;  %v4502_v53 = vld [vmem:[%s4991_s15 + $0xc4] sm:$0xf] }
 0x140   : > { %v2135_v26 = vpack.c.b16 %v2117_v58, %v2116_v18  ;;  %v1178_v4 = vunpack.c.l.b16 %v1139_v5  ;;  %v999_v18 = vld [vmem:[%s4991_s15 + $0xb4] sm:$0xe]  ;;  %v4886_v58 = vld [vmem:[%s4991_s15 + $0xb8] sm:$0xf]  ;;  %v2078_v5 = vshrl.u32 %v4502_v53, 16 }
 0x141   : > { %v2220_v38 = vpop.f32.mrf.mxu0  ;;  %v1142_v10 = vrot.slane %v4886_v58, 5 }
 0x142   : > { %v1566_v49 = vpop.f32.mrf.mxu3  ;;  %4340 = vmatmul.msk.bf16.gmra.mxu2 %vm622_vm3, %v1194_v15  ;;  %v2047_v15 = vor.u32 %v2046_v20, %v2043_v33  ;;  %v2062_v33 = vrot.slane %v2060_v22, 5  ;;  %v4501_v20 = vld [vmem:[%s4991_s15 + $0xc0] sm:$0xf]  ;;  %v4887_v22 = vld [vmem:[%s4991_s15 + $0x14] sm:$0x1] }
 0x143   : > { %v931_v6 = vpop.f32.mrf.mxu1  ;;  %v1633_v3 = vadd.f32 %v1566_v49, %v1346_v43  ;;  %v1136_v43 = vsel %vm5198_vm7, %v4324_v63, %v1135_v32  ;;  %v2058_v32 = vrot.slane %v2057_v9, 4 }
 0x144   : > { %v1177_v28 = vunpack.c.l.b16 %v1136_v43  ;;  %v2048_v49 = vrot.slane %v2047_v15, 4  ;;  %v932_v24 = vadd.f32 %v931_v6, %v5346_v31  ;;  %v2065_v6 = vshrl.u32 %v4501_v20, 16 }
 0x145   : > { %v1282_v39 = vpop.f32.mrf.mxu2  ;;  %v5594_v52 = vadd.f32 %v2220_v38, %v1633_v3  ;;  %v4885_v3 = vld [vmem:[%s4991_s15 + $0x10] sm:$0xf]  ;;  %v2063_v31 = vsel %vm5007_vm4, %v2058_v32, %v2062_v33  ;;  %v2068_v15 = vshll.u32 %v4501_v20, 16  ;;  %v2074_v43 = vshll.u32 %v4502_v53, 16  ;;  %v4521_v33 = vld [vmem:[%s4991_s15 + $0xc] sm:$0xe] }
 0x146   : > { %v1347_v23 = vadd.f32 %v1282_v39, %v930_v62  ;;  %v1195_v62 = vpack.c.b16 %v1178_v4, %v1177_v28  ;;  %v4888_v28 = vld [vmem:[%s4991_s15 + $0xbc] sm:$0x1]  ;;  %v1144_v32 = vrot.slane %v1142_v10, 4  ;;  %v4831_v20 = vld [vmem:[%s4991_s15 + $0xb4] sm:$0xff]  ;;  %v4537_v53 = vrot.slane %v4521_v33, 9 }
 0x147   : > { %4453 = vmatmul.msk.bf16.gmra.mxu3 %vm622_vm3, %v4830_v0  ;;  %v2376_v0 = vrot.slane %v4885_v3, 5  ;;  %v2067_v3 = vrot.slane %v2065_v6, 4 }
 0x149   : > { %v2223_v2 = vpop.f32.mrf.mxu0  ;;  %v2378_v9 = vrot.slane %v2376_v0, 4 }
 0x14a   : > { %v1569_v35 = vpop.f32.mrf.mxu3 }
 0x14b   : > { %v934_v38 = vpop.f32.mrf.mxu1  ;;  %v1634_v8 = vadd.f32 %v1569_v35, %v1347_v23  ;;  %v2053_v23 = vsel %vm5007_vm4, %v2048_v49, %v2052_v57  ;;  %v4325_v35 = vrot.slane %v999_v18, 9  ;;  %v2076_v18 = vrot.slane %v2074_v43, 5  ;;  %v4683_v43 = vld [vmem:[%s4991_s15 + $0x18] sm:$0xf] }
 0x14c   : > { %4518 = vmatmul.msk.bf16.gmra.mxu0 %vm622_vm3, %v2135_v26  ;;  %v2379_v26 = vrot.slane %v4887_v22, 5  ;;  %v2118_v57 = vunpack.c.l.b16 %v2053_v23  ;;  %v935_v58 = vadd.f32 %v934_v38, %v5366_v54  ;;  %v2080_v22 = vrot.slane %v2078_v5, 4  ;;  %v4503_v23 = vld [vmem:[%s4991_s15 + $0xc8] sm:$0x1] }
 0x14d   : > { %v1284_v63 = vpop.f32.mrf.mxu2  ;;  %v5610_v39 = vadd.f32 %v2223_v2, %v1634_v8  ;;  %v1145_v2 = vrot.slane %v4888_v28, 5  ;;  %v2119_v8 = vunpack.c.l.b16 %v2063_v31  ;;  %v2377_v31 = vsel %vm5198_vm7, %v4537_v53, %v2376_v0 }
 0x14e   : > { %4308 = vmatmul.msk.bf16.gmra.mxu1 %vm622_vm3, %v4815_v46  ;;  %v1348_v40 = vadd.f32 %v1284_v63, %v932_v24  ;;  %v2070_v63 = vrot.slane %v2068_v15, 5  ;;  %v2488_v54 = vunpack.c.l.b16 %v2377_v31  ;;  %v2084_v33 = vshll.u32 %v4503_v23, 16 }
 0x14f   : > { %v1146_v15 = vsel %vm5198_vm7, %v1144_v32, %v1145_v2  ;;  %v2136_v5 = vpack.c.b16 %v2119_v8, %v2118_v57  ;;  %v3044_v2 = vshrl.u32 %v4683_v43, 16  ;;  %v3047_v32 = vshll.u32 %v4683_v43, 16 }
 0x151   : > { %v2225_v46 = vpop.f32.mrf.mxu0  ;;  %v3046_v23 = vrot.slane %v3044_v2, 4 }
 0x152   : > { %v1571_v4 = vpop.f32.mrf.mxu3  ;;  %4341 = vmatmul.msk.bf16.gmra.mxu2 %vm622_vm3, %v1195_v62  ;;  %v1143_v62 = vsel %vm5198_vm7, %v4325_v35, %v1142_v10  ;;  %v5634_v10 = vld [vmem:[%s4991_s15 + $0x1c] sm:$0xf]  ;;  %v2081_v35 = vor.u32 %v2080_v22, %v2076_v18 }
 0x153   : > { %v936_v49 = vpop.f32.mrf.mxu1  ;;  %v1635_v24 = vadd.f32 %v1571_v4, %v1348_v40  ;;  %v2380_v40 = vsel %vm5198_vm7, %v2378_v9, %v2379_v26  ;;  %v2071_v4 = vor.u32 %v2070_v63, %v2067_v3  ;;  %v4816_v26 = vld [vmem:[%s4991_s15 + $0xb4] sm:$0xff]  ;;  %v3057_v57 = vshrl.u32 %v5634_v10, 16 }
 0x154   : > { %v2489_v38 = vunpack.c.l.b16 %v2380_v40  ;;  %v937_v3 = vadd.f32 %v936_v49, %v5386_v19 }
 0x155   : > { %v1287_v28 = vpop.f32.mrf.mxu2  ;;  %v5638_v53 = vadd.f32 %v2225_v46, %v1635_v24  ;;  %v2072_v46 = vrot.slane %v2071_v4, 4  ;;  %v2082_v24 = vrot.slane %v2081_v35, 4  ;;  %v3059_v43 = vrot.slane %v3057_v57, 4 }
 0x156   : > { %v1349_v6 = vadd.f32 %v1287_v28, %v935_v58  ;;  %v5636_v0 = vpack.c.b16 %v2489_v38, %v2488_v54  ;;  %v1179_v58 = vunpack.c.l.b16 %v1143_v62  ;;  %v1180_v28 = vunpack.c.l.b16 %v1146_v15 }
 0x157   : > { %4454 = vmatmul.msk.bf16.gmra.mxu3 %vm622_vm3, %v4831_v20  ;;  %6318 = vst [vmem:[#allocation5_spill] sm:$0xff] %v5638_v53  ;;  %v3053_v20 = vshll.u32 %v5634_v10, 16  ;;  %v2086_v62 = vrot.slane %v2084_v33, 5  ;;  %v3049_v15 = vrot.slane %v3047_v32, 5  ;;  %v2077_v19 = vsel %vm5007_vm4, %v2072_v46, %v2076_v18  ;;  %v4748_v46 = vld [vmem:[%s4991_s15 + $0x18] sm:$0xe] }
 0x158   : > { %v1196_v22 = vpack.c.b16 %v1180_v28, %v1179_v58  ;;  %v4832_v28 = vld [vmem:[%s4991_s15 + $0xc0] sm:$0xff]  ;;  %v2120_v18 = vunpack.c.l.b16 %v2077_v19 }
 0x159   : > { %v2228_v9 = vpop.f32.mrf.mxu0  ;;  %v3055_v38 = vrot.slane %v3053_v20, 5  ;;  %v2087_v49 = vsel %vm5007_vm4, %v2082_v24, %v2086_v62  ;;  %v3050_v33 = vor.u32 %v3049_v15, %v3046_v23  ;;  %v4686_v24 = vld [vmem:[%s4991_s15 + $0x24] sm:$0xf]  ;;  %v5664_v62 = vld [vmem:[%s4991_s15 + $0x28] sm:$0xf] }
 0x15a   : > { %v1574_v31 = vpop.f32.mrf.mxu3  ;;  %v2121_v32 = vunpack.c.l.b16 %v2087_v49 }
 0x15b   : > { %v939_v40 = vpop.f32.mrf.mxu1  ;;  %v1636_v8 = vadd.f32 %v1574_v31, %v1349_v6  ;;  %v5649_v6 = vld [vmem:[%s4991_s15 + $0x20] sm:$0x1]  ;;  %v3051_v57 = vrot.slane %v3050_v33, 4  ;;  %v4522_v33 = vld [vmem:[%s4991_s15 + $0x18] sm:$0xe] }
 0x15c   : > { %4519 = vmatmul.msk.bf16.gmra.mxu0 %vm622_vm3, %v2136_v5  ;;  %v940_v2 = vadd.f32 %v939_v40, %v5409_v56  ;;  %v4889_v40 = vld [vmem:[%s4991_s15 + $0x1c] sm:$0xf] }
 0x15d   : > { %v1289_v63 = vpop.f32.mrf.mxu2  ;;  %v5646_v53 = vadd.f32 %v2228_v9, %v1636_v8  ;;  %v3063_v9 = vshll.u32 %v5649_v6, 16  ;;  %v2383_v15 = vrot.slane %v4889_v40, 5  ;;  %v3056_v19 = vsel %vm5007_vm4, %v3051_v57, %v3055_v38 }
 0x15e   : > { %4309 = vmatmul.msk.bf16.gmra.mxu1 %vm622_vm3, %v4816_v26  ;;  %v1350_v54 = vadd.f32 %v1289_v63, %v937_v3  ;;  %v3060_v26 = vor.u32 %v3059_v43, %v3055_v38  ;;  %v2137_v63 = vpack.c.b16 %v2121_v32, %v2120_v18  ;;  %v3718_v38 = vrot.slane %v5649_v6, 5  ;;  %v4890_v18 = vld [vmem:[%s4991_s15 + $0x20] sm:$0x1] }
 0x15f   : > { %v3065_v3 = vrot.slane %v3063_v9, 5  ;;  %v3071_v9 = vshll.u32 %v4686_v24, 16  ;;  %v2386_v32 = vrot.slane %v4890_v18, 5  ;;  %v4538_v57 = vrot.slane %v4522_v33, 9 }
 0x160   : > { %v3061_v8 = vrot.slane %v3060_v26, 4  ;;  %v3068_v26 = vshrl.u32 %v4686_v24, 16 }
 0x161   : > { %v2230_v5 = vpop.f32.mrf.mxu0  ;;  %v3073_v6 = vrot.slane %v3071_v9, 5  ;;  %v2384_v33 = vsel %vm5198_vm7, %v4538_v57, %v2383_v15  ;;  %v4689_v57 = vld [vmem:[%s4991_s15 + $0x30] sm:$0xf] }
 0x162   : > { %v1576_v4 = vpop.f32.mrf.mxu3  ;;  %4342 = vmatmul.msk.bf16.gmra.mxu2 %vm622_vm3, %v1196_v22  ;;  %v3715_v22 = vrot.slane %v5634_v10, 5  ;;  %v3066_v49 = vsel %vm5007_vm4, %v3061_v8, %v3065_v3  ;;  %v2385_v8 = vrot.slane %v2383_v15, 4 }
 0x163   : > { %v941_v35 = vpop.f32.mrf.mxu1  ;;  %v1637_v58 = vadd.f32 %v1576_v4, %v1350_v54  ;;  %v4764_v4 = vrot.slane %v4748_v46, 9  ;;  %v4833_v46 = vld [vmem:[%s4991_s15 + $0x18] sm:$0xff]  ;;  %v3430_v24 = vunpack.c.l.b16 %v3066_v49 }
 0x164   : > { %v2387_v49 = vsel %vm5198_vm7, %v2385_v8, %v2386_v32  ;;  %v5704_v8 = vld [vmem:[%s4991_s15 + $0x34] sm:$0xf] }
 0x165   : > { %v1292_v31 = vpop.f32.mrf.mxu2  ;;  %v5666_v23 = vadd.f32 %v2230_v5, %v1637_v58  ;;  %v3077_v5 = vshll.u32 %v5664_v62, 16  ;;  %v3081_v58 = vshrl.u32 %v5664_v62, 16 }
 0x166   : > { %v1351_v20 = vadd.f32 %v1292_v31, %v940_v2  ;;  %v3717_v2 = vrot.slane %v3715_v22, 4 }
 0x167   : > { %4455 = vmatmul.msk.bf16.gmra.mxu3 %vm622_vm3, %v4832_v28  ;;  %v942_v28 = vadd.f32 %v941_v35, %v5429_v29  ;;  %v3070_v35 = vrot.slane %v3068_v26, 4  ;;  %v5687_v40 = vrot.slane %v3077_v5, 5 }
 0x169   : > { %v2233_v56 = vpop.f32.mrf.mxu0  ;;  %v3074_v5 = vor.u32 %v3073_v6, %v3070_v35  ;;  %v4749_v35 = vld [vmem:[%s4991_s15 + $0x24] sm:$0xe] }
 0x16a   : > { %v1579_v54 = vpop.f32.mrf.mxu3 }
 0x16b   : > { %v944_v43 = vpop.f32.mrf.mxu1  ;;  %v1638_v10 = vadd.f32 %v1579_v54, %v1351_v20  ;;  %v3429_v20 = vunpack.c.l.b16 %v3056_v19  ;;  %v3083_v54 = vrot.slane %v3081_v58, 4 }
 0x16c   : > { %4520 = vmatmul.msk.bf16.gmra.mxu0 %vm622_vm3, %v2137_v63  ;;  %v3716_v63 = vsel %vm5198_vm7, %v4764_v4, %v3715_v22  ;;  %v945_v15 = vadd.f32 %v944_v43, %v5309_v37  ;;  %v3722_v37 = vrot.slane %v5664_v62, 5 }
 0x16d   : > { %v1294_v31 = vpop.f32.mrf.mxu2  ;;  %v5685_v29 = vadd.f32 %v2233_v56, %v1638_v10  ;;  %v3461_v56 = vpack.c.b16 %v3430_v24, %v3429_v20  ;;  %v3827_v4 = vunpack.c.l.b16 %v3716_v63  ;;  %v3084_v58 = vor.u32 %v3083_v54, %v5687_v40 }
 0x16e   : > { %4554 = vmatmul.msk.bf16.vlgmr.msra.gmra.mxu1 %vm622_vm3, %v5636_v0  ;;  %v1352_v3 = vadd.f32 %v1294_v31, %v942_v28  ;;  %v3719_v0 = vsel %vm5198_vm7, %v3717_v2, %v3718_v38  ;;  %v5696_v28 = vld [vmem:[%s4991_s15 + $0x2c] sm:$0x1]  ;;  %v2490_v2 = vunpack.c.l.b16 %v2384_v33  ;;  %v2491_v38 = vunpack.c.l.b16 %v2387_v49 }
 0x16f   : > { %v3828_v9 = vunpack.c.l.b16 %v3719_v0  ;;  %v3087_v18 = vshll.u32 %v5696_v28, 16  ;;  %v3092_v54 = vshrl.u32 %v4689_v57, 16  ;;  %v3095_v0 = vshll.u32 %v4689_v57, 16 }
 0x170   : > { %v2521_v24 = vpack.c.b16 %v2491_v38, %v2490_v2  ;;  %v3101_v33 = vshll.u32 %v5704_v8, 16  ;;  %v3105_v49 = vshrl.u32 %v5704_v8, 16  ;;  %v4765_v2 = vrot.slane %v4749_v35, 9 }
 0x171   : > { %v2235_v19 = vpop.f32.mrf.mxu0  ;;  %v3859_v20 = vpack.c.b16 %v3828_v9, %v3827_v4  ;;  %v3089_v63 = vrot.slane %v3087_v18, 5  ;;  %v4891_v4 = vld [vmem:[%s4991_s15 + $0x28] sm:$0xf]  ;;  %v3725_v62 = vrot.slane %v5696_v28, 5  ;;  %v3097_v35 = vrot.slane %v3095_v0, 5 }
 0x172   : > { %v1581_v22 = vpop.f32.mrf.mxu3  ;;  %4667 = vmatmul.msk.bf16.vlgmr.msra.gmra.mxu2 %vm622_vm3, %v4833_v46  ;;  %v3085_v46 = vrot.slane %v3084_v58, 4  ;;  %v2390_v9 = vrot.slane %v4891_v4, 5  ;;  %v5725_v28 = vrot.slane %v3101_v33, 5  ;;  %v4834_v4 = vld [vmem:[%s4991_s15 + $0x24] sm:$0xff] }
 0x173   : > { %v946_v26 = vpop.f32.mrf.mxu1  ;;  %v1639_v10 = vadd.f32 %v1581_v22, %v1352_v3  ;;  %v3075_v3 = vrot.slane %v3074_v5, 4  ;;  %v4892_v5 = vld [vmem:[%s4991_s15 + $0x2c] sm:$0x1] }
 0x174   : > { %v2393_v58 = vrot.slane %v4892_v5, 5  ;;  %v3090_v18 = vsel %vm5007_vm4, %v3085_v46, %v3089_v63  ;;  %v3723_v63 = vsel %vm5198_vm7, %v4765_v2, %v3722_v37 }
 0x175   : > { %v1297_v32 = vpop.f32.mrf.mxu2  ;;  %v5709_v43 = vadd.f32 %v2235_v19, %v1639_v10  ;;  %v4523_v19 = vld [vmem:[%s4991_s15 + $0x24] sm:$0xe]  ;;  %v947_v10 = vadd.f32 %v946_v26, %v5330_v1  ;;  %v3080_v38 = vsel %vm5007_vm4, %v3075_v3, %v5687_v40  ;;  %v2392_v26 = vrot.slane %v2390_v9, 4 }
 0x176   : > { %v1353_v31 = vadd.f32 %v1297_v32, %v945_v15  ;;  %v3724_v32 = vrot.slane %v3722_v37, 4  ;;  %v4539_v1 = vrot.slane %v4523_v19, 9  ;;  %v3431_v40 = vunpack.c.l.b16 %v3080_v38 }
 0x177   : > { %4732 = vmatmul.msk.bf16.vlgmr.msra.gmra.mxu3 %vm622_vm3, %v3461_v56  ;;  %6319 = vst [vmem:[#allocation6_spill] sm:$0xff] %v5709_v43  ;;  %v3432_v3 = vunpack.c.l.b16 %v3090_v18  ;;  %v5731_v43 = vld [vmem:[%s4991_s15 + $0x38] sm:$0x1] }
 0x178   : > { %v3111_v37 = vshll.u32 %v5731_v43, 16 }
 0x179   : > { %v2238_v6 = vpop.f32.mrf.mxu0  ;;  %v3462_v19 = vpack.c.b16 %v3432_v3, %v3431_v40  ;;  %v4893_v3 = vld [vmem:[%s4991_s15 + $0x34] sm:$0xf] }
 0x17a   : > { %v1584_v22 = vpop.f32.mrf.mxu3 }
 0x17b   : > { %v949_v56 = vpop.f32.mrf.mxu1  ;;  %v1640_v15 = vadd.f32 %v1584_v22, %v1353_v31  ;;  %v3094_v31 = vrot.slane %v3092_v54, 4  ;;  %v3107_v22 = vrot.slane %v3105_v49, 4  ;;  %v2394_v49 = vsel %vm5198_vm7, %v2392_v26, %v2393_v58  ;;  %v5750_v26 = vld [vmem:[%s4991_s15 + $0x40] sm:$0xf] }
 0x17c   : > { %4781 = vmatmul.msk.bf16.vlgmr.msra.gmra.mxu0 %vm622_vm3, %v3859_v20 }
 0x17d   : > { %v1299_v57 = vpop.f32.mrf.mxu2  ;;  %v5728_v5 = vadd.f32 %v2238_v6, %v1640_v15  ;;  %v3098_v54 = vor.u32 %v3097_v35, %v3094_v31  ;;  %v2391_v6 = vsel %vm5198_vm7, %v4539_v1, %v2390_v9  ;;  %v3108_v15 = vor.u32 %v3107_v22, %v5725_v28  ;;  %v4750_v22 = vld [vmem:[%s4991_s15 + $0x30] sm:$0xe] }
 0x17e   : > { %4555 = vmatmul.msk.bf16.gmra.mxu1 %vm622_vm3, %v2521_v24  ;;  %v1354_v20 = vadd.f32 %v1299_v57, %v947_v10  ;;  %v3726_v24 = vsel %vm5198_vm7, %v3724_v32, %v3725_v62  ;;  %v950_v62 = vadd.f32 %v949_v56, %v5349_v21  ;;  %v3829_v10 = vunpack.c.l.b16 %v3723_v63 }
 0x17f   : > { %v3830_v38 = vunpack.c.l.b16 %v3726_v24  ;;  %v2492_v32 = vunpack.c.l.b16 %v2391_v6  ;;  %v2493_v9 = vunpack.c.l.b16 %v2394_v49  ;;  %v3099_v31 = vrot.slane %v3098_v54, 4 }
 0x180   : > { %v3109_v58 = vrot.slane %v3108_v15, 4  ;;  %v3113_v35 = vrot.slane %v3111_v37, 5  ;;  %v3729_v1 = vrot.slane %v5704_v8, 5  ;;  %v2397_v63 = vrot.slane %v4893_v3, 5  ;;  %v4524_v8 = vld [vmem:[%s4991_s15 + $0x30] sm:$0xe] }
 0x181   : > { %v2240_v46 = vpop.f32.mrf.mxu0  ;;  %v2522_v40 = vpack.c.b16 %v2493_v9, %v2492_v32  ;;  %v4766_v49 = vrot.slane %v4750_v22, 9 }
 0x182   : > { %v1586_v0 = vpop.f32.mrf.mxu3  ;;  %4668 = vmatmul.msk.bf16.gmra.mxu2 %vm622_vm3, %v4834_v4  ;;  %v4692_v4 = vld [vmem:[%s4991_s15 + $0x3c] sm:$0xf]  ;;  %v3114_v6 = vsel %vm5007_vm4, %v3109_v58, %v3113_v35  ;;  %v4835_v35 = vld [vmem:[%s4991_s15 + $0x30] sm:$0xff] }
 0x183   : > { %v951_v33 = vpop.f32.mrf.mxu1  ;;  %v1641_v2 = vadd.f32 %v1586_v0, %v1354_v20  ;;  %v3860_v20 = vpack.c.b16 %v3830_v38, %v3829_v10  ;;  %v3104_v0 = vsel %vm5007_vm4, %v3099_v31, %v5725_v28  ;;  %v3116_v15 = vshrl.u32 %v4692_v4, 16  ;;  %v4894_v38 = vld [vmem:[%s4991_s15 + $0x38] sm:$0x1] }
 0x184   : > { %v3731_v10 = vrot.slane %v3729_v1, 4  ;;  %v3732_v28 = vrot.slane %v5731_v43, 5  ;;  %v3433_v9 = vunpack.c.l.b16 %v3104_v0  ;;  %v2399_v31 = vrot.slane %v2397_v63, 4 }
 0x185   : > { %v1302_v18 = vpop.f32.mrf.mxu2  ;;  %v5752_v21 = vadd.f32 %v2240_v46, %v1641_v2  ;;  %v3119_v46 = vshll.u32 %v4692_v4, 16  ;;  %v3125_v2 = vshll.u32 %v5750_v26, 16  ;;  %v3434_v22 = vunpack.c.l.b16 %v3114_v6 }
 0x186   : > { %v1355_v57 = vadd.f32 %v1302_v18, %v950_v62  ;;  %v952_v62 = vadd.f32 %v951_v33, %v5374_v60  ;;  %v2400_v18 = vrot.slane %v4894_v38, 5  ;;  %v3730_v4 = vsel %vm5198_vm7, %v4766_v49, %v3729_v1 }
 0x187   : > { %4733 = vmatmul.msk.bf16.gmra.mxu3 %vm622_vm3, %v3462_v19  ;;  %v3129_v19 = vshrl.u32 %v5750_v26, 16  ;;  %v3118_v60 = vrot.slane %v3116_v15, 4  ;;  %v3121_v33 = vrot.slane %v3119_v46, 5  ;;  %v5773_v43 = vrot.slane %v3125_v2, 5 }
 0x188   : > { %v2401_v6 = vsel %vm5198_vm7, %v2399_v31, %v2400_v18  ;;  %v3831_v49 = vunpack.c.l.b16 %v3730_v4  ;;  %v4751_v4 = vld [vmem:[%s4991_s15 + $0x3c] sm:$0xe] }
 0x189   : > { %v2243_v56 = vpop.f32.mrf.mxu0  ;;  %v3131_v3 = vrot.slane %v3129_v19, 4  ;;  %v3122_v2 = vor.u32 %v3121_v33, %v3118_v60 }
 0x18a   : > { %v1589_v24 = vpop.f32.mrf.mxu3 }
 0x18b   : > { %v954_v54 = vpop.f32.mrf.mxu1  ;;  %v1642_v37 = vadd.f32 %v1589_v24, %v1355_v57  ;;  %v4540_v57 = vrot.slane %v4524_v8, 9  ;;  %v5782_v8 = vld [vmem:[%s4991_s15 + $0x44] sm:$0x1]  ;;  %v3132_v19 = vor.u32 %v3131_v3, %v5773_v43  ;;  %v3123_v31 = vrot.slane %v3122_v2, 4 }
 0x18c   : > { %4782 = vmatmul.msk.bf16.gmra.mxu0 %vm622_vm3, %v3860_v20 }
 0x18d   : > { %v1304_v32 = vpop.f32.mrf.mxu2  ;;  %v5771_v20 = vadd.f32 %v2243_v56, %v1642_v37  ;;  %v2398_v0 = vsel %vm5198_vm7, %v4540_v57, %v2397_v63  ;;  %v3463_v56 = vpack.c.b16 %v3434_v22, %v3433_v9  ;;  %v955_v63 = vadd.f32 %v954_v54, %v5394_v27  ;;  %v5790_v57 = vld [vmem:[%s4991_s15 + $0x4c] sm:$0xf] }
 0x18e   : > { %4556 = vmatmul.msk.bf16.gmra.mxu1 %vm622_vm3, %v2522_v40  ;;  %v1356_v58 = vadd.f32 %v1304_v32, %v952_v62  ;;  %v3733_v40 = vsel %vm5198_vm7, %v3731_v10, %v3732_v28  ;;  %v2494_v62 = vunpack.c.l.b16 %v2398_v0  ;;  %v2495_v10 = vunpack.c.l.b16 %v2401_v6  ;;  %v4695_v32 = vld [vmem:[%s4991_s15 + $0x48] sm:$0xf] }
 0x18f   : > { %v3832_v46 = vunpack.c.l.b16 %v3733_v40  ;;  %v3135_v28 = vshll.u32 %v5782_v8, 16  ;;  %v3736_v27 = vrot.slane %v5750_v26, 5  ;;  %v3140_v33 = vshrl.u32 %v4695_v32, 16 }
 0x190   : > { %v3143_v3 = vshll.u32 %v4695_v32, 16  ;;  %v3149_v40 = vshll.u32 %v5790_v57, 16  ;;  %v3153_v0 = vshrl.u32 %v5790_v57, 16  ;;  %v3739_v26 = vrot.slane %v5782_v8, 5 }
 0x191   : > { %v2245_v24 = vpop.f32.mrf.mxu0  ;;  %v3861_v9 = vpack.c.b16 %v3832_v46, %v3831_v49  ;;  %v3137_v22 = vrot.slane %v3135_v28, 5  ;;  %v4896_v46 = vld [vmem:[%s4991_s15 + $0x44] sm:$0x1]  ;;  %v3738_v28 = vrot.slane %v3736_v27, 4 }
 0x192   : > { %v1591_v1 = vpop.f32.mrf.mxu3  ;;  %4669 = vmatmul.msk.bf16.gmra.mxu2 %vm622_vm3, %v4835_v35  ;;  %v2523_v35 = vpack.c.b16 %v2495_v10, %v2494_v62  ;;  %v2407_v2 = vrot.slane %v4896_v46, 5  ;;  %v3128_v62 = vsel %vm5007_vm4, %v3123_v31, %v5773_v43  ;;  %v3145_v32 = vrot.slane %v3143_v3, 5  ;;  %v5817_v46 = vld [vmem:[%s4991_s15 + $0x50] sm:$0x1] }
 0x193   : > { %v956_v15 = vpop.f32.mrf.mxu1  ;;  %v1643_v37 = vadd.f32 %v1591_v1, %v1356_v58  ;;  %v3133_v58 = vrot.slane %v3132_v19, 4  ;;  %v5811_v8 = vrot.slane %v3149_v40, 5  ;;  %v3435_v43 = vunpack.c.l.b16 %v3128_v62 }
 0x195   : > { %v1307_v38 = vpop.f32.mrf.mxu2  ;;  %v5795_v54 = vadd.f32 %v2245_v24, %v1643_v37  ;;  %v4525_v24 = vld [vmem:[%s4991_s15 + $0x3c] sm:$0xe]  ;;  %v957_v37 = vadd.f32 %v956_v15, %v5411_v47  ;;  %v3138_v10 = vsel %vm5007_vm4, %v3133_v58, %v3137_v22 }
 0x196   : > { %v1357_v18 = vadd.f32 %v1307_v38, %v955_v63  ;;  %v4767_v63 = vrot.slane %v4751_v4, 9  ;;  %v3155_v4 = vrot.slane %v3153_v0, 4  ;;  %v4541_v47 = vrot.slane %v4525_v24, 9 }
 0x197   : > { %4734 = vmatmul.msk.bf16.gmra.mxu3 %vm622_vm3, %v3463_v56  ;;  %v4895_v56 = vld [vmem:[%s4991_s15 + $0x40] sm:$0xf]  ;;  %v3436_v31 = vunpack.c.l.b16 %v3138_v10 }
 0x198   : > { %v2404_v49 = vrot.slane %v4895_v56, 5  ;;  %v3737_v22 = vsel %vm5198_vm7, %v4767_v63, %v3736_v27  ;;  %v3159_v27 = vshll.u32 %v5817_v46, 16 }
 0x199   : > { %v2248_v60 = vpop.f32.mrf.mxu0  ;;  %v3464_v24 = vpack.c.b16 %v3436_v31, %v3435_v43  ;;  %v4897_v31 = vld [vmem:[%s4991_s15 + $0x4c] sm:$0xf] }
 0x19a   : > { %v1594_v6 = vpop.f32.mrf.mxu3  ;;  %v2406_v15 = vrot.slane %v2404_v49, 4 }
 0x19b   : > { %v959_v1 = vpop.f32.mrf.mxu1  ;;  %v1644_v19 = vadd.f32 %v1594_v6, %v1357_v18  ;;  %v3142_v18 = vrot.slane %v3140_v33, 4  ;;  %v4836_v6 = vld [vmem:[%s4991_s15 + $0x3c] sm:$0xff] }
 0x19c   : > { %4783 = vmatmul.msk.bf16.gmra.mxu0 %vm622_vm3, %v3861_v9  ;;  %v2408_v0 = vsel %vm5198_vm7, %v2406_v15, %v2407_v2  ;;  %v5836_v15 = vld [vmem:[%s4991_s15 + $0x58] sm:$0xf] }
 0x19d   : > { %v1309_v38 = vpop.f32.mrf.mxu2  ;;  %v5814_v56 = vadd.f32 %v2248_v60, %v1644_v19  ;;  %v3146_v33 = vor.u32 %v3145_v32, %v3142_v18  ;;  %v2405_v60 = vsel %vm5198_vm7, %v4541_v47, %v2404_v49  ;;  %v3156_v19 = vor.u32 %v3155_v4, %v5811_v8  ;;  %v4752_v4 = vld [vmem:[%s4991_s15 + $0x48] sm:$0xe] }
 0x19e   : > { %4557 = vmatmul.msk.bf16.gmra.mxu1 %vm622_vm3, %v2523_v35  ;;  %v1358_v9 = vadd.f32 %v1309_v38, %v957_v37  ;;  %v3740_v35 = vsel %vm5198_vm7, %v3738_v28, %v3739_v26  ;;  %v960_v26 = vadd.f32 %v959_v1, %v5432_v42  ;;  %v3833_v37 = vunpack.c.l.b16 %v3737_v22 }
 0x19f   : > { %v3834_v62 = vunpack.c.l.b16 %v3740_v35  ;;  %v2496_v28 = vunpack.c.l.b16 %v2405_v60  ;;  %v2497_v49 = vunpack.c.l.b16 %v2408_v0  ;;  %v3147_v18 = vrot.slane %v3146_v33, 4 }
 0x1a0   : > { %v3157_v2 = vrot.slane %v3156_v19, 4  ;;  %v3161_v32 = vrot.slane %v3159_v27, 5  ;;  %v3743_v47 = vrot.slane %v5790_v57, 5  ;;  %v2411_v22 = vrot.slane %v4897_v31, 5  ;;  %v4526_v57 = vld [vmem:[%s4991_s15 + $0x48] sm:$0xe] }
 0x1a1   : > { %v2250_v58 = vpop.f32.mrf.mxu0  ;;  %v2524_v43 = vpack.c.b16 %v2497_v49, %v2496_v28  ;;  %v4768_v0 = vrot.slane %v4752_v4, 9 }
 0x1a2   : > { %v1596_v3 = vpop.f32.mrf.mxu3  ;;  %4670 = vmatmul.msk.bf16.gmra.mxu2 %vm622_vm3, %v4836_v6  ;;  %v4698_v6 = vld [vmem:[%s4991_s15 + $0x54] sm:$0xf]  ;;  %v3162_v60 = vsel %vm5007_vm4, %v3157_v2, %v3161_v32  ;;  %v4837_v32 = vld [vmem:[%s4991_s15 + $0x48] sm:$0xff] }
 0x1a3   : > { %v961_v40 = vpop.f32.mrf.mxu1  ;;  %v1645_v63 = vadd.f32 %v1596_v3, %v1358_v9  ;;  %v3862_v9 = vpack.c.b16 %v3834_v62, %v3833_v37  ;;  %v3152_v3 = vsel %vm5007_vm4, %v3147_v18, %v5811_v8  ;;  %v3164_v19 = vshrl.u32 %v4698_v6, 16  ;;  %v4898_v62 = vld [vmem:[%s4991_s15 + $0x50] sm:$0x1] }
 0x1a4   : > { %v3745_v37 = vrot.slane %v3743_v47, 4  ;;  %v3746_v8 = vrot.slane %v5817_v46, 5  ;;  %v3437_v49 = vunpack.c.l.b16 %v3152_v3  ;;  %v2413_v18 = vrot.slane %v2411_v22, 4 }
 0x1a5   : > { %v1312_v10 = vpop.f32.mrf.mxu2  ;;  %v5838_v42 = vadd.f32 %v2250_v58, %v1645_v63  ;;  %v3167_v58 = vshll.u32 %v4698_v6, 16  ;;  %v3173_v63 = vshll.u32 %v5836_v15, 16  ;;  %v3438_v4 = vunpack.c.l.b16 %v3162_v60 }
 0x1a6   : > { %v1359_v38 = vadd.f32 %v1312_v10, %v960_v26  ;;  %v962_v26 = vadd.f32 %v961_v40, %v5447_v11  ;;  %v2414_v10 = vrot.slane %v4898_v62, 5  ;;  %v3744_v6 = vsel %vm5198_vm7, %v4768_v0, %v3743_v47 }
 0x1a7   : > { %4735 = vmatmul.msk.bf16.gmra.mxu3 %vm622_vm3, %v3464_v24  ;;  %v3177_v24 = vshrl.u32 %v5836_v15, 16  ;;  %v3166_v11 = vrot.slane %v3164_v19, 4  ;;  %v3169_v40 = vrot.slane %v3167_v58, 5  ;;  %v5859_v46 = vrot.slane %v3173_v63, 5 }
 0x1a8   : > { %v2415_v60 = vsel %vm5198_vm7, %v2413_v18, %v2414_v10  ;;  %v3835_v0 = vunpack.c.l.b16 %v3744_v6  ;;  %v4753_v6 = vld [vmem:[%s4991_s15 + $0x54] sm:$0xe] }
 0x1a9   : > { %v2253_v1 = vpop.f32.mrf.mxu0  ;;  %v3179_v31 = vrot.slane %v3177_v24, 4  ;;  %v3170_v63 = vor.u32 %v3169_v40, %v3166_v11 }
 0x1aa   : > { %v1599_v35 = vpop.f32.mrf.mxu3 }
 0x1ab   : > { %v964_v33 = vpop.f32.mrf.mxu1  ;;  %v1646_v27 = vadd.f32 %v1599_v35, %v1359_v38  ;;  %v4542_v38 = vrot.slane %v4526_v57, 9  ;;  %v5868_v57 = vld [vmem:[%s4991_s15 + $0x5c] sm:$0x1]  ;;  %v3180_v24 = vor.u32 %v3179_v31, %v5859_v46  ;;  %v3171_v18 = vrot.slane %v3170_v63, 4 }
 0x1ac   : > { %4784 = vmatmul.msk.bf16.gmra.mxu0 %vm622_vm3, %v3862_v9 }
 0x1ad   : > { %v1314_v28 = vpop.f32.mrf.mxu2  ;;  %v5857_v9 = vadd.f32 %v2253_v1, %v1646_v27  ;;  %v2412_v3 = vsel %vm5198_vm7, %v4542_v38, %v2411_v22  ;;  %v3465_v1 = vpack.c.b16 %v3438_v4, %v3437_v49  ;;  %v965_v22 = vadd.f32 %v964_v33, %v5324_v51  ;;  %v5876_v38 = vld [vmem:[%s4991_s15 + $0x64] sm:$0xf] }
 0x1ae   : > { %4558 = vmatmul.msk.bf16.gmra.mxu1 %vm622_vm3, %v2524_v43  ;;  %v1360_v2 = vadd.f32 %v1314_v28, %v962_v26  ;;  %v3747_v43 = vsel %vm5198_vm7, %v3745_v37, %v3746_v8  ;;  %v2498_v26 = vunpack.c.l.b16 %v2412_v3  ;;  %v2499_v37 = vunpack.c.l.b16 %v2415_v60  ;;  %v4701_v28 = vld [vmem:[%s4991_s15 + $0x60] sm:$0xf] }
 0x1af   : > { %v3836_v58 = vunpack.c.l.b16 %v3747_v43  ;;  %v3183_v8 = vshll.u32 %v5868_v57, 16  ;;  %v3750_v51 = vrot.slane %v5836_v15, 5  ;;  %v3188_v40 = vshrl.u32 %v4701_v28, 16 }
 0x1b0   : > { %v3191_v31 = vshll.u32 %v4701_v28, 16  ;;  %v3197_v43 = vshll.u32 %v5876_v38, 16  ;;  %v3201_v3 = vshrl.u32 %v5876_v38, 16  ;;  %v3753_v15 = vrot.slane %v5868_v57, 5 }
 0x1b1   : > { %v2255_v35 = vpop.f32.mrf.mxu0  ;;  %v3863_v49 = vpack.c.b16 %v3836_v58, %v3835_v0  ;;  %v3185_v4 = vrot.slane %v3183_v8, 5  ;;  %v4900_v58 = vld [vmem:[%s4991_s15 + $0x5c] sm:$0x1]  ;;  %v3752_v8 = vrot.slane %v3750_v51, 4 }
 0x1b2   : > { %v1601_v47 = vpop.f32.mrf.mxu3  ;;  %4671 = vmatmul.msk.bf16.gmra.mxu2 %vm622_vm3, %v4837_v32  ;;  %v2525_v32 = vpack.c.b16 %v2499_v37, %v2498_v26  ;;  %v2421_v63 = vrot.slane %v4900_v58, 5  ;;  %v3176_v26 = vsel %vm5007_vm4, %v3171_v18, %v5859_v46  ;;  %v3193_v28 = vrot.slane %v3191_v31, 5  ;;  %v5903_v58 = vld [vmem:[%s4991_s15 + $0x68] sm:$0x1] }
 0x1b3   : > { %v966_v19 = vpop.f32.mrf.mxu1  ;;  %v1647_v27 = vadd.f32 %v1601_v47, %v1360_v2  ;;  %v3181_v2 = vrot.slane %v3180_v24, 4  ;;  %v5897_v57 = vrot.slane %v3197_v43, 5  ;;  %v3439_v46 = vunpack.c.l.b16 %v3176_v26 }
 0x1b5   : > { %v1317_v62 = vpop.f32.mrf.mxu2  ;;  %v5881_v33 = vadd.f32 %v2255_v35, %v1647_v27  ;;  %v4527_v35 = vld [vmem:[%s4991_s15 + $0x54] sm:$0xe]  ;;  %v967_v27 = vadd.f32 %v966_v19, %v5343_v13  ;;  %v3186_v37 = vsel %vm5007_vm4, %v3181_v2, %v3185_v4 }
 0x1b6   : > { %v1361_v10 = vadd.f32 %v1317_v62, %v965_v22  ;;  %v4769_v22 = vrot.slane %v4753_v6, 9  ;;  %v3203_v6 = vrot.slane %v3201_v3, 4  ;;  %v4543_v13 = vrot.slane %v4527_v35, 9 }
 0x1b7   : > { %4736 = vmatmul.msk.bf16.gmra.mxu3 %vm622_vm3, %v3465_v1  ;;  %v4899_v1 = vld [vmem:[%s4991_s15 + $0x58] sm:$0xf]  ;;  %v3440_v18 = vunpack.c.l.b16 %v3186_v37 }
 0x1b8   : > { %v2418_v0 = vrot.slane %v4899_v1, 5  ;;  %v3751_v4 = vsel %vm5198_vm7, %v4769_v22, %v3750_v51  ;;  %v3207_v51 = vshll.u32 %v5903_v58, 16 }
 0x1b9   : > { %v2258_v11 = vpop.f32.mrf.mxu0  ;;  %v3466_v35 = vpack.c.b16 %v3440_v18, %v3439_v46 }
 0x1ba   : > { %v1604_v60 = vpop.f32.mrf.mxu3  ;;  %v2420_v19 = vrot.slane %v2418_v0, 4 }
 0x1bb   : > { %v969_v47 = vpop.f32.mrf.mxu1  ;;  %v1648_v24 = vadd.f32 %v1604_v60, %v1361_v10  ;;  %v3190_v10 = vrot.slane %v3188_v40, 4  ;;  %v4838_v60 = vld [vmem:[%s4991_s15 + $0x54] sm:$0xff] }
 0x1bc   : > { %4785 = vmatmul.msk.bf16.gmra.mxu0 %vm622_vm3, %v3863_v49  ;;  %v2422_v3 = vsel %vm5198_vm7, %v2420_v19, %v2421_v63  ;;  %v3209_v63 = vrot.slane %v3207_v51, 5  ;;  %v5922_v19 = vld [vmem:[%s4991_s15 + $0x70] sm:$0xf]  ;;  %v4528_v51 = vld [vmem:[%s4991_s15 + $0x60] sm:$0xe] }
 0x1bd   : > { %v1319_v62 = vpop.f32.mrf.mxu2  ;;  %v5900_v1 = vadd.f32 %v2258_v11, %v1648_v24  ;;  %v3194_v40 = vor.u32 %v3193_v28, %v3190_v10  ;;  %v2419_v11 = vsel %vm5198_vm7, %v4543_v13, %v2418_v0  ;;  %v3204_v24 = vor.u32 %v3203_v6, %v5897_v57  ;;  %v4704_v6 = vld [vmem:[%s4991_s15 + $0x6c] sm:$0xf] }
 0x1be   : > { %4559 = vmatmul.msk.bf16.gmra.mxu1 %vm622_vm3, %v2525_v32  ;;  %v1362_v49 = vadd.f32 %v1319_v62, %v967_v27  ;;  %v3754_v32 = vsel %vm5198_vm7, %v3752_v8, %v3753_v15  ;;  %v970_v15 = vadd.f32 %v969_v47, %v5364_v48  ;;  %v3837_v27 = vunpack.c.l.b16 %v3751_v4 }
 0x1bf   : > { %v3838_v26 = vunpack.c.l.b16 %v3754_v32  ;;  %v2500_v8 = vunpack.c.l.b16 %v2419_v11  ;;  %v2501_v62 = vunpack.c.l.b16 %v2422_v3  ;;  %v3195_v10 = vrot.slane %v3194_v40, 4  ;;  %v4901_v11 = vld [vmem:[%s4991_s15 + $0x64] sm:$0xf] }
 0x1c0   : > { %v3205_v28 = vrot.slane %v3204_v24, 4  ;;  %v3757_v13 = vrot.slane %v5876_v38, 5  ;;  %v2425_v3 = vrot.slane %v4901_v11, 5  ;;  %v3212_v38 = vshrl.u32 %v4704_v6, 16 }
 0x1c1   : > { %v2260_v2 = vpop.f32.mrf.mxu0  ;;  %v2526_v46 = vpack.c.b16 %v2501_v62, %v2500_v8  ;;  %v3200_v40 = vsel %vm5007_vm4, %v3195_v10, %v5897_v57  ;;  %v3760_v57 = vrot.slane %v5903_v58, 5 }
 0x1c2   : > { %v1606_v31 = vpop.f32.mrf.mxu3  ;;  %4672 = vmatmul.msk.bf16.gmra.mxu2 %vm622_vm3, %v4838_v60  ;;  %v4754_v60 = vld [vmem:[%s4991_s15 + $0x60] sm:$0xe]  ;;  %v3441_v62 = vunpack.c.l.b16 %v3200_v40  ;;  %v5950_v40 = vld [vmem:[%s4991_s15 + $0x74] sm:$0x1] }
 0x1c3   : > { %v971_v43 = vpop.f32.mrf.mxu1  ;;  %v1649_v22 = vadd.f32 %v1606_v31, %v1362_v49  ;;  %v3864_v49 = vpack.c.b16 %v3838_v26, %v3837_v27  ;;  %v4770_v18 = vrot.slane %v4754_v60, 9  ;;  %v3210_v31 = vsel %vm5007_vm4, %v3205_v28, %v3209_v63  ;;  %v4902_v26 = vld [vmem:[%s4991_s15 + $0x68] sm:$0x1]  ;;  %v4839_v63 = vld [vmem:[%s4991_s15 + $0x60] sm:$0xff] }
 0x1c4   : > { %v3759_v27 = vrot.slane %v3757_v13, 4  ;;  %v4544_v60 = vrot.slane %v4528_v51, 9 }
 0x1c5   : > { %v1322_v37 = vpop.f32.mrf.mxu2  ;;  %v5924_v48 = vadd.f32 %v2260_v2, %v1649_v22  ;;  %v3215_v2 = vshll.u32 %v4704_v6, 16  ;;  %v3221_v22 = vshll.u32 %v5922_v19, 16  ;;  %v3758_v10 = vsel %vm5198_vm7, %v4770_v18, %v3757_v13 }
 0x1c6   : > { %v1363_v0 = vadd.f32 %v1322_v37, %v970_v15  ;;  %v972_v15 = vadd.f32 %v971_v43, %v5382_v7  ;;  %v2428_v37 = vrot.slane %v4902_v26, 5  ;;  %v2427_v6 = vrot.slane %v2425_v3, 4 }
 0x1c7   : > { %4737 = vmatmul.msk.bf16.gmra.mxu3 %vm622_vm3, %v3466_v35  ;;  %v3225_v35 = vshrl.u32 %v5922_v19, 16  ;;  %v3214_v7 = vrot.slane %v3212_v38, 4  ;;  %v3217_v43 = vrot.slane %v3215_v2, 5  ;;  %v5945_v58 = vrot.slane %v3221_v22, 5 }
 0x1c8   : > { %v3761_v11 = vsel %vm5198_vm7, %v3759_v27, %v3760_v57  ;;  %v3839_v18 = vunpack.c.l.b16 %v3758_v10  ;;  %v2426_v38 = vsel %vm5198_vm7, %v4544_v60, %v2425_v3  ;;  %v3231_v27 = vshll.u32 %v5950_v40, 16  ;;  %v5962_v10 = vld [vmem:[%s4991_s15 + $0x7c] sm:$0xf]  ;;  %v4755_v60 = vld [vmem:[%s4991_s15 + $0x6c] sm:$0xe] }
 0x1c9   : > { %v2263_v47 = vpop.f32.mrf.mxu0  ;;  %v3840_v2 = vunpack.c.l.b16 %v3761_v11  ;;  %v3218_v22 = vor.u32 %v3217_v43, %v3214_v7  ;;  %v2502_v26 = vunpack.c.l.b16 %v2426_v38  ;;  %v3245_v11 = vshll.u32 %v5962_v10, 16 }
 0x1ca   : > { %v1609_v4 = vpop.f32.mrf.mxu3 }
 0x1cb   : > { %v974_v32 = vpop.f32.mrf.mxu1  ;;  %v1650_v24 = vadd.f32 %v1609_v4, %v1363_v0  ;;  %v3442_v0 = vunpack.c.l.b16 %v3210_v31  ;;  %v3227_v4 = vrot.slane %v3225_v35, 4  ;;  %v3865_v3 = vpack.c.b16 %v3840_v2, %v3839_v18  ;;  %v4529_v18 = vld [vmem:[%s4991_s15 + $0x6c] sm:$0xe] }
 0x1cc   : > { %4786 = vmatmul.msk.bf16.gmra.mxu0 %vm622_vm3, %v3864_v49 }
 0x1cd   : > { %v1324_v8 = vpop.f32.mrf.mxu2  ;;  %v5943_v49 = vadd.f32 %v2263_v47, %v1650_v24  ;;  %v3467_v13 = vpack.c.b16 %v3442_v0, %v3441_v62  ;;  %v2429_v24 = vsel %vm5198_vm7, %v2427_v6, %v2428_v37  ;;  %v3228_v35 = vor.u32 %v3227_v4, %v5945_v58  ;;  %v4707_v62 = vld [vmem:[%s4991_s15 + $0x78] sm:$0xf] }
 0x1ce   : > { %4560 = vmatmul.msk.bf16.gmra.mxu1 %vm622_vm3, %v2526_v46  ;;  %v1364_v28 = vadd.f32 %v1324_v8, %v972_v15  ;;  %v975_v15 = vadd.f32 %v974_v32, %v5401_v44  ;;  %v2503_v8 = vunpack.c.l.b16 %v2429_v24  ;;  %v3219_v37 = vrot.slane %v3218_v22, 4  ;;  %v4903_v24 = vld [vmem:[%s4991_s15 + $0x70] sm:$0xf] }
 0x1cf   : > { %v3764_v44 = vrot.slane %v5922_v19, 5  ;;  %v3236_v32 = vshrl.u32 %v4707_v62, 16  ;;  %v3239_v4 = vshll.u32 %v4707_v62, 16  ;;  %v2432_v2 = vrot.slane %v4903_v24, 5 }
 0x1d0   : > { %v2527_v43 = vpack.c.b16 %v2503_v8, %v2502_v26  ;;  %v3224_v19 = vsel %vm5007_vm4, %v3219_v37, %v5945_v58  ;;  %v4545_v8 = vrot.slane %v4529_v18, 9  ;;  %v3247_v58 = vrot.slane %v3245_v11, 5 }
 0x1d1   : > { %v2265_v46 = vpop.f32.mrf.mxu0  ;;  %v3241_v62 = vrot.slane %v3239_v4, 5 }
 0x1d2   : > { %v1611_v31 = vpop.f32.mrf.mxu3  ;;  %4673 = vmatmul.msk.bf16.gmra.mxu2 %vm622_vm3, %v4839_v63  ;;  %v3233_v63 = vrot.slane %v3231_v27, 5  ;;  %v3766_v27 = vrot.slane %v3764_v44, 4 }
 0x1d3   : > { %v976_v47 = vpop.f32.mrf.mxu1  ;;  %v1651_v51 = vadd.f32 %v1611_v31, %v1364_v28  ;;  %v3229_v28 = vrot.slane %v3228_v35, 4  ;;  %v3249_v31 = vshrl.u32 %v5962_v10, 16 }
 0x1d4   : > { %v977_v35 = vadd.f32 %v976_v47, %v5424_v12  ;;  %v3443_v12 = vunpack.c.l.b16 %v3224_v19 }
 0x1d5   : > { %v1327_v57 = vpop.f32.mrf.mxu2  ;;  %v5967_v6 = vadd.f32 %v2265_v46, %v1651_v51  ;;  %v4771_v46 = vrot.slane %v4755_v60, 9  ;;  %v3767_v51 = vrot.slane %v5950_v40, 5  ;;  %v4840_v60 = vld [vmem:[%s4991_s15 + $0x6c] sm:$0xff]  ;;  %v2434_v40 = vrot.slane %v2432_v2, 4 }
 0x1d6   : > { %v1365_v0 = vadd.f32 %v1327_v57, %v975_v15  ;;  %v3234_v15 = vsel %vm5007_vm4, %v3229_v28, %v3233_v63  ;;  %v3238_v57 = vrot.slane %v3236_v32, 4  ;;  %v5987_v28 = vld [vmem:[%s4991_s15 + $0x80] sm:$0x1] }
 0x1d7   : > { %4738 = vmatmul.msk.bf16.gmra.mxu3 %vm622_vm3, %v3467_v13  ;;  %v3444_v47 = vunpack.c.l.b16 %v3234_v15  ;;  %v3765_v32 = vsel %vm5198_vm7, %v4771_v46, %v3764_v44  ;;  %v3255_v19 = vshll.u32 %v5987_v28, 16 }
 0x1d8   : > { %v3242_v4 = vor.u32 %v3241_v62, %v3238_v57 }
 0x1d9   : > { %v2268_v7 = vpop.f32.mrf.mxu0  ;;  %v3468_v46 = vpack.c.b16 %v3444_v47, %v3443_v12 }
 0x1da   : > { %v1614_v13 = vpop.f32.mrf.mxu3  ;;  %v3243_v62 = vrot.slane %v3242_v4, 4 }
 0x1db   : > { %v979_v38 = vpop.f32.mrf.mxu1  ;;  %v1652_v22 = vadd.f32 %v1614_v13, %v1365_v0  ;;  %v3251_v0 = vrot.slane %v3249_v31, 4  ;;  %v4904_v13 = vld [vmem:[%s4991_s15 + $0x74] sm:$0x1] }
 0x1dc   : > { %4787 = vmatmul.msk.bf16.gmra.mxu0 %vm622_vm3, %v3865_v3  ;;  %v2435_v3 = vrot.slane %v4904_v13, 5  ;;  %v3257_v13 = vrot.slane %v3255_v19, 5  ;;  %v4530_v19 = vld [vmem:[%s4991_s15 + $0x78] sm:$0xe] }
 0x1dd   : > { %v1329_v26 = vpop.f32.mrf.mxu2  ;;  %v5984_v24 = vadd.f32 %v2268_v7, %v1652_v22  ;;  %v2433_v7 = vsel %vm5198_vm7, %v4545_v8, %v2432_v2  ;;  %v3252_v22 = vor.u32 %v3251_v0, %v3247_v58  ;;  %v3771_v0 = vrot.slane %v5962_v10, 5 }
 0x1de   : > { %4561 = vmatmul.msk.bf16.gmra.mxu1 %vm622_vm3, %v2527_v43  ;;  %v1366_v37 = vadd.f32 %v1329_v26, %v977_v35  ;;  %v3768_v43 = vsel %vm5198_vm7, %v3766_v27, %v3767_v51  ;;  %v2436_v18 = vsel %vm5198_vm7, %v2434_v40, %v2435_v3  ;;  %v980_v51 = vadd.f32 %v979_v38, %v5443_v61  ;;  %v4710_v40 = vld [vmem:[%s4991_s15 + $0x84] sm:$0xf]  ;;  %v6005_v38 = vld [vmem:[%s4991_s15 + $0x88] sm:$0xf] }
 0x1df   : > { %v3841_v35 = vunpack.c.l.b16 %v3765_v32  ;;  %v3842_v15 = vunpack.c.l.b16 %v3768_v43  ;;  %v2504_v57 = vunpack.c.l.b16 %v2433_v7  ;;  %v2505_v26 = vunpack.c.l.b16 %v2436_v18 }
 0x1e0   : > { %v3253_v8 = vrot.slane %v3252_v22, 4  ;;  %v3248_v32 = vsel %vm5007_vm4, %v3243_v62, %v3247_v58  ;;  %v3260_v43 = vshrl.u32 %v4710_v40, 16  ;;  %v3263_v4 = vshll.u32 %v4710_v40, 16  ;;  %v4906_v40 = vld [vmem:[%s4991_s15 + $0x80] sm:$0x1] }
 0x1e1   : > { %v2270_v63 = vpop.f32.mrf.mxu0  ;;  %v2528_v47 = vpack.c.b16 %v2505_v26, %v2504_v57  ;;  %v3773_v18 = vrot.slane %v3771_v0, 4  ;;  %v3774_v22 = vrot.slane %v5987_v28, 5  ;;  %v3269_v58 = vshll.u32 %v6005_v38, 16 }
 0x1e2   : > { %v1616_v11 = vpop.f32.mrf.mxu3  ;;  %4674 = vmatmul.msk.bf16.gmra.mxu2 %vm622_vm3, %v4840_v60  ;;  %v4756_v60 = vld [vmem:[%s4991_s15 + $0x78] sm:$0xe]  ;;  %v3258_v7 = vsel %vm5007_vm4, %v3253_v8, %v3257_v13  ;;  %v4546_v62 = vrot.slane %v4530_v19, 9 }
 0x1e3   : > { %v981_v31 = vpop.f32.mrf.mxu1  ;;  %v1653_v44 = vadd.f32 %v1616_v11, %v1366_v37  ;;  %v3866_v37 = vpack.c.b16 %v3842_v15, %v3841_v35  ;;  %v4772_v61 = vrot.slane %v4756_v60, 9  ;;  %v3273_v35 = vshrl.u32 %v6005_v38, 16  ;;  %v4841_v8 = vld [vmem:[%s4991_s15 + $0x78] sm:$0xff] }
 0x1e4   : > { %v982_v15 = vadd.f32 %v981_v31, %v5460_v36  ;;  %v3446_v26 = vunpack.c.l.b16 %v3258_v7  ;;  %v3265_v60 = vrot.slane %v3263_v4, 5  ;;  %v3775_v36 = vsel %vm5198_vm7, %v3773_v18, %v3774_v22 }
 0x1e5   : > { %v1332_v27 = vpop.f32.mrf.mxu2  ;;  %v6007_v3 = vadd.f32 %v2270_v63, %v1653_v44  ;;  %v3772_v28 = vsel %vm5198_vm7, %v4772_v61, %v3771_v0  ;;  %v6030_v31 = vrot.slane %v3269_v58, 5  ;;  %v3275_v0 = vrot.slane %v3273_v35, 4  ;;  %v6033_v61 = vld [vmem:[%s4991_s15 + $0x8c] sm:$0x1]  ;;  %v4713_v35 = vld [vmem:[%s4991_s15 + $0x90] sm:$0xf] }
 0x1e6   : > { %v1367_v2 = vadd.f32 %v1332_v27, %v980_v51  ;;  %v3445_v27 = vunpack.c.l.b16 %v3248_v32  ;;  %v3279_v58 = vshll.u32 %v6033_v61, 16 }
 0x1e7   : > { %4739 = vmatmul.msk.bf16.gmra.mxu3 %vm622_vm3, %v3468_v46  ;;  %v4905_v46 = vld [vmem:[%s4991_s15 + $0x7c] sm:$0xf] }
 0x1e8   : > { %v2439_v51 = vrot.slane %v4905_v46, 5  ;;  %v3469_v32 = vpack.c.b16 %v3446_v26, %v3445_v27 }
 0x1e9   : > { %v2273_v12 = vpop.f32.mrf.mxu0 }
 0x1ea   : > { %v1619_v11 = vpop.f32.mrf.mxu3  ;;  %v2441_v13 = vrot.slane %v2439_v51, 4 }
 0x1eb   : > { %v2596_v10 = vpop.f32.mrf.mxu1  ;;  %v1654_v63 = vadd.f32 %v1619_v11, %v1367_v2  ;;  %v2442_v11 = vrot.slane %v4906_v40, 5 }
 0x1ec   : > { %v2676_v44 = vadd.f32 %v2596_v10, %v5477_v45  ;;  %4788 = vmatmul.msk.bf16.gmra.mxu0 %vm622_vm3, %v3866_v37  ;;  %v3262_v45 = vrot.slane %v3260_v43, 4  ;;  %v3843_v43 = vunpack.c.l.b16 %v3772_v28  ;;  %v3844_v10 = vunpack.c.l.b16 %v3775_v36 }
 0x1ed   : > { %v1334_v57 = vpop.f32.mrf.mxu2  ;;  %v6026_v37 = vadd.f32 %v2273_v12, %v1654_v63  ;;  %v2440_v12 = vsel %vm5198_vm7, %v4546_v62, %v2439_v51  ;;  %v2443_v18 = vsel %vm5198_vm7, %v2441_v13, %v2442_v11  ;;  %v3276_v63 = vor.u32 %v3275_v0, %v6030_v31 }
 0x1ee   : > { %4562 = vmatmul.msk.bf16.gmra.mxu1 %vm622_vm3, %v2528_v47  ;;  %v1368_v2 = vadd.f32 %v1334_v57, %v982_v15  ;;  %v3266_v22 = vor.u32 %v3265_v60, %v3262_v45  ;;  %v2506_v27 = vunpack.c.l.b16 %v2440_v12  ;;  %v2507_v28 = vunpack.c.l.b16 %v2443_v18  ;;  %v6045_v57 = vld [vmem:[%s4991_s15 + $0x94] sm:$0xf] }
 0x1ef   : > { %v3867_v26 = vpack.c.b16 %v3844_v10, %v3843_v43  ;;  %v3277_v45 = vrot.slane %v3276_v63, 4  ;;  %v3281_v60 = vrot.slane %v3279_v58, 5  ;;  %v3293_v13 = vshll.u32 %v6045_v57, 16  ;;  %v4907_v10 = vld [vmem:[%s4991_s15 + $0x88] sm:$0xf] }
 0x1f0   : > { %v3267_v62 = vrot.slane %v3266_v22, 4  ;;  %v3297_v40 = vshrl.u32 %v6045_v57, 16  ;;  %v2529_v0 = vpack.c.b16 %v2507_v28, %v2506_v27  ;;  %v3781_v28 = vrot.slane %v6033_v61, 5 }
 0x1f1   : > { %v2275_v47 = vpop.f32.mrf.mxu0  ;;  %v6063_v58 = vrot.slane %v3293_v13, 5 }
 0x1f2   : > { %v1621_v4 = vpop.f32.mrf.mxu3  ;;  %4675 = vmatmul.msk.bf16.gmra.mxu2 %vm622_vm3, %v4841_v8  ;;  %v3287_v8 = vshll.u32 %v4713_v35, 16  ;;  %v3272_v22 = vsel %vm5007_vm4, %v3267_v62, %v6030_v31  ;;  %v6068_v31 = vld [vmem:[%s4991_s15 + $0x98] sm:$0x1]  ;;  %v4842_v62 = vld [vmem:[%s4991_s15 + $0x84] sm:$0xff] }
 0x1f3   : > { %v2598_v7 = vpop.f32.mrf.mxu1  ;;  %v1655_v19 = vadd.f32 %v1621_v4, %v1368_v2  ;;  %v4757_v2 = vld [vmem:[%s4991_s15 + $0x84] sm:$0xe]  ;;  %v3303_v61 = vshll.u32 %v6068_v31, 16 }
 0x1f4   : > { %v2677_v46 = vadd.f32 %v2598_v7, %v5490_v41  ;;  %v3284_v41 = vshrl.u32 %v4713_v35, 16  ;;  %v4773_v4 = vrot.slane %v4757_v2, 9  ;;  %v2446_v7 = vrot.slane %v4907_v10, 5  ;;  %v4908_v2 = vld [vmem:[%s4991_s15 + $0x8c] sm:$0x1] }
 0x1f5   : > { %v2883_v15 = vpop.f32.mrf.mxu2  ;;  %v6051_v11 = vadd.f32 %v2275_v47, %v1655_v19  ;;  %v3282_v47 = vsel %vm5007_vm4, %v3277_v45, %v3281_v60  ;;  %v4531_v19 = vld [vmem:[%s4991_s15 + $0x84] sm:$0xe]  ;;  %v3289_v63 = vrot.slane %v3287_v8, 5  ;;  %v3299_v35 = vrot.slane %v3297_v40, 4 }
 0x1f6   : > { %v2963_v51 = vadd.f32 %v2883_v15, %v2676_v44  ;;  %v3778_v44 = vrot.slane %v6005_v38, 5  ;;  %v3286_v38 = vrot.slane %v3284_v41, 4  ;;  %v4547_v45 = vrot.slane %v4531_v19, 9  ;;  %v4716_v19 = vld [vmem:[%s4991_s15 + $0x9c] sm:$0xf] }
 0x1f7   : > { %4740 = vmatmul.msk.bf16.gmra.mxu3 %vm622_vm3, %v3469_v32  ;;  %6320 = vst [vmem:[#allocation7_spill] sm:$0xff] %v6051_v11  ;;  %v2448_v60 = vrot.slane %v2446_v7, 4  ;;  %v3447_v41 = vunpack.c.l.b16 %v3272_v22  ;;  %v3448_v8 = vunpack.c.l.b16 %v3282_v47  ;;  %v3785_v11 = vrot.slane %v6045_v57, 5 }
 0x1f8   : > { %v3779_v13 = vsel %vm5198_vm7, %v4773_v4, %v3778_v44  ;;  %v3290_v40 = vor.u32 %v3289_v63, %v3286_v38  ;;  %v2447_v10 = vsel %vm5198_vm7, %v4547_v45, %v2446_v7  ;;  %v6086_v38 = vld [vmem:[%s4991_s15 + $0xa0] sm:$0xf]  ;;  %v4758_v45 = vld [vmem:[%s4991_s15 + $0x90] sm:$0xe] }
 0x1f9   : > { %v3935_v36 = vpop.f32.mrf.mxu0  ;;  %v3845_v22 = vunpack.c.l.b16 %v3779_v13 }
 0x1fa   : > { %v3537_v43 = vpop.f32.mrf.mxu3 }
 0x1fb   : > { %v2601_v32 = vpop.f32.mrf.mxu1  ;;  %v3617_v12 = vadd.f32 %v3537_v43, %v2963_v51 }
 0x1fc   : > { %v2678_v18 = vadd.f32 %v2601_v32, %v5503_v16  ;;  %4789 = vmatmul.msk.bf16.gmra.mxu0 %vm622_vm3, %v3867_v26  ;;  %v3780_v16 = vrot.slane %v3778_v44, 4  ;;  %v2449_v26 = vrot.slane %v4908_v2, 5  ;;  %v2508_v2 = vunpack.c.l.b16 %v2447_v10 }
 0x1fd   : > { %v4015_v15 = vadd.f32 %v3935_v36, %v3617_v12  ;;  %v2885_v27 = vpop.f32.mrf.mxu2  ;;  %v3300_v36 = vor.u32 %v3299_v35, %v6063_v58  ;;  %v3470_v12 = vpack.c.b16 %v3448_v8, %v3447_v41  ;;  %v3291_v35 = vrot.slane %v3290_v40, 4 }
 0x1fe   : > { %4563 = vmatmul.msk.bf16.gmra.mxu1 %vm622_vm3, %v2529_v0  ;;  %v2964_v51 = vadd.f32 %v2885_v27, %v2677_v46  ;;  %v3782_v46 = vsel %vm5198_vm7, %v3780_v16, %v3781_v28  ;;  %v2450_v44 = vsel %vm5198_vm7, %v2448_v60, %v2449_v26  ;;  %v3305_v16 = vrot.slane %v3303_v61, 5 }
 0x1ff   : > { %v3846_v63 = vunpack.c.l.b16 %v3782_v46  ;;  %v3301_v27 = vrot.slane %v3300_v36, 4  ;;  %v2509_v7 = vunpack.c.l.b16 %v2450_v44  ;;  %v3311_v26 = vshll.u32 %v4716_v19, 16 }
 0x200   : > { %v4088_v41 = vmul.f32 %v4015_v15, %v4015_v15  ;;  %v3321_v40 = vshrl.u32 %v6086_v38, 16  ;;  %v4774_v61 = vrot.slane %v4758_v45, 9  ;;  %v4910_v45 = vld [vmem:[%s4991_s15 + $0x98] sm:$0x1] }
 0x201   : > { %v3937_v0 = vpop.f32.mrf.mxu0  ;;  %v3868_v36 = vpack.c.b16 %v3846_v63, %v3845_v22  ;;  %v4532_v22 = vld [vmem:[%s4991_s15 + $0x90] sm:$0xe] }
 0x202   : > { %v3539_v43 = vpop.f32.mrf.mxu3  ;;  %4676 = vmatmul.msk.bf16.gmra.mxu2 %vm622_vm3, %v4842_v62 }
 0x203   : > { %v2603_v32 = vpop.f32.mrf.mxu1  ;;  %v3618_v4 = vadd.f32 %v3539_v43, %v2964_v51  ;;  %v3308_v51 = vshrl.u32 %v4716_v19, 16  ;;  %v3296_v43 = vsel %vm5007_vm4, %v3291_v35, %v6063_v58  ;;  %v3323_v58 = vrot.slane %v3321_v40, 4 }
 0x204   : > { %v2679_v47 = vadd.f32 %v2603_v32, %v5516_v14  ;;  %v3317_v14 = vshll.u32 %v6086_v38, 16  ;;  %v4909_v32 = vld [vmem:[%s4991_s15 + $0x94] sm:$0xf]  ;;  %v3449_v35 = vunpack.c.l.b16 %v3296_v43 }
 0x205   : > { %v4016_v28 = vadd.f32 %v3937_v0, %v3618_v4  ;;  %v2888_v62 = vpop.f32.mrf.mxu2  ;;  %v3788_v0 = vrot.slane %v6068_v31, 5  ;;  %v2453_v10 = vrot.slane %v4909_v32, 5  ;;  %v3306_v4 = vsel %vm5007_vm4, %v3301_v27, %v3305_v16 }
 0x206   : > { %v2965_v60 = vadd.f32 %v2888_v62, %v2678_v18  ;;  %v2530_v18 = vpack.c.b16 %v2509_v7, %v2508_v2  ;;  %v3310_v19 = vrot.slane %v3308_v51, 4  ;;  %v3313_v31 = vrot.slane %v3311_v26, 5  ;;  %v6108_v51 = vld [vmem:[%s4991_s15 + $0xa4] sm:$0x1] }
 0x207   : > { %v4048_v8 = vadd.f32 %v4016_v28, %v4015_v15  ;;  %v4089_v13 = vmul.f32 %v4016_v28, %v4016_v28  ;;  %4741 = vmatmul.msk.bf16.gmra.mxu3 %vm622_vm3, %v3470_v12  ;;  %v3787_v12 = vrot.slane %v3785_v11, 4  ;;  %v6102_v62 = vrot.slane %v3317_v14, 5 }
 0x208   : > { %v4548_v27 = vrot.slane %v4532_v22, 9  ;;  %v2455_v16 = vrot.slane %v2453_v10, 4  ;;  %v3327_v43 = vshll.u32 %v6108_v51, 16 }
 0x209   : > { %v4120_v46 = vadd.f32 %v4089_v13, %v4088_v41  ;;  %v3940_v57 = vpop.f32.mrf.mxu0  ;;  %v2456_v41 = vrot.slane %v4910_v45, 5  ;;  %v3450_v13 = vunpack.c.l.b16 %v3306_v4  ;;  %v3789_v14 = vsel %vm5198_vm7, %v3787_v12, %v3788_v0 }
 0x20a   : > { %v3542_v15 = vpop.f32.mrf.mxu3  ;;  %v3848_v0 = vunpack.c.l.b16 %v3789_v14  ;;  %v6133_v14 = vld [vmem:[%s4991_s15 + $0xac] sm:$0xf] }
 0x20b   : > { %v2606_v44 = vpop.f32.mrf.mxu1  ;;  %v3619_v63 = vadd.f32 %v3542_v15, %v2965_v60  ;;  %v4843_v60 = vld [vmem:[%s4991_s15 + $0x90] sm:$0xff] }
 0x20c   : > { %v2680_v28 = vadd.f32 %v2606_v44, %v5529_v59  ;;  %4790 = vmatmul.msk.bf16.gmra.mxu0 %vm622_vm3, %v3868_v36  ;;  %v3786_v59 = vsel %vm5198_vm7, %v4774_v61, %v3785_v11  ;;  %v2457_v44 = vsel %vm5198_vm7, %v2455_v16, %v2456_v41  ;;  %v3471_v61 = vpack.c.b16 %v3450_v13, %v3449_v35  ;;  %v4719_v35 = vld [vmem:[%s4991_s15 + $0xa8] sm:$0xf] }
 0x20d   : > { %v4017_v2 = vadd.f32 %v3940_v57, %v3619_v63  ;;  %v2890_v7 = vpop.f32.mrf.mxu2  ;;  %v3314_v57 = vor.u32 %v3313_v31, %v3310_v19  ;;  %v2511_v63 = vunpack.c.l.b16 %v2457_v44 }
 0x20e   : > { %4564 = vmatmul.msk.bf16.gmra.mxu1 %vm622_vm3, %v2530_v18  ;;  %v2966_v26 = vadd.f32 %v2890_v7, %v2679_v47  ;;  %v3324_v18 = vor.u32 %v3323_v58, %v6102_v62  ;;  %v2454_v47 = vsel %vm5198_vm7, %v4548_v27, %v2453_v10  ;;  %v3329_v58 = vrot.slane %v3327_v43, 5  ;;  %v4759_v10 = vld [vmem:[%s4991_s15 + $0x9c] sm:$0xe] }
 0x20f   : > { %v4049_v40 = vadd.f32 %v4048_v8, %v4017_v2  ;;  %v4090_v36 = vmul.f32 %v4017_v2, %v4017_v2  ;;  %v3847_v8 = vunpack.c.l.b16 %v3786_v59  ;;  %v2510_v31 = vunpack.c.l.b16 %v2454_v47  ;;  %v4911_v47 = vld [vmem:[%s4991_s15 + $0xa0] sm:$0xf] }
 0x210   : > { %v3325_v19 = vrot.slane %v3324_v18, 4  ;;  %v3792_v2 = vrot.slane %v6086_v38, 5  ;;  %v3335_v18 = vshll.u32 %v4719_v35, 16  ;;  %v2460_v44 = vrot.slane %v4911_v47, 5 }
 0x211   : > { %v4121_v32 = vadd.f32 %v4120_v46, %v4090_v36  ;;  %v3942_v15 = vpop.f32.mrf.mxu0  ;;  %v3315_v46 = vrot.slane %v3314_v57, 4  ;;  %v3795_v36 = vrot.slane %v6108_v51, 5  ;;  %v3332_v57 = vshrl.u32 %v4719_v35, 16 }
 0x212   : > { %v3544_v11 = vpop.f32.mrf.mxu3  ;;  %4677 = vmatmul.msk.bf16.gmra.mxu2 %vm622_vm3, %v4843_v60  ;;  %v2531_v60 = vpack.c.b16 %v2511_v63, %v2510_v31  ;;  %v3330_v38 = vsel %vm5007_vm4, %v3325_v19, %v3329_v58  ;;  %v3794_v59 = vrot.slane %v3792_v2, 4  ;;  %v3337_v31 = vrot.slane %v3335_v18, 5  ;;  %v4844_v58 = vld [vmem:[%s4991_s15 + $0x9c] sm:$0xff] }
 0x213   : > { %v2608_v4 = vpop.f32.mrf.mxu1  ;;  %v3620_v12 = vadd.f32 %v3544_v11, %v2966_v26  ;;  %v3869_v26 = vpack.c.b16 %v3848_v0, %v3847_v8  ;;  %v3320_v13 = vsel %vm5007_vm4, %v3315_v46, %v6102_v62  ;;  %v3341_v8 = vshll.u32 %v6133_v14, 16 }
 0x214   : > { %v2681_v22 = vadd.f32 %v2608_v4, %v5542_v55  ;;  %v4775_v55 = vrot.slane %v4759_v10, 9  ;;  %v3345_v0 = vshrl.u32 %v6133_v14, 16  ;;  %v3452_v51 = vunpack.c.l.b16 %v3330_v38 }
 0x215   : > { %v4018_v7 = vadd.f32 %v3942_v15, %v3620_v12  ;;  %v2893_v27 = vpop.f32.mrf.mxu2  ;;  %v3334_v19 = vrot.slane %v3332_v57, 4 }
 0x216   : > { %v2967_v16 = vadd.f32 %v2893_v27, %v2680_v28  ;;  %v3793_v4 = vsel %vm5198_vm7, %v4775_v55, %v3792_v2  ;;  %v4912_v27 = vld [vmem:[%s4991_s15 + $0xa4] sm:$0x1]  ;;  %v3347_v2 = vrot.slane %v3345_v0, 4  ;;  %v6152_v55 = vld [vmem:[%s4991_s15 + $0xb0] sm:$0x1] }
 0x217   : > { %v4050_v45 = vadd.f32 %v4049_v40, %v4018_v7  ;;  %v4091_v41 = vmul.f32 %v4018_v7, %v4018_v7  ;;  %4742 = vmatmul.msk.bf16.gmra.mxu3 %vm622_vm3, %v3471_v61  ;;  %v4533_v61 = vld [vmem:[%s4991_s15 + $0x9c] sm:$0xe]  ;;  %v2462_v7 = vrot.slane %v2460_v44, 4  ;;  %v3338_v18 = vor.u32 %v3337_v31, %v3334_v19  ;;  %v4760_v31 = vld [vmem:[%s4991_s15 + $0xa8] sm:$0xe] }
 0x218   : > { %v4549_v10 = vrot.slane %v4533_v61, 9  ;;  %v3351_v47 = vshll.u32 %v6152_v55, 16 }
 0x219   : > { %v4122_v28 = vadd.f32 %v4121_v32, %v4091_v41  ;;  %v3945_v40 = vpop.f32.mrf.mxu0  ;;  %v3451_v32 = vunpack.c.l.b16 %v3320_v13 }
 0x21a   : > { %v3547_v43 = vpop.f32.mrf.mxu3  ;;  %v3353_v19 = vrot.slane %v3351_v47, 5 }
 0x21b   : > { %v2611_v15 = vpop.f32.mrf.mxu1  ;;  %v3621_v11 = vadd.f32 %v3547_v43, %v2967_v16  ;;  %v2463_v16 = vrot.slane %v4912_v27, 5  ;;  %v3472_v38 = vpack.c.b16 %v3452_v51, %v3451_v32  ;;  %v4722_v32 = vld [vmem:[%s4991_s15 + $0xb4] sm:$0xf]  ;;  %v6164_v51 = vld [vmem:[%s4991_s15 + $0xb8] sm:$0xf] }
 0x21c   : > { %v2682_v62 = vadd.f32 %v2611_v15, %v5554_v34  ;;  %4791 = vmatmul.msk.bf16.gmra.mxu0 %vm622_vm3, %v3869_v26  ;;  %v3796_v34 = vsel %vm5198_vm7, %v3794_v59, %v3795_v36  ;;  %v6149_v26 = vrot.slane %v3341_v8, 5 }
 0x21d   : > { %v4019_v12 = vadd.f32 %v3945_v40, %v3621_v11  ;;  %v2895_v46 = vpop.f32.mrf.mxu2  ;;  %v3849_v40 = vunpack.c.l.b16 %v3793_v4  ;;  %v2464_v57 = vsel %vm5198_vm7, %v2462_v7, %v2463_v16  ;;  %v3369_v7 = vshrl.u32 %v6164_v51, 16 }
 0x21e   : > { %4565 = vmatmul.msk.bf16.gmra.mxu1 %vm622_vm3, %v2531_v60  ;;  %v2968_v63 = vadd.f32 %v2895_v46, %v2681_v22  ;;  %v3850_v22 = vunpack.c.l.b16 %v3796_v34  ;;  %v3348_v15 = vor.u32 %v3347_v2, %v6149_v26  ;;  %v2513_v0 = vunpack.c.l.b16 %v2464_v57 }
 0x21f   : > { %v4051_v35 = vadd.f32 %v4050_v45, %v4019_v12  ;;  %v4092_v41 = vmul.f32 %v4019_v12, %v4019_v12  ;;  %v2461_v45 = vsel %vm5198_vm7, %v4549_v10, %v2460_v44  ;;  %v3339_v12 = vrot.slane %v3338_v18, 4 }
 0x220   : > { %v2512_v8 = vunpack.c.l.b16 %v2461_v45  ;;  %v3870_v44 = vpack.c.b16 %v3850_v22, %v3849_v40  ;;  %v3365_v10 = vshll.u32 %v6164_v51, 16  ;;  %v4913_v40 = vld [vmem:[%s4991_s15 + $0xac] sm:$0xf]  ;;  %v4534_v45 = vld [vmem:[%s4991_s15 + $0xa8] sm:$0xe] }
 0x221   : > { %v4123_v13 = vadd.f32 %v4122_v28, %v4092_v41  ;;  %v3947_v60 = vpop.f32.mrf.mxu0 }
 0x222   : > { %v3549_v59 = vpop.f32.mrf.mxu3  ;;  %4678 = vmatmul.msk.bf16.gmra.mxu2 %vm622_vm3, %v4844_v58  ;;  %v3359_v58 = vshll.u32 %v4722_v32, 16  ;;  %v2532_v41 = vpack.c.b16 %v2513_v0, %v2512_v8  ;;  %v6180_v18 = vrot.slane %v3365_v10, 5  ;;  %v4845_v8 = vld [vmem:[%s4991_s15 + $0xa8] sm:$0xff]  ;;  %v4550_v0 = vrot.slane %v4534_v45, 9 }
 0x223   : > { %v2613_v36 = vpop.f32.mrf.mxu1  ;;  %v3622_v43 = vadd.f32 %v3549_v59, %v2968_v63  ;;  %v3356_v63 = vshrl.u32 %v4722_v32, 16 }
 0x224   : > { %v2683_v28 = vadd.f32 %v2613_v36, %v5567_v50  ;;  %v3349_v50 = vrot.slane %v3348_v15, 4  ;;  %v3344_v36 = vsel %vm5007_vm4, %v3339_v12, %v6149_v26  ;;  %v3361_v57 = vrot.slane %v3359_v58, 5  ;;  %v6185_v26 = vld [vmem:[%s4991_s15 + $0xbc] sm:$0x1] }
 0x225   : > { %v4020_v11 = vadd.f32 %v3947_v60, %v3622_v43  ;;  %v2898_v61 = vpop.f32.mrf.mxu2  ;;  %v4776_v60 = vrot.slane %v4760_v31, 9  ;;  %v3371_v43 = vrot.slane %v3369_v7, 4 }
 0x226   : > { %v2969_v4 = vadd.f32 %v2898_v61, %v2682_v62  ;;  %v3799_v62 = vrot.slane %v6133_v14, 5  ;;  %v3358_v14 = vrot.slane %v3356_v63, 4 }
 0x227   : > { %v4052_v46 = vadd.f32 %v4051_v35, %v4020_v11  ;;  %v4093_v34 = vmul.f32 %v4020_v11, %v4020_v11  ;;  %4743 = vmatmul.msk.bf16.gmra.mxu3 %vm622_vm3, %v3472_v38  ;;  %v2467_v38 = vrot.slane %v4913_v40, 5  ;;  %v3802_v11 = vrot.slane %v6152_v55, 5 }
 0x228   : > { %v3800_v31 = vsel %vm5198_vm7, %v4776_v60, %v3799_v62  ;;  %v3362_v63 = vor.u32 %v3361_v57, %v3358_v14  ;;  %v3372_v58 = vor.u32 %v3371_v43, %v6180_v18  ;;  %v3375_v55 = vshll.u32 %v6185_v26, 16 }
 0x229   : > { %v4124_v27 = vadd.f32 %v4123_v13, %v4093_v34  ;;  %v3950_v16 = vpop.f32.mrf.mxu0  ;;  %v3354_v13 = vsel %vm5007_vm4, %v3349_v50, %v3353_v19  ;;  %v2469_v32 = vrot.slane %v2467_v38, 4  ;;  %v3453_v50 = vunpack.c.l.b16 %v3344_v36 }
 0x22a   : > { %v3552_v35 = vpop.f32.mrf.mxu3  ;;  %v3454_v19 = vunpack.c.l.b16 %v3354_v13  ;;  %v3851_v60 = vunpack.c.l.b16 %v3800_v31  ;;  %v3373_v36 = vrot.slane %v3372_v58, 4  ;;  %v3377_v13 = vrot.slane %v3375_v55, 5  ;;  %v4915_v31 = vld [vmem:[%s4991_s15 + $0xb8] sm:$0xf]  ;;  %v4535_v55 = vld [vmem:[%s4991_s15 + $0xb4] sm:$0xe] }
 0x22b   : > { %v2616_v2 = vpop.f32.mrf.mxu1  ;;  %v3623_v59 = vadd.f32 %v3552_v35, %v2969_v4  ;;  %v4914_v4 = vld [vmem:[%s4991_s15 + $0xb0] sm:$0x1] }
 0x22c   : > { %v2684_v22 = vadd.f32 %v2616_v2, %v5581_v30  ;;  %4792 = vmatmul.msk.bf16.gmra.mxu0 %vm622_vm3, %v3870_v44  ;;  %v3801_v30 = vrot.slane %v3799_v62, 4  ;;  %v2470_v44 = vrot.slane %v4914_v4, 5  ;;  %v3473_v2 = vpack.c.b16 %v3454_v19, %v3453_v50 }
 0x22d   : > { %v4021_v15 = vadd.f32 %v3950_v16, %v3623_v59  ;;  %v2900_v47 = vpop.f32.mrf.mxu2  ;;  %v3363_v59 = vrot.slane %v3362_v63, 4  ;;  %v2474_v63 = vrot.slane %v4915_v31, 5 }
 0x22e   : > { %4566 = vmatmul.msk.bf16.gmra.mxu1 %vm622_vm3, %v2532_v41  ;;  %v2970_v61 = vadd.f32 %v2900_v47, %v2683_v28  ;;  %v3803_v28 = vsel %vm5198_vm7, %v3801_v30, %v3802_v11  ;;  %v2468_v41 = vsel %vm5198_vm7, %v4550_v0, %v2467_v38  ;;  %v2471_v62 = vsel %vm5198_vm7, %v2469_v32, %v2470_v44  ;;  %v4725_v38 = vld [vmem:[%s4991_s15 + $0xc0] sm:$0xf]  ;;  %v6210_v0 = vld [vmem:[%s4991_s15 + $0xc4] sm:$0xf]  ;;  %v4761_v44 = vld [vmem:[%s4991_s15 + $0xb4] sm:$0xe] }
 0x22f   : > { %v4053_v12 = vadd.f32 %v4052_v46, %v4021_v15  ;;  %v4094_v34 = vmul.f32 %v4021_v15, %v4021_v15  ;;  %v3852_v40 = vunpack.c.l.b16 %v3803_v28  ;;  %v2514_v57 = vunpack.c.l.b16 %v2468_v41 }
 0x230   : > { %v2515_v43 = vunpack.c.l.b16 %v2471_v62 }
 0x231   : > { %v4125_v10 = vadd.f32 %v4124_v27, %v4094_v34  ;;  %v3952_v7 = vpop.f32.mrf.mxu0  ;;  %v3871_v11 = vpack.c.b16 %v3852_v40, %v3851_v60  ;;  %v3383_v34 = vshll.u32 %v4725_v38, 16  ;;  %v4846_v40 = vld [vmem:[%s4991_s15 + $0xb4] sm:$0xff] }
 0x232   : > { %v3554_v16 = vpop.f32.mrf.mxu3  ;;  %4679 = vmatmul.msk.bf16.gmra.mxu2 %vm622_vm3, %v4845_v8  ;;  %v3806_v8 = vrot.slane %v6164_v51, 5  ;;  %v2533_v4 = vpack.c.b16 %v2515_v43, %v2514_v57  ;;  %v3393_v51 = vshrl.u32 %v6210_v0, 16 }
 0x233   : > { %v2618_v46 = vpop.f32.mrf.mxu1  ;;  %v3624_v35 = vadd.f32 %v3554_v16, %v2970_v61  ;;  %v3378_v61 = vsel %vm5007_vm4, %v3373_v36, %v3377_v13  ;;  %v4777_v16 = vrot.slane %v4761_v44, 9  ;;  %v2476_v36 = vrot.slane %v2474_v63, 4  ;;  %v4916_v13 = vld [vmem:[%s4991_s15 + $0xbc] sm:$0x1] }
 0x234   : > { %v2685_v27 = vadd.f32 %v2618_v46, %v5594_v52  ;;  %v3368_v52 = vsel %vm5007_vm4, %v3363_v59, %v6180_v18  ;;  %v3456_v28 = vunpack.c.l.b16 %v3378_v61  ;;  %v3808_v46 = vrot.slane %v3806_v8, 4 }
 0x235   : > { %v4022_v45 = vadd.f32 %v3952_v7, %v3624_v35  ;;  %v2903_v14 = vpop.f32.mrf.mxu2  ;;  %v3389_v7 = vshll.u32 %v6210_v0, 16  ;;  %v4551_v59 = vrot.slane %v4535_v55, 9 }
 0x236   : > { %v2971_v15 = vadd.f32 %v2903_v14, %v2684_v22 }
 0x237   : > { %v4054_v47 = vadd.f32 %v4053_v12, %v4022_v45  ;;  %v4095_v30 = vmul.f32 %v4022_v45, %v4022_v45  ;;  %4744 = vmatmul.msk.bf16.gmra.mxu3 %vm622_vm3, %v3473_v2  ;;  %v3380_v12 = vshrl.u32 %v4725_v38, 16  ;;  %v3385_v2 = vrot.slane %v3383_v34, 5  ;;  %v6224_v38 = vld [vmem:[%s4991_s15 + $0xc8] sm:$0x1] }
 0x238   : > { %v2477_v45 = vrot.slane %v4916_v13, 5  ;;  %v3391_v43 = vrot.slane %v3389_v7, 5 }
 0x239   : > { %v4126_v22 = vadd.f32 %v4125_v10, %v4095_v30  ;;  %v3955_v32 = vpop.f32.mrf.mxu0  ;;  %v3455_v10 = vunpack.c.l.b16 %v3368_v52  ;;  %v3382_v35 = vrot.slane %v3380_v12, 4  ;;  %v3807_v52 = vsel %vm5198_vm7, %v4777_v16, %v3806_v8  ;;  %v6321_v12 = vld [vmem:[#allocation5_spill] sm:$0xff] }
 0x23a   : > { %v3557_v50 = vpop.f32.mrf.mxu3  ;;  %v3399_v8 = vshll.u32 %v6224_v38, 16 }
 0x23b   : > { %v2621_v19 = vpop.f32.mrf.mxu1  ;;  %v3625_v58 = vadd.f32 %v3557_v50, %v2971_v15  ;;  %v3395_v15 = vrot.slane %v3393_v51, 4  ;;  %v3474_v61 = vpack.c.b16 %v3456_v28, %v3455_v10  ;;  %v3386_v44 = vor.u32 %v3385_v2, %v3382_v35 }
 0x23c   : > { %v2686_v18 = vadd.f32 %v2621_v19, %v5610_v39  ;;  %4793 = vmatmul.msk.bf16.gmra.mxu0 %vm622_vm3, %v3871_v11  ;;  %v3809_v39 = vrot.slane %v6185_v26, 5  ;;  %v3853_v19 = vunpack.c.l.b16 %v3807_v52 }
 0x23d   : > { %v4023_v41 = vadd.f32 %v3955_v32, %v3625_v58  ;;  %v2905_v62 = vpop.f32.mrf.mxu2  ;;  %v3396_v50 = vor.u32 %v3395_v15, %v3391_v43  ;;  %v3387_v10 = vrot.slane %v3386_v44, 4  ;;  %v3816_v44 = vrot.slane %v6224_v38, 5 }
 0x23e   : > { %4567 = vmatmul.msk.bf16.gmra.mxu1 %vm622_vm3, %v2533_v4  ;;  %v2972_v60 = vadd.f32 %v2905_v62, %v2685_v27  ;;  %v3810_v26 = vsel %vm5198_vm7, %v3808_v46, %v3809_v39  ;;  %v2478_v4 = vsel %vm5198_vm7, %v2476_v36, %v2477_v45  ;;  %v4762_v39 = vld [vmem:[%s4991_s15 + $0xc0] sm:$0xe]  ;;  %v6242_v36 = vld [vmem:[%s4991_s15 + $0xd0] sm:$0xf] }
 0x23f   : > { %v4055_v14 = vadd.f32 %v4054_v47, %v4023_v41  ;;  %v4096_v57 = vmul.f32 %v4023_v41, %v4023_v41  ;;  %v2475_v47 = vsel %vm5198_vm7, %v4551_v59, %v2474_v63  ;;  %v3854_v31 = vunpack.c.l.b16 %v3810_v26  ;;  %v4728_v59 = vld [vmem:[%s4991_s15 + $0xcc] sm:$0xf]  ;;  %v4536_v26 = vld [vmem:[%s4991_s15 + $0xc0] sm:$0xe] }
 0x240   : > { %v2516_v7 = vunpack.c.l.b16 %v2475_v47  ;;  %v2517_v51 = vunpack.c.l.b16 %v2478_v4  ;;  %v3397_v46 = vrot.slane %v3396_v50, 4  ;;  %v3401_v41 = vrot.slane %v3399_v8, 5 }
 0x241   : > { %v4127_v30 = vadd.f32 %v4126_v22, %v4096_v57  ;;  %v3957_v11 = vpop.f32.mrf.mxu0  ;;  %v3872_v62 = vpack.c.b16 %v3854_v31, %v3853_v19  ;;  %v3392_v45 = vsel %vm5007_vm4, %v3387_v10, %v3391_v43  ;;  %v4778_v52 = vrot.slane %v4762_v39, 9  ;;  %v4918_v19 = vld [vmem:[%s4991_s15 + $0xc8] sm:$0x1] }
 0x242   : > { %v3559_v27 = vpop.f32.mrf.mxu3  ;;  %4680 = vmatmul.msk.bf16.gmra.mxu2 %vm622_vm3, %v4846_v40  ;;  %v3813_v40 = vrot.slane %v6210_v0, 5  ;;  %v3404_v0 = vshrl.u32 %v4728_v59, 16  ;;  %v3417_v43 = vshrl.u32 %v6242_v36, 16  ;;  %v4552_v50 = vrot.slane %v4536_v26, 9 }
 0x243   : > { %v2623_v32 = vpop.f32.mrf.mxu1  ;;  %v3626_v22 = vadd.f32 %v3559_v27, %v2972_v60  ;;  %v2534_v60 = vpack.c.b16 %v2517_v51, %v2516_v7  ;;  %v3407_v27 = vshll.u32 %v4728_v59, 16  ;;  %v2484_v31 = vrot.slane %v4918_v19, 5 }
 0x244   : > { %v2687_v34 = vadd.f32 %v2623_v32, %v6321_v12  ;;  %v3815_v4 = vrot.slane %v3813_v40, 4  ;;  %v4847_v12 = vld [vmem:[%s4991_s15 + $0xc0] sm:$0xff]  ;;  %v3814_v51 = vsel %vm5198_vm7, %v4778_v52, %v3813_v40 }
 0x245   : > { %v4024_v58 = vadd.f32 %v3957_v11, %v3626_v22  ;;  %v2908_v55 = vpop.f32.mrf.mxu2  ;;  %v3409_v10 = vrot.slane %v3407_v27, 5 }
 0x246   : > { %v2973_v63 = vadd.f32 %v2908_v55, %v2686_v18  ;;  %v3817_v38 = vsel %vm5198_vm7, %v3815_v4, %v3816_v44 }
 0x247   : > { %v4056_v28 = vadd.f32 %v4055_v14, %v4024_v58  ;;  %v4097_v16 = vmul.f32 %v4024_v58, %v4024_v58  ;;  %4745 = vmatmul.msk.bf16.gmra.mxu3 %vm622_vm3, %v3474_v61  ;;  %v4917_v14 = vld [vmem:[%s4991_s15 + $0xc4] sm:$0xf]  ;;  %v3413_v61 = vshll.u32 %v6242_v36, 16 }
 0x248   : > { %v2481_v57 = vrot.slane %v4917_v14, 5 }
 0x249   : > { %v4128_v35 = vadd.f32 %v4127_v30, %v4097_v16  ;;  %v3960_v2 = vpop.f32.mrf.mxu0  ;;  %v3402_v30 = vsel %vm5007_vm4, %v3397_v46, %v3401_v41  ;;  %v3415_v16 = vrot.slane %v3413_v61, 5  ;;  %v3419_v46 = vrot.slane %v3417_v43, 4 }
 0x24a   : > { %v3562_v18 = vpop.f32.mrf.mxu3  ;;  %v2483_v8 = vrot.slane %v2481_v57, 4  ;;  %v3458_v7 = vunpack.c.l.b16 %v3402_v30 }
 0x24b   : > { %v2626_v13 = vpop.f32.mrf.mxu1  ;;  %v3627_v15 = vadd.f32 %v3562_v18, %v2973_v63  ;;  %v3406_v63 = vrot.slane %v3404_v0, 4  ;;  %v3855_v18 = vunpack.c.l.b16 %v3814_v51  ;;  %v3420_v14 = vor.u32 %v3419_v46, %v3415_v16  ;;  %v4848_v46 = vld [vmem:[%s4991_s15 + $0xcc] sm:$0xff] }
 0x24c   : > { %v2688_v11 = vadd.f32 %v2626_v13, %v5646_v53  ;;  %4794 = vmatmul.msk.bf16.gmra.mxu0 %vm622_vm3, %v3872_v62  ;;  %v3457_v53 = vunpack.c.l.b16 %v3392_v45  ;;  %v3856_v13 = vunpack.c.l.b16 %v3817_v38 }
 0x24d   : > { %v4025_v32 = vadd.f32 %v3960_v2, %v3627_v15  ;;  %v2910_v47 = vpop.f32.mrf.mxu2  ;;  %v3410_v45 = vor.u32 %v3409_v10, %v3406_v63 }
 0x24e   : > { %4568 = vmatmul.msk.bf16.gmra.mxu1 %vm622_vm3, %v2534_v60  ;;  %v2974_v22 = vadd.f32 %v2910_v47, %v2687_v34  ;;  %v4730_v34 = vld [vmem:[%s4991_s15 + $0xd4] sm:$0x1]  ;;  %v2485_v60 = vsel %vm5198_vm7, %v2483_v8, %v2484_v31  ;;  %v3475_v59 = vpack.c.b16 %v3458_v7, %v3457_v53  ;;  %v3873_v43 = vpack.c.b16 %v3856_v13, %v3855_v18  ;;  %v4763_v8 = vld [vmem:[%s4991_s15 + $0xcc] sm:$0xe] }
 0x24f   : > { %v4057_v58 = vadd.f32 %v4056_v28, %v4025_v32  ;;  %v4098_v55 = vmul.f32 %v4025_v32, %v4025_v32  ;;  %v2482_v28 = vsel %vm5198_vm7, %v4552_v50, %v2481_v57  ;;  %v3423_v15 = vshll.u32 %v4730_v34, 16 }
 0x250   : > { %v2518_v26 = vunpack.c.l.b16 %v2482_v28  ;;  %v2519_v0 = vunpack.c.l.b16 %v2485_v60  ;;  %v3411_v32 = vrot.slane %v3410_v45, 4  ;;  %v3421_v47 = vrot.slane %v3420_v14, 4 }
 0x251   : > { %v4129_v41 = vadd.f32 %v4128_v35, %v4098_v55  ;;  %v3962_v62 = vpop.f32.mrf.mxu0  ;;  %v3425_v53 = vrot.slane %v3423_v15, 5  ;;  %v3823_v63 = vrot.slane %v4730_v34, 5 }
 0x252   : > { %v3564_v39 = vpop.f32.mrf.mxu3  ;;  %4681 = vmatmul.msk.bf16.gmra.mxu2 %vm622_vm3, %v4847_v12  ;;  %v2535_v44 = vpack.c.b16 %v2519_v0, %v2518_v26  ;;  %v3416_v31 = vsel %vm5007_vm4, %v3411_v32, %v3415_v16 }
 0x253   : > { %v2628_v2 = vpop.f32.mrf.mxu1  ;;  %v3628_v40 = vadd.f32 %v3564_v39, %v2974_v22  ;;  %v3820_v22 = vrot.slane %v6242_v36, 5  ;;  %v4779_v36 = vrot.slane %v4763_v8, 9 }
 0x254   : > { %v2689_v35 = vadd.f32 %v2628_v2, %v5666_v23 }
 0x255   : > { %v4026_v30 = vadd.f32 %v3962_v62, %v3628_v40  ;;  %v2913_v52 = vpop.f32.mrf.mxu2  ;;  %v3822_v51 = vrot.slane %v3820_v22, 4  ;;  %v3821_v16 = vsel %vm5198_vm7, %v4779_v36, %v3820_v22 }
 0x256   : > { %v2975_v27 = vadd.f32 %v2913_v52, %v2688_v11 }
 0x257   : > { %v4058_v61 = vadd.f32 %v4057_v58, %v4026_v30  ;;  %v4099_v57 = vmul.f32 %v4026_v30, %v4026_v30  ;;  %4746 = vmatmul.msk.bf16.gmra.mxu3 %vm622_vm3, %v3475_v59  ;;  %v3426_v58 = vsel %vm5007_vm4, %v3421_v47, %v3425_v53  ;;  %v3824_v25 = vsel %vm5198_vm7, %v3822_v51, %v3823_v63  ;;  %v6322_v59 = vld [vmem:[#allocation6_spill] sm:$0xff] }
 0x258   : > { %v3460_v38 = vunpack.c.l.b16 %v3426_v58  ;;  %v3858_v13 = vunpack.c.l.b16 %v3824_v25 }
 0x259   : > { %v4130_v4 = vadd.f32 %v4129_v41, %v4099_v57  ;;  %v3965_v23 = vpop.f32.mrf.mxu0 }
 0x25a   : > { %v3567_v12 = vpop.f32.mrf.mxu3 }
 0x25b   : > { %v2631_v50 = vpop.f32.mrf.mxu1  ;;  %v3629_v19 = vadd.f32 %v3567_v12, %v2975_v27 }
 0x25c   : > { %v2690_v11 = vadd.f32 %v2631_v50, %v5685_v29  ;;  %4795 = vmatmul.msk.bf16.gmra.mxu0 %vm622_vm3, %v3873_v43  ;;  %v3459_v29 = vunpack.c.l.b16 %v3416_v31 }
 0x25d   : > { %v4027_v55 = vadd.f32 %v3965_v23, %v3629_v19  ;;  %v2915_v7 = vpop.f32.mrf.mxu2 }
 0x25e   : > { %4569 = vmatmul.msk.bf16.gmra.mxu1 %vm622_vm3, %v2535_v44  ;;  %v2976_v10 = vadd.f32 %v2915_v7, %v2689_v35  ;;  %v3476_v34 = vpack.c.b16 %v3460_v38, %v3459_v29  ;;  %v3857_v35 = vunpack.c.l.b16 %v3821_v16 }
 0x25f   : > { %v4059_v41 = vadd.f32 %v4058_v61, %v4027_v55  ;;  %v4100_v62 = vmul.f32 %v4027_v55, %v4027_v55 }
 0x260   : > { %v3874_v26 = vpack.c.b16 %v3858_v13, %v3857_v35 }
 0x261   : > { %v4131_v39 = vadd.f32 %v4130_v4, %v4100_v62  ;;  %v3967_v2 = vpop.f32.mrf.mxu0 }
 0x262   : > { %v3569_v28 = vpop.f32.mrf.mxu3  ;;  %4682 = vmatmul.msk.bf16.gmra.mxu2 %vm622_vm3, %v4848_v46 }
 0x263   : > { %v2633_v60 = vpop.f32.mrf.mxu1  ;;  %v3630_v40 = vadd.f32 %v3569_v28, %v2976_v10 }
 0x264   : > { %v2691_v18 = vadd.f32 %v2633_v60, %v6322_v59 }
 0x265   : > { %v4028_v45 = vadd.f32 %v3967_v2, %v3630_v40  ;;  %v2918_v14 = vpop.f32.mrf.mxu2 }
 0x266   : > { %v2977_v15 = vadd.f32 %v2918_v14, %v2690_v11 }
 0x267   : > { %v4060_v30 = vadd.f32 %v4059_v41, %v4028_v45  ;;  %v4101_v52 = vmul.f32 %v4028_v45, %v4028_v45  ;;  %4747 = vmatmul.msk.bf16.gmra.mxu3 %vm622_vm3, %v3476_v34 }
 0x269   : > { %v4132_v17 = vadd.f32 %v4131_v39, %v4101_v52  ;;  %v3970_v0 = vpop.f32.mrf.mxu0 }
 0x26a   : > { %v3572_v27 = vpop.f32.mrf.mxu3 }
 0x26b   : > { %v2636_v61 = vpop.f32.mrf.mxu1  ;;  %v3631_v57 = vadd.f32 %v3572_v27, %v2977_v15 }
 0x26c   : > { %v2692_v43 = vadd.f32 %v2636_v61, %v5728_v5  ;;  %4796 = vmatmul.msk.bf16.gmra.mxu0 %vm622_vm3, %v3874_v26 }
 0x26d   : > { %v4029_v32 = vadd.f32 %v3970_v0, %v3631_v57  ;;  %v2920_v47 = vpop.f32.mrf.mxu2 }
 0x26e   : > { %v2978_v53 = vadd.f32 %v2920_v47, %v2691_v18 }
 0x26f   : > { %v4061_v4 = vadd.f32 %v4060_v30, %v4029_v32  ;;  %v4102_v23 = vmul.f32 %v4029_v32, %v4029_v32 }
 0x271   : > { %v4133_v44 = vadd.f32 %v4132_v17, %v4102_v23  ;;  %v3972_v22 = vpop.f32.mrf.mxu0 }
 0x272   : > { %v3574_v12 = vpop.f32.mrf.mxu3 }
 0x273   : > { %v2638_v50 = vpop.f32.mrf.mxu1  ;;  %v3632_v8 = vadd.f32 %v3574_v12, %v2978_v53 }
 0x274   : > { %v2693_v19 = vadd.f32 %v2638_v50, %v5752_v21 }
 0x275   : > { %v4030_v11 = vadd.f32 %v3972_v22, %v3632_v8  ;;  %v2923_v31 = vpop.f32.mrf.mxu2 }
 0x276   : > { %v2979_v58 = vadd.f32 %v2923_v31, %v2692_v43 }
 0x277   : > { %v4062_v55 = vadd.f32 %v4061_v4, %v4030_v11  ;;  %v4103_v7 = vmul.f32 %v4030_v11, %v4030_v11 }
 0x279   : > { %v4134_v5 = vadd.f32 %v4133_v44, %v4103_v7  ;;  %v3975_v36 = vpop.f32.mrf.mxu0 }
 0x27a   : > { %v3577_v51 = vpop.f32.mrf.mxu3 }
 0x27b   : > { %v2641_v63 = vpop.f32.mrf.mxu1  ;;  %v3633_v10 = vadd.f32 %v3577_v51, %v2979_v58 }
 0x27c   : > { %v2694_v46 = vadd.f32 %v2641_v63, %v5771_v20 }
 0x27d   : > { %v4031_v41 = vadd.f32 %v3975_v36, %v3633_v10  ;;  %v2925_v62 = vpop.f32.mrf.mxu2 }
 0x27e   : > { %v2980_v29 = vadd.f32 %v2925_v62, %v2693_v19 }
 0x27f   : > { %v4063_v38 = vadd.f32 %v4062_v55, %v4031_v41  ;;  %v4104_v39 = vmul.f32 %v4031_v41, %v4031_v41 }
 0x281   : > { %v4135_v2 = vadd.f32 %v4134_v5, %v4104_v39  ;;  %v3977_v16 = vpop.f32.mrf.mxu0 }
 0x282   : > { %v3579_v21 = vpop.f32.mrf.mxu3 }
 0x283   : > { %v2643_v25 = vpop.f32.mrf.mxu1  ;;  %v3634_v28 = vadd.f32 %v3579_v21, %v2980_v29 }
 0x284   : > { %v2695_v60 = vadd.f32 %v2643_v25, %v5795_v54 }
 0x285   : > { %v4032_v40 = vadd.f32 %v3977_v16, %v3634_v28  ;;  %v2928_v34 = vpop.f32.mrf.mxu2 }
 0x286   : > { %v2981_v59 = vadd.f32 %v2928_v34, %v2694_v46 }
 0x287   : > { %v4064_v18 = vadd.f32 %v4063_v38, %v4032_v40  ;;  %v4105_v35 = vmul.f32 %v4032_v40, %v4032_v40 }
 0x289   : > { %v4136_v13 = vadd.f32 %v4135_v2, %v4105_v35  ;;  %v3980_v45 = vpop.f32.mrf.mxu0 }
 0x28a   : > { %v3582_v20 = vpop.f32.mrf.mxu3 }
 0x28b   : > { %v2646_v14 = vpop.f32.mrf.mxu1  ;;  %v3635_v15 = vadd.f32 %v3582_v20, %v2981_v59 }
 0x28c   : > { %v2696_v30 = vadd.f32 %v2646_v14, %v5814_v56 }
 0x28d   : > { %v4033_v52 = vadd.f32 %v3980_v45, %v3635_v15  ;;  %v2930_v26 = vpop.f32.mrf.mxu2 }
 0x28e   : > { %v2982_v17 = vadd.f32 %v2930_v26, %v2695_v60 }
 0x28f   : > { %v4065_v0 = vadd.f32 %v4064_v18, %v4033_v52  ;;  %v4106_v27 = vmul.f32 %v4033_v52, %v4033_v52 }
 0x291   : > { %v4137_v61 = vadd.f32 %v4136_v13, %v4106_v27  ;;  %v3982_v57 = vpop.f32.mrf.mxu0 }
 0x292   : > { %v3584_v54 = vpop.f32.mrf.mxu3 }
 0x293   : > { %v2648_v43 = vpop.f32.mrf.mxu1  ;;  %v3636_v32 = vadd.f32 %v3584_v54, %v2982_v17 }
 0x294   : > { %v2697_v11 = vadd.f32 %v2648_v43, %v5838_v42 }
 0x295   : > { %v4034_v47 = vadd.f32 %v3982_v57, %v3636_v32  ;;  %v2933_v53 = vpop.f32.mrf.mxu2 }
 0x296   : > { %v2983_v4 = vadd.f32 %v2933_v53, %v2696_v30 }
 0x297   : > { %v4066_v23 = vadd.f32 %v4065_v0, %v4034_v47  ;;  %v4107_v44 = vmul.f32 %v4034_v47, %v4034_v47 }
 0x299   : > { %v4138_v22 = vadd.f32 %v4137_v61, %v4107_v44  ;;  %v3985_v12 = vpop.f32.mrf.mxu0 }
 0x29a   : > { %v3587_v50 = vpop.f32.mrf.mxu3 }
 0x29b   : > { %v2651_v8 = vpop.f32.mrf.mxu1  ;;  %v3637_v56 = vadd.f32 %v3587_v50, %v2983_v4 }
 0x29c   : > { %v2698_v41 = vadd.f32 %v2651_v8, %v5857_v9 }
 0x29d   : > { %v4035_v19 = vadd.f32 %v3985_v12, %v3637_v56  ;;  %v2935_v31 = vpop.f32.mrf.mxu2 }
 0x29e   : > { %v2984_v7 = vadd.f32 %v2935_v31, %v2697_v11 }
 0x29f   : > { %v4067_v58 = vadd.f32 %v4066_v23, %v4035_v19  ;;  %v4108_v55 = vmul.f32 %v4035_v19, %v4035_v19 }
 0x2a1   : > { %v4139_v5 = vadd.f32 %v4138_v22, %v4108_v55  ;;  %v3987_v36 = vpop.f32.mrf.mxu0 }
 0x2a2   : > { %v3589_v51 = vpop.f32.mrf.mxu3 }
 0x2a3   : > { %v2653_v63 = vpop.f32.mrf.mxu1  ;;  %v3638_v10 = vadd.f32 %v3589_v51, %v2984_v7 }
 0x2a4   : > { %v2699_v60 = vadd.f32 %v2653_v63, %v5881_v33 }
 0x2a5   : > { %v4036_v46 = vadd.f32 %v3987_v36, %v3638_v10  ;;  %v2938_v62 = vpop.f32.mrf.mxu2 }
 0x2a6   : > { %v2985_v39 = vadd.f32 %v2938_v62, %v2698_v41 }
 0x2a7   : > { %v4068_v29 = vadd.f32 %v4067_v58, %v4036_v46  ;;  %v4109_v38 = vmul.f32 %v4036_v46, %v4036_v46 }
 0x2a9   : > { %v4140_v2 = vadd.f32 %v4139_v5, %v4109_v38  ;;  %v3990_v16 = vpop.f32.mrf.mxu0 }
 0x2aa   : > { %v3592_v21 = vpop.f32.mrf.mxu3 }
 0x2ab   : > { %v2656_v42 = vpop.f32.mrf.mxu1  ;;  %v3639_v25 = vadd.f32 %v3592_v21, %v2985_v39 }
 0x2ac   : > { %v2700_v15 = vadd.f32 %v2656_v42, %v5900_v1 }
 0x2ad   : > { %v4037_v28 = vadd.f32 %v3990_v16, %v3639_v25  ;;  %v2940_v40 = vpop.f32.mrf.mxu2 }
 0x2ae   : > { %v2986_v18 = vadd.f32 %v2940_v40, %v2699_v60 }
 0x2af   : > { %v4069_v34 = vadd.f32 %v4068_v29, %v4037_v28  ;;  %v4110_v59 = vmul.f32 %v4037_v28, %v4037_v28 }
 0x2b1   : > { %v4141_v35 = vadd.f32 %v4140_v2, %v4110_v59  ;;  %v3992_v13 = vpop.f32.mrf.mxu0 }
 0x2b2   : > { %v3594_v45 = vpop.f32.mrf.mxu3 }
 0x2b3   : > { %v2658_v9 = vpop.f32.mrf.mxu1  ;;  %v3640_v20 = vadd.f32 %v3594_v45, %v2986_v18 }
 0x2b4   : > { %v2701_v43 = vadd.f32 %v2658_v9, %v5924_v48 }
 0x2b5   : > { %v4038_v14 = vadd.f32 %v3992_v13, %v3640_v20  ;;  %v2943_v30 = vpop.f32.mrf.mxu2 }
 0x2b6   : > { %v2987_v17 = vadd.f32 %v2943_v30, %v2700_v15 }
 0x2b7   : > { %v4070_v52 = vadd.f32 %v4069_v34, %v4038_v14  ;;  %v4111_v26 = vmul.f32 %v4038_v14, %v4038_v14 }
 0x2b9   : > { %v4142_v0 = vadd.f32 %v4141_v35, %v4111_v26  ;;  %v3995_v27 = vpop.f32.mrf.mxu0 }
 0x2ba   : > { %v3597_v61 = vpop.f32.mrf.mxu3 }
 0x2bb   : > { %v2661_v33 = vpop.f32.mrf.mxu1  ;;  %v3641_v57 = vadd.f32 %v3597_v61, %v2987_v17 }
 0x2bc   : > { %v2702_v8 = vadd.f32 %v2661_v33, %v5943_v49 }
 0x2bd   : > { %v4039_v54 = vadd.f32 %v3995_v27, %v3641_v57  ;;  %v2945_v32 = vpop.f32.mrf.mxu2 }
 0x2be   : > { %v2988_v4 = vadd.f32 %v2945_v32, %v2701_v43 }
 0x2bf   : > { %v4071_v47 = vadd.f32 %v4070_v52, %v4039_v54  ;;  %v4112_v53 = vmul.f32 %v4039_v54, %v4039_v54 }
 0x2c1   : > { %v4143_v23 = vadd.f32 %v4142_v0, %v4112_v53  ;;  %v3997_v44 = vpop.f32.mrf.mxu0 }
 0x2c2   : > { %v3599_v22 = vpop.f32.mrf.mxu3 }
 0x2c3   : > { %v2663_v1 = vpop.f32.mrf.mxu1  ;;  %v3642_v12 = vadd.f32 %v3599_v22, %v2988_v4 }
 0x2c4   : > { %v2703_v51 = vadd.f32 %v2663_v1, %v5967_v6 }
 0x2c5   : > { %v4040_v50 = vadd.f32 %v3997_v44, %v3642_v12  ;;  %v2948_v56 = vpop.f32.mrf.mxu2 }
 0x2c6   : > { %v2989_v31 = vadd.f32 %v2948_v56, %v2702_v8 }
 0x2c7   : > { %v4072_v19 = vadd.f32 %v4071_v47, %v4040_v50  ;;  %v4113_v11 = vmul.f32 %v4040_v50, %v4040_v50  ;;  %v6323_v47 = vld [vmem:[#allocation7_spill] sm:$0xff] }
 0x2c9   : > { %v4144_v58 = vadd.f32 %v4143_v23, %v4113_v11  ;;  %v4000_v55 = vpop.f32.mrf.mxu0 }
 0x2ca   : > { %v3602_v7 = vpop.f32.mrf.mxu3 }
 0x2cb   : > { %v3643_v48 = vadd.f32 %v3602_v7, %v2989_v31  ;;  %v2666_v5 = vpop.f32.mrf.mxu1 }
 0x2cc   : > { %v2704_v2 = vadd.f32 %v2666_v5, %v5984_v24 }
 0x2cd   : > { %v4041_v36 = vadd.f32 %v4000_v55, %v3643_v48  ;;  %v2950_v63 = vpop.f32.mrf.mxu2 }
 0x2ce   : > { %v2990_v41 = vadd.f32 %v2950_v63, %v2703_v51 }
 0x2cf   : > { %v4073_v10 = vadd.f32 %v4072_v19, %v4041_v36  ;;  %v4114_v46 = vmul.f32 %v4041_v36, %v4041_v36 }
 0x2d1   : > { %v4145_v62 = vadd.f32 %v4144_v58, %v4114_v46  ;;  %v4002_v29 = vpop.f32.mrf.mxu0 }
 0x2d2   : > { %v3604_v38 = vpop.f32.mrf.mxu3 }
 0x2d3   : > { %v3644_v49 = vadd.f32 %v3604_v38, %v2990_v41  ;;  %v2668_v21 = vpop.f32.mrf.mxu1 }
 0x2d4   : > { %v2705_v18 = vadd.f32 %v2668_v21, %v6007_v3 }
 0x2d5   : > { %v4042_v39 = vadd.f32 %v4002_v29, %v3644_v49  ;;  %v2953_v16 = vpop.f32.mrf.mxu2 }
 0x2d6   : > { %v2991_v28 = vadd.f32 %v2953_v16, %v2704_v2 }
 0x2d7   : > { %v4074_v42 = vadd.f32 %v4073_v10, %v4042_v39  ;;  %v4115_v25 = vmul.f32 %v4042_v39, %v4042_v39  ;;  %v4047_v10 = vld [vmem:[#allocation2] sm:$0x1] }
 0x2d9   : > { %v4146_v60 = vadd.f32 %v4145_v62, %v4115_v25  ;;  %v4005_v40 = vpop.f32.mrf.mxu0  ;;  %v4087_v62 = vld [vmem:[#allocation2 + $0x1] sm:$0x1] }
 0x2da   : > { %v3607_v34 = vpop.f32.mrf.mxu3 }
 0x2db   : > { %v3645_v6 = vadd.f32 %v3607_v34, %v2991_v28  ;;  %v2671_v20 = vpop.f32.mrf.mxu1 }
 0x2dc   : > { %v2706_v26 = vadd.f32 %v2671_v20, %v6026_v37 }
 0x2dd   : > { %v4043_v59 = vadd.f32 %v4005_v40, %v3645_v6  ;;  %v2955_v35 = vpop.f32.mrf.mxu2 }
 0x2de   : > { %v2992_v9 = vadd.f32 %v2955_v35, %v2705_v18 }
 0x2df   : > { %v4075_v13 = vadd.f32 %v4074_v42, %v4043_v59  ;;  %v4116_v45 = vmul.f32 %v4043_v59, %v4043_v59 }
 0x2e1   : > { %v4147_v14 = vadd.f32 %v4146_v60, %v4116_v45  ;;  %v4007_v15 = vpop.f32.mrf.mxu0 }
 0x2e2   : > { %v3609_v24 = vpop.f32.mrf.mxu3 }
 0x2e3   : > { %v3646_v30 = vadd.f32 %v3609_v24, %v2992_v9  ;;  %v2673_v57 = vpop.f32.mrf.mxu1 }
 0x2e4   : > { %v2707_v53 = vadd.f32 %v2673_v57, %v6323_v47 }
 0x2e5   : > { %v4044_v52 = vadd.f32 %v4007_v15, %v3646_v30  ;;  %v2958_v17 = vpop.f32.mrf.mxu2 }
 0x2e6   : > { %v2993_v61 = vadd.f32 %v2958_v17, %v2706_v26 }
 0x2e7   : > { %v4076_v0 = vadd.f32 %v4075_v13, %v4044_v52  ;;  %v4117_v27 = vmul.f32 %v4044_v52, %v4044_v52 }
 0x2e9   : > { %v4148_v33 = vadd.f32 %v4147_v14, %v4117_v27  ;;  %v4010_v54 = vpop.f32.mrf.mxu0 }
 0x2ea   : > { %v3612_v3 = vpop.f32.mrf.mxu3 }
 0x2eb   : > { %v3647_v43 = vadd.f32 %v3612_v3, %v2993_v61 }
 0x2ed   : > { %v4045_v32 = vadd.f32 %v4010_v54, %v3647_v43  ;;  %v2960_v4 = vpop.f32.mrf.mxu2 }
 0x2ee   : > { %v2994_v22 = vadd.f32 %v2960_v4, %v2707_v53 }
 0x2ef   : > { %v4077_v23 = vadd.f32 %v4076_v0, %v4045_v32  ;;  %v4118_v44 = vmul.f32 %v4045_v32, %v4045_v32 }
 0x2f1   : > { %v4149_v1 = vadd.f32 %v4148_v33, %v4118_v44  ;;  %v4012_v37 = vpop.f32.mrf.mxu0 }
 0x2f2   : > { %v3614_v12 = vpop.f32.mrf.mxu3 }
 0x2f3   : > { %v3648_v50 = vadd.f32 %v3614_v12, %v2994_v22 }
 0x2f5   : > { %v4046_v8 = vadd.f32 %v4012_v37, %v3648_v50 }
 0x2f7   : > { %v4078_v56 = vadd.f32 %v4077_v23, %v4046_v8  ;;  %v4119_v19 = vmul.f32 %v4046_v8, %v4046_v8 }
 0x2f9   : > { %v4079_v11 = vrot.slane %v4078_v56, 4  ;;  %v4150_v31 = vadd.f32 %v4149_v1, %v4119_v19 }
 0x2fb   : > { %v4080_v58 = vadd.f32 %v4079_v11, %v4078_v56  ;;  %v4151_v55 = vrot.slane %v4150_v31, 4 }
 0x2fd   : > { %v4081_v7 = vrot.slane %v4080_v58, 2  ;;  %v4152_v48 = vadd.f32 %v4151_v55, %v4150_v31 }
 0x2ff   : > { %v4082_v5 = vadd.f32 %v4081_v7, %v4080_v58  ;;  %v4153_v36 = vrot.slane %v4152_v48, 2 }
 0x301   : > { %v4083_v51 = vrot.slane %v4082_v5, 1  ;;  %v4154_v63 = vadd.f32 %v4153_v36, %v4152_v48 }
 0x303   : > { %v4084_v46 = vadd.f32 %v4083_v51, %v4082_v5  ;;  %v4155_v41 = vrot.slane %v4154_v63, 1 }
 0x305   : > { %v4085_v29 = vadd.f32 %v4084_v46, %v4047_v10  ;;  %v4156_v38 = vadd.f32 %v4155_v41, %v4154_v63 }
 0x307   : > { %4086 = vst [vmem:[#allocation2] sm:$0x1] %v4085_v29  ;;  %v4157_v49 = vadd.f32 %v4156_v38, %v4087_v62 }
 0x309   : > { %4158 = vst [vmem:[#allocation2 + $0x1] sm:$0x1] %v4157_v49 }
 0x30a   : > { %4854 = dma.vmem_to_hbm [thread:$0]  (%p4857_p5), %s4166_s7, 32, %s4168_s12, [#allocation3]  }
 0x30b   : > { %4952 = dma.done.wait (%p4857_p5), [#allocation3], 32  }
 0x30c   : > { %4954 = vsyncadd (%p4857_p5), [#allocation3], 4294967264 }
 0x30d PF: > { %s13_s9 = sadd.s32 1, %s4957_s9  }
 0x30e   : > { %p10_p6 = scmp.ge.s32.totalorder %s13_s9, 4  }
 0x310   :  { %12 = sbr.rel (!%p10_p6) target bundleno = 1 (0x1), region = 69 }
 0x315   :  { %4181 = vsyncpa [#allocation3], 1 }
 0x316   :  { %4183 = vsyncpa [#allocation3 + $0x1], 1 }

</bundles_post_ra>
